<compile_context>
chip_gen: v7x
topology: tpu7x:2x2x1
jax: 0.10.0
libtpu: 0.0.40
codegen_flags: <defaults>
</compile_context>

<pallas_src>
import functools

import jax
import jax.numpy as jnp
from jax.experimental import pallas as pl
from jax.experimental.pallas import tpu as pltpu


# ---------------------------------------------------------------------------
# Helpers
# ---------------------------------------------------------------------------
def _round_up(x, m):
    return (x + m - 1) // m * m


def _choose_m_tiling(M, base=16, max_tm=512):
    """Return (TM, Mp): TM multiple of `base`, Mp = ntiles*TM >= M.

    Prefers 2-4 M tiles (so v7x megacore has parallel work) whenever that costs
    little extra padding; caps TM at `max_tm` for large M so per-buffer VMEM
    stays bounded.
    """
    single = _round_up(M, base)
    if single <= max_tm:
        for ntiles in (2, 3, 4):
            tm = _round_up(-(-M // ntiles), base)
            mp = tm * ntiles
            # accept only if padding stays modest and every tile has real rows
            if mp <= single + max(base, single // 8) and tm * (ntiles - 1) < M:
                return tm, mp
        return single, single
    return max_tm, _round_up(M, max_tm)


def _choose_k_tiling(Kp, TM, budget_bytes=6 * 1024 * 1024):
    """Largest multiple-of-128 divisor of Kp whose (4*TM, TK) bf16 A block fits
    the per-buffer budget (the pipeline double-buffers it)."""
    d = Kp // 128
    best = 128
    for f in range(1, d + 1):
        if d % f == 0:
            tk = 128 * f
            if 4 * TM * tk * 2 <= budget_bytes:
                best = tk
    return best


# ---------------------------------------------------------------------------
# Kernel 1: fused conv-as-matmul + bias + PReLU + 2x2 max-pool
#   A    : (nmt*4*TM, Kp) bf16 -- per M tile, the 4 pool taps stacked as rows
#   W    : (Kp, Np)       bf16
#   bias : (1, Np)        f32 (VMEM row)
#   alpha: (1,)           f32 (SMEM scalar, PReLU slope)
#   out  : (Mp, Np)       bf16, lane-dense (Np multiple of 128)
# Grid = (Mp//TM, Np//TN, Kp//TK); one MXU dot per K step.
# ---------------------------------------------------------------------------
def _conv_pool_epilogue(acc, bias, alpha, tm, o_ref):
    def act(t):
        y = acc[t * tm:(t + 1) * tm, :] + bias
        return jnp.where(y >= 0.0, y, alpha * y)     # PReLU before pool: exact
    o_ref[...] = jnp.maximum(jnp.maximum(act(0), act(1)),
                             jnp.maximum(act(2), act(3))).astype(o_ref.dtype)


def _conv_pool_kernel_1k(a_ref, w_ref, b_ref, alpha_ref, o_ref, *, tm):
    # Single K step: no scratch accumulator, dot straight into the epilogue.
    acc = jnp.dot(a_ref[...], w_ref[...], preferred_element_type=jnp.float32)
    _conv_pool_epilogue(acc, b_ref[...], alpha_ref[0], tm, o_ref)


def _conv_pool_kernel_mk(a_ref, w_ref, b_ref, alpha_ref, o_ref, acc_ref, *, tm):
    k = pl.program_id(2)

    @pl.when(k == 0)
    def _init():
        acc_ref[...] = jnp.zeros_like(acc_ref)

    acc_ref[...] += jnp.dot(a_ref[...], w_ref[...],
                            preferred_element_type=jnp.float32)

    @pl.when(k == pl.num_programs(2) - 1)
    def _finish():
        _conv_pool_epilogue(acc_ref[...], b_ref[...], alpha_ref[0], tm, o_ref)


def _pool_tap_patches(x, k):
    """im2col arranged so the 4 taps of each 2x2 pool window sit on axis 0.

    x: (N, H, W, C) NHWC. Returns (patches(4, M, K), (N, PH, PW)) where
    patches[t, n*PH*PW + ph*PW + pw, :] is the (kh, kw, cin)-flattened patch of
    conv output position (2*ph + t//2, 2*pw + t%2).
    """
    N, H, W, C = x.shape
    OH, OW = H - k + 1, W - k + 1
    PH, PW = OH // 2, OW // 2
    cols = [x[:, kh:kh + OH, kw:kw + OW, :] for kh in range(k) for kw in range(k)]
    p = jnp.stack(cols, axis=3).reshape(N, OH, OW, k * k * C)
    taps = [p[:, dh:2 * PH:2, dw:2 * PW:2, :].reshape(N * PH * PW, k * k * C)
            for dh in (0, 1) for dw in (0, 1)]
    return jnp.stack(taps, axis=0), (N, PH, PW)


def conv_prelu_pool(x, w_oihw, b, alpha, *, ksize=9,
                    compute_dtype=jnp.bfloat16, out_dtype=jnp.bfloat16):
    """Conv2d(valid, stride 1) + PReLU + MaxPool2d(2,2) as one fused Pallas call."""
    Cout = w_oihw.shape[0]
    patches, (N, PH, PW) = _pool_tap_patches(x, ksize)   # (4, M, K)
    M, K = patches.shape[1], patches.shape[2]
    w_mat = jnp.transpose(w_oihw, (2, 3, 1, 0)).reshape(K, Cout)  # rows=(kh,kw,cin)

    cdt = jnp.dtype(compute_dtype)
    Kp = _round_up(K, 128)
    Np = _round_up(Cout, 128)          # pad Cout -> lane-dense (unmasked) stores
    TN = 128
    TM, Mp = _choose_m_tiling(M)
    TK = _choose_k_tiling(Kp, TM)
    nmt, nk = Mp // TM, Kp // TK

    # Pad, then regroup so each (4*TM)-row block holds one M tile's 4 taps.
    a = jnp.zeros((4, Mp, Kp), cdt).at[:, :M, :K].set(patches.astype(cdt))
    a = a.reshape(4, nmt, TM, Kp).transpose(1, 0, 2, 3).reshape(nmt * 4 * TM, Kp)
    wp = jnp.zeros((Kp, Np), cdt).at[:K, :Cout].set(w_mat.astype(cdt))
    bias = jnp.zeros((1, Np), jnp.float32).at[0, :Cout].set(
        jnp.asarray(b, jnp.float32))
    alpha_arr = jnp.asarray(alpha, jnp.float32).reshape(1)

    if nk == 1:
        kernel = functools.partial(_conv_pool_kernel_1k, tm=TM)
        scratch = []
    else:
        kernel = functools.partial(_conv_pool_kernel_mk, tm=TM)
        scratch = [pltpu.VMEM((4 * TM, TN), jnp.float32)]

    cost = pl.CostEstimate(
        flops=2 * 4 * Mp * Np * Kp,
        transcendentals=0,
        bytes_accessed=(4 * Mp * Kp + Kp * Np) * cdt.itemsize
                       + Mp * Np * jnp.dtype(out_dtype).itemsize,
    )
    out = pl.pallas_call(
        kernel,
        out_shape=jax.ShapeDtypeStruct((Mp, Np), out_dtype),
        grid=(nmt, Np // TN, nk),
        in_specs=[
            pl.BlockSpec((4 * TM, TK), lambda m, n, k: (m, k)),
            pl.BlockSpec((TK, TN), lambda m, n, k: (k, n)),
            pl.BlockSpec((1, TN), lambda m, n, k: (0, n)),
            pl.BlockSpec(memory_space=pltpu.MemorySpace.SMEM),   # PReLU alpha
        ],
        out_specs=pl.BlockSpec((TM, TN), lambda m, n, k: (m, n)),
        scratch_shapes=scratch,
        compiler_params=pltpu.CompilerParams(
            dimension_semantics=("parallel", "parallel", "arbitrary"),
            # Not binding at these block sizes (<1 MiB per buffer); make this
            # generation-aware if tiles are grown toward the roofline regime.
            vmem_limit_bytes=32 * 1024 * 1024),
        cost_estimate=cost,
    )(a, wp, bias, alpha_arr)

    return out[:M, :Cout].reshape(N, PH, PW, Cout)


# ---------------------------------------------------------------------------
# Kernel 2: fused fc1->PReLU->fc2->PReLU->fc3
#   bf16 operands on the MXU, f32 accumulation, all (tiny) weights VMEM-resident.
# TODO(synk): real Linear(484416, 256) needs a K-tiled grid + f32 accumulator
#   (same pattern as the conv kernel) -- it cannot be VMEM-resident anywhere.
# ---------------------------------------------------------------------------
def _fc_stack_kernel(x_ref, w1_ref, b1_ref, w2_ref, b2_ref, w3_ref, b3_ref,
                     al_ref, o_ref):
    h = jnp.dot(x_ref[...], w1_ref[...],
                preferred_element_type=jnp.float32) + b1_ref[...]
    h = jnp.where(h >= 0.0, h, al_ref[0] * h)
    h = jnp.dot(h.astype(jnp.bfloat16), w2_ref[...],
                preferred_element_type=jnp.float32) + b2_ref[...]
    h = jnp.where(h >= 0.0, h, al_ref[1] * h)
    y = jnp.dot(h.astype(jnp.bfloat16), w3_ref[...],
                preferred_element_type=jnp.float32) + b3_ref[...]
    o_ref[...] = y.astype(o_ref.dtype)


def fc_stack(x, w1, b1, a1, w2, b2, a2, w3, b3):
    M, K1 = x.shape
    N1, N2, N3 = w1.shape[1], w2.shape[1], w3.shape[1]
    Mp = _round_up(max(M, 16), 16)     # bf16 sublane-pack friendly
    cdt = jnp.bfloat16
    xp = jnp.zeros((Mp, K1), cdt).at[:M].set(x.astype(cdt))
    alphas = jnp.stack([jnp.asarray(a1, jnp.float32).reshape(()),
                        jnp.asarray(a2, jnp.float32).reshape(())])
    b1r = jnp.asarray(b1, jnp.float32).reshape(1, N1)
    b2r = jnp.asarray(b2, jnp.float32).reshape(1, N2)
    b3r = jnp.asarray(b3, jnp.float32).reshape(1, N3)
    full = lambda i: (0, 0)
    out = pl.pallas_call(
        _fc_stack_kernel,
        out_shape=jax.ShapeDtypeStruct((Mp, N3), jnp.float32),
        grid=(1,),
        in_specs=[
            pl.BlockSpec((Mp, K1), full),
            pl.BlockSpec((K1, N1), full),
            pl.BlockSpec((1, N1), full),
            pl.BlockSpec((N1, N2), full),
            pl.BlockSpec((1, N2), full),
            pl.BlockSpec((N2, N3), full),
            pl.BlockSpec((1, N3), full),
            pl.BlockSpec(memory_space=pltpu.MemorySpace.SMEM),   # PReLU alphas
        ],
        out_specs=pl.BlockSpec((Mp, N3), full),
        compiler_params=pltpu.CompilerParams(
            dimension_semantics=("arbitrary",),
            vmem_limit_bytes=32 * 1024 * 1024),
        cost_estimate=pl.CostEstimate(
            flops=2 * Mp * (K1 * N1 + N1 * N2 + N2 * N3),
            transcendentals=0,
            bytes_accessed=2 * (Mp * K1 + K1 * N1 + N1 * N2 + N2 * N3)
                           + 4 * Mp * N3),
    )(xp, jnp.asarray(w1, cdt), b1r,
      jnp.asarray(w2, cdt), b2r,
      jnp.asarray(w3, cdt), b3r, alphas)
    return out[:M]


# ---------------------------------------------------------------------------
# EmbeddingNet forward
# ---------------------------------------------------------------------------
def embedding_net_forward(x_nchw, p):
    x = jnp.transpose(x_nchw, (0, 2, 3, 1))  # NCHW -> NHWC (input only, once)
    y = conv_prelu_pool(x, p["conv1_w"], p["conv1_b"], p["prelu1_a"])
    y = conv_prelu_pool(y, p["conv2_w"], p["conv2_b"], p["prelu2_a"])
    # NHWC flatten; PyTorch's NCHW .view(N,-1) ordering is folded into fc1_w.
    y = y.reshape(y.shape[0], -1)
    return fc_stack(y, p["fc1_w_nhwc"], p["fc1_b"], p["prelu3_a"],
                    p["fc2_w"], p["fc2_b"], p["prelu4_a"],
                    p["fc3_w"], p["fc3_b"])


def fold_flatten_into_fc1(fc1_w, c, h, w):
    """Permute fc1 rows (given in PyTorch NCHW-flatten order) to NHWC order."""
    n_out = fc1_w.shape[1]
    return (fc1_w.reshape(c, h, w, n_out)
                 .transpose(1, 2, 0, 3)
                 .reshape(h * w * c, n_out))


def init_params(key, conv_out_chw):
    C2, Hc, Wc = conv_out_chw
    flat_dim = C2 * Hc * Wc
    ks = jax.random.split(key, 10)
    s = 0.05
    p = {
        "conv1_w": s * jax.random.normal(ks[0], (32, 3, 9, 9), jnp.float32),
        "conv1_b": s * jax.random.normal(ks[1], (32,), jnp.float32),
        "conv2_w": s * jax.random.normal(ks[2], (64, 32, 9, 9), jnp.float32),
        "conv2_b": s * jax.random.normal(ks[3], (64,), jnp.float32),
        "fc1_w": s * jax.random.normal(ks[4], (flat_dim, 256), jnp.float32),
        "fc1_b": s * jax.random.normal(ks[5], (256,), jnp.float32),
        "fc2_w": s * jax.random.normal(ks[6], (256, 256), jnp.float32),
        "fc2_b": s * jax.random.normal(ks[7], (256,), jnp.float32),
        "fc3_w": s * jax.random.normal(ks[8], (256, 128), jnp.float32),
        "fc3_b": s * jax.random.normal(ks[9], (128,), jnp.float32),
        "prelu1_a": 0.25,  # nn.PReLU() default init (num_parameters=1)
        "prelu2_a": 0.25,
        "prelu3_a": 0.25,
        "prelu4_a": 0.25,
    }
    # Constant-fold PyTorch's NCHW flatten into fc1 (done once, off the hot path).
    p["fc1_w_nhwc"] = fold_flatten_into_fc1(p["fc1_w"], C2, Hc, Wc)
    return p


if __name__ == "__main__":
    key = jax.random.PRNGKey(0)
    kx, kp = jax.random.split(key)

    # small input: (N=2, C=3, H=36, W=36)
    # conv1(9) -> 28, pool -> 14, conv2(9) -> 6, pool -> 3 => flatten 64*3*3 = 576
    x = jax.random.normal(kx, (2, 3, 36, 36), jnp.float32)
    params = init_params(kp, conv_out_chw=(64, 3, 3))

    fwd = jax.jit(embedding_net_forward)
    out = jax.block_until_ready(fwd(x, params))
    assert out.shape == (2, 128), out.shape
    assert bool(jnp.all(jnp.isfinite(out)))
    print("KERNEL_OK")
</pallas_src>

<mosaic_0001>
module attributes {stable_mosaic.version = 11 : i64} {
  func.func @_conv_pool_kernel_1k(%arg0: i32, %arg1: i32, %arg2: i32, %arg3: memref<832x256xbf16, #tpu.memory_space<vmem>>, %arg4: memref<256x128xbf16, #tpu.memory_space<vmem>>, %arg5: memref<1x128xf32, #tpu.memory_space<vmem>>, %arg6: memref<1xf32, #tpu.memory_space<smem>>, %arg7: memref<208x128xbf16, #tpu.memory_space<vmem>>) attributes {dimension_semantics = [#tpu.dimension_semantics<parallel>, #tpu.dimension_semantics<parallel>, #tpu.dimension_semantics<arbitrary>], iteration_bounds = array<i64: 2, 1, 1>, scalar_prefetch = 0 : i64, scratch_operands = 0 : i64, tpu.core_type = #tpu.core_type<tc>, window_params = [{transform_indices = @transform_0, window_bounds = array<i64: 832, 256>}, {transform_indices = @transform_1, window_bounds = array<i64: 256, 128>}, {transform_indices = @transform_2, window_bounds = array<i64: 1, 128>}, {transform_indices = @transform_3, window_bounds = array<i64: 1>}, {transform_indices = @transform_4, window_bounds = array<i64: 208, 128>}]} {
    %c0 = arith.constant 0 : index
    %c0_0 = arith.constant 0 : index
    %0 = vector.load %arg3[%c0, %c0_0] : memref<832x256xbf16, #tpu.memory_space<vmem>>, vector<832x256xbf16>
    %c0_1 = arith.constant 0 : index
    %c0_2 = arith.constant 0 : index
    %1 = vector.load %arg4[%c0_1, %c0_2] : memref<256x128xbf16, #tpu.memory_space<vmem>>, vector<256x128xbf16>
    %cst = arith.constant dense<0.000000e+00> : vector<832x128xf32>
    %2 = tpu.matmul %0, %1, %cst {dimension_numbers = #tpu.dot_dimension_numbers<[1], [0], [0], [1], [0, 0, 1, 1], [], []>} : vector<832x256xbf16>, vector<256x128xbf16>, vector<832x128xf32> -> vector<832x128xf32>
    %c0_3 = arith.constant 0 : index
    %c0_4 = arith.constant 0 : index
    %3 = vector.load %arg5[%c0_3, %c0_4] : memref<1x128xf32, #tpu.memory_space<vmem>>, vector<1x128xf32>
    %c0_5 = arith.constant 0 : index
    %4 = memref.load %arg6[%c0_5] : memref<1xf32, #tpu.memory_space<smem>>
    %5 = vector.extract_strided_slice %2 {offsets = [0, 0], sizes = [208, 128], strides = [1, 1]} : vector<832x128xf32> to vector<208x128xf32>
    %6 = vector.broadcast %3 : vector<1x128xf32> to vector<208x128xf32>
    %7 = arith.addf %5, %6 : vector<208x128xf32>
    %cst_6 = arith.constant 0.000000e+00 : f32
    %8 = vector.broadcast %cst_6 : f32 to vector<208x128xf32>
    %9 = arith.cmpf oge, %7, %8 : vector<208x128xf32>
    %10 = vector.broadcast %4 : f32 to vector<208x128xf32>
    %11 = arith.mulf %10, %7 : vector<208x128xf32>
    %12 = arith.select %9, %7, %11 : vector<208x128xi1>, vector<208x128xf32>
    %13 = vector.extract_strided_slice %2 {offsets = [208, 0], sizes = [208, 128], strides = [1, 1]} : vector<832x128xf32> to vector<208x128xf32>
    %14 = vector.broadcast %3 : vector<1x128xf32> to vector<208x128xf32>
    %15 = arith.addf %13, %14 : vector<208x128xf32>
    %cst_7 = arith.constant 0.000000e+00 : f32
    %16 = vector.broadcast %cst_7 : f32 to vector<208x128xf32>
    %17 = arith.cmpf oge, %15, %16 : vector<208x128xf32>
    %18 = vector.broadcast %4 : f32 to vector<208x128xf32>
    %19 = arith.mulf %18, %15 : vector<208x128xf32>
    %20 = arith.select %17, %15, %19 : vector<208x128xi1>, vector<208x128xf32>
    %21 = arith.maximumf %12, %20 : vector<208x128xf32>
    %22 = vector.extract_strided_slice %2 {offsets = [416, 0], sizes = [208, 128], strides = [1, 1]} : vector<832x128xf32> to vector<208x128xf32>
    %23 = vector.broadcast %3 : vector<1x128xf32> to vector<208x128xf32>
    %24 = arith.addf %22, %23 : vector<208x128xf32>
    %cst_8 = arith.constant 0.000000e+00 : f32
    %25 = vector.broadcast %cst_8 : f32 to vector<208x128xf32>
    %26 = arith.cmpf oge, %24, %25 : vector<208x128xf32>
    %27 = vector.broadcast %4 : f32 to vector<208x128xf32>
    %28 = arith.mulf %27, %24 : vector<208x128xf32>
    %29 = arith.select %26, %24, %28 : vector<208x128xi1>, vector<208x128xf32>
    %30 = vector.extract_strided_slice %2 {offsets = [624, 0], sizes = [208, 128], strides = [1, 1]} : vector<832x128xf32> to vector<208x128xf32>
    %31 = vector.broadcast %3 : vector<1x128xf32> to vector<208x128xf32>
    %32 = arith.addf %30, %31 : vector<208x128xf32>
    %cst_9 = arith.constant 0.000000e+00 : f32
    %33 = vector.broadcast %cst_9 : f32 to vector<208x128xf32>
    %34 = arith.cmpf oge, %32, %33 : vector<208x128xf32>
    %35 = vector.broadcast %4 : f32 to vector<208x128xf32>
    %36 = arith.mulf %35, %32 : vector<208x128xf32>
    %37 = arith.select %34, %32, %36 : vector<208x128xi1>, vector<208x128xf32>
    %38 = arith.maximumf %29, %37 : vector<208x128xf32>
    %39 = arith.maximumf %21, %38 : vector<208x128xf32>
    %40 = arith.truncf %39 : vector<208x128xf32> to vector<208x128xbf16>
    %c0_10 = arith.constant 0 : index
    %c0_11 = arith.constant 0 : index
    %41 = vector.load %arg7[%c0_10, %c0_11] : memref<208x128xbf16, #tpu.memory_space<vmem>>, vector<208x128xbf16>
    tpu.vector_store %arg7[%c0_10, %c0_11], %40 {strides = array<i32>} : memref<208x128xbf16, #tpu.memory_space<vmem>>, vector<208x128xbf16>,
    return
  }
  func.func @transform_0(%arg0: i32, %arg1: i32, %arg2: i32) -> (i32, i32) {
    %c0_i32 = arith.constant 0 : i32
    return %arg0, %arg2 : i32, i32
  }
  func.func @transform_1(%arg0: i32, %arg1: i32, %arg2: i32) -> (i32, i32) {
    %c0_i32 = arith.constant 0 : i32
    return %arg2, %arg1 : i32, i32
  }
  func.func @transform_2(%arg0: i32, %arg1: i32, %arg2: i32) -> (i32, i32) {
    %c0_i32 = arith.constant 0 : i32
    %c0_i32_0 = arith.constant 0 : i32
    return %c0_i32, %arg1 : i32, i32
  }
  func.func @transform_3(%arg0: i32, %arg1: i32, %arg2: i32) -> i32 {
    %c0_i32 = arith.constant 0 : i32
    %c0_i32_0 = arith.constant 0 : i32
    return %c0_i32 : i32
  }
  func.func @transform_4(%arg0: i32, %arg1: i32, %arg2: i32) -> (i32, i32) {
    %c0_i32 = arith.constant 0 : i32
    return %arg0, %arg1 : i32, i32
  }
}

module attributes {stable_mosaic.version = 11 : i64} {
  func.func @_conv_pool_kernel_1k(%arg0: i32, %arg1: i32, %arg2: i32, %arg3: memref<64x2688xbf16, #tpu.memory_space<vmem>>, %arg4: memref<2688x128xbf16, #tpu.memory_space<vmem>>, %arg5: memref<1x128xf32, #tpu.memory_space<vmem>>, %arg6: memref<1xf32, #tpu.memory_space<smem>>, %arg7: memref<16x128xbf16, #tpu.memory_space<vmem>>) attributes {dimension_semantics = [#tpu.dimension_semantics<parallel>, #tpu.dimension_semantics<parallel>, #tpu.dimension_semantics<arbitrary>], iteration_bounds = array<i64: 2, 1, 1>, scalar_prefetch = 0 : i64, scratch_operands = 0 : i64, tpu.core_type = #tpu.core_type<tc>, window_params = [{transform_indices = @transform_0, window_bounds = array<i64: 64, 2688>}, {transform_indices = @transform_1, window_bounds = array<i64: 2688, 128>}, {transform_indices = @transform_2, window_bounds = array<i64: 1, 128>}, {transform_indices = @transform_3, window_bounds = array<i64: 1>}, {transform_indices = @transform_4, window_bounds = array<i64: 16, 128>}]} {
    %c0 = arith.constant 0 : index
    %c0_0 = arith.constant 0 : index
    %0 = vector.load %arg3[%c0, %c0_0] : memref<64x2688xbf16, #tpu.memory_space<vmem>>, vector<64x2688xbf16>
    %c0_1 = arith.constant 0 : index
    %c0_2 = arith.constant 0 : index
    %1 = vector.load %arg4[%c0_1, %c0_2] : memref<2688x128xbf16, #tpu.memory_space<vmem>>, vector<2688x128xbf16>
    %cst = arith.constant dense<0.000000e+00> : vector<64x128xf32>
    %2 = tpu.matmul %0, %1, %cst {dimension_numbers = #tpu.dot_dimension_numbers<[1], [0], [0], [1], [0, 0, 1, 1], [], []>} : vector<64x2688xbf16>, vector<2688x128xbf16>, vector<64x128xf32> -> vector<64x128xf32>
    %c0_3 = arith.constant 0 : index
    %c0_4 = arith.constant 0 : index
    %3 = vector.load %arg5[%c0_3, %c0_4] : memref<1x128xf32, #tpu.memory_space<vmem>>, vector<1x128xf32>
    %c0_5 = arith.constant 0 : index
    %4 = memref.load %arg6[%c0_5] : memref<1xf32, #tpu.memory_space<smem>>
    %5 = vector.extract_strided_slice %2 {offsets = [0, 0], sizes = [16, 128], strides = [1, 1]} : vector<64x128xf32> to vector<16x128xf32>
    %6 = vector.broadcast %3 : vector<1x128xf32> to vector<16x128xf32>
    %7 = arith.addf %5, %6 : vector<16x128xf32>
    %cst_6 = arith.constant 0.000000e+00 : f32
    %8 = vector.broadcast %cst_6 : f32 to vector<16x128xf32>
    %9 = arith.cmpf oge, %7, %8 : vector<16x128xf32>
    %10 = vector.broadcast %4 : f32 to vector<16x128xf32>
    %11 = arith.mulf %10, %7 : vector<16x128xf32>
    %12 = arith.select %9, %7, %11 : vector<16x128xi1>, vector<16x128xf32>
    %13 = vector.extract_strided_slice %2 {offsets = [16, 0], sizes = [16, 128], strides = [1, 1]} : vector<64x128xf32> to vector<16x128xf32>
    %14 = vector.broadcast %3 : vector<1x128xf32> to vector<16x128xf32>
    %15 = arith.addf %13, %14 : vector<16x128xf32>
    %cst_7 = arith.constant 0.000000e+00 : f32
    %16 = vector.broadcast %cst_7 : f32 to vector<16x128xf32>
    %17 = arith.cmpf oge, %15, %16 : vector<16x128xf32>
    %18 = vector.broadcast %4 : f32 to vector<16x128xf32>
    %19 = arith.mulf %18, %15 : vector<16x128xf32>
    %20 = arith.select %17, %15, %19 : vector<16x128xi1>, vector<16x128xf32>
    %21 = arith.maximumf %12, %20 : vector<16x128xf32>
    %22 = vector.extract_strided_slice %2 {offsets = [32, 0], sizes = [16, 128], strides = [1, 1]} : vector<64x128xf32> to vector<16x128xf32>
    %23 = vector.broadcast %3 : vector<1x128xf32> to vector<16x128xf32>
    %24 = arith.addf %22, %23 : vector<16x128xf32>
    %cst_8 = arith.constant 0.000000e+00 : f32
    %25 = vector.broadcast %cst_8 : f32 to vector<16x128xf32>
    %26 = arith.cmpf oge, %24, %25 : vector<16x128xf32>
    %27 = vector.broadcast %4 : f32 to vector<16x128xf32>
    %28 = arith.mulf %27, %24 : vector<16x128xf32>
    %29 = arith.select %26, %24, %28 : vector<16x128xi1>, vector<16x128xf32>
    %30 = vector.extract_strided_slice %2 {offsets = [48, 0], sizes = [16, 128], strides = [1, 1]} : vector<64x128xf32> to vector<16x128xf32>
    %31 = vector.broadcast %3 : vector<1x128xf32> to vector<16x128xf32>
    %32 = arith.addf %30, %31 : vector<16x128xf32>
    %cst_9 = arith.constant 0.000000e+00 : f32
    %33 = vector.broadcast %cst_9 : f32 to vector<16x128xf32>
    %34 = arith.cmpf oge, %32, %33 : vector<16x128xf32>
    %35 = vector.broadcast %4 : f32 to vector<16x128xf32>
    %36 = arith.mulf %35, %32 : vector<16x128xf32>
    %37 = arith.select %34, %32, %36 : vector<16x128xi1>, vector<16x128xf32>
    %38 = arith.maximumf %29, %37 : vector<16x128xf32>
    %39 = arith.maximumf %21, %38 : vector<16x128xf32>
    %40 = arith.truncf %39 : vector<16x128xf32> to vector<16x128xbf16>
    %c0_10 = arith.constant 0 : index
    %c0_11 = arith.constant 0 : index
    %41 = vector.load %arg7[%c0_10, %c0_11] : memref<16x128xbf16, #tpu.memory_space<vmem>>, vector<16x128xbf16>
    tpu.vector_store %arg7[%c0_10, %c0_11], %40 {strides = array<i32>} : memref<16x128xbf16, #tpu.memory_space<vmem>>, vector<16x128xbf16>,
    return
  }
  func.func @transform_0(%arg0: i32, %arg1: i32, %arg2: i32) -> (i32, i32) {
    %c0_i32 = arith.constant 0 : i32
    return %arg0, %arg2 : i32, i32
  }
  func.func @transform_1(%arg0: i32, %arg1: i32, %arg2: i32) -> (i32, i32) {
    %c0_i32 = arith.constant 0 : i32
    return %arg2, %arg1 : i32, i32
  }
  func.func @transform_2(%arg0: i32, %arg1: i32, %arg2: i32) -> (i32, i32) {
    %c0_i32 = arith.constant 0 : i32
    %c0_i32_0 = arith.constant 0 : i32
    return %c0_i32, %arg1 : i32, i32
  }
  func.func @transform_3(%arg0: i32, %arg1: i32, %arg2: i32) -> i32 {
    %c0_i32 = arith.constant 0 : i32
    %c0_i32_0 = arith.constant 0 : i32
    return %c0_i32 : i32
  }
  func.func @transform_4(%arg0: i32, %arg1: i32, %arg2: i32) -> (i32, i32) {
    %c0_i32 = arith.constant 0 : i32
    return %arg0, %arg1 : i32, i32
  }
}

module attributes {stable_mosaic.version = 11 : i64} {
  func.func @_fc_stack_kernel(%arg0: i32, %arg1: memref<16x576xbf16, #tpu.memory_space<vmem>>, %arg2: memref<576x256xbf16, #tpu.memory_space<vmem>>, %arg3: memref<1x256xf32, #tpu.memory_space<vmem>>, %arg4: memref<256x256xbf16, #tpu.memory_space<vmem>>, %arg5: memref<1x256xf32, #tpu.memory_space<vmem>>, %arg6: memref<256x128xbf16, #tpu.memory_space<vmem>>, %arg7: memref<1x128xf32, #tpu.memory_space<vmem>>, %arg8: memref<2xf32, #tpu.memory_space<smem>>, %arg9: memref<16x128xf32, #tpu.memory_space<vmem>>) attributes {dimension_semantics = [#tpu.dimension_semantics<arbitrary>], iteration_bounds = array<i64: 1>, scalar_prefetch = 0 : i64, scratch_operands = 0 : i64, tpu.core_type = #tpu.core_type<tc>, window_params = [{pipeline_mode = #tpu.pipeline_mode<synchronous>, transform_indices = @transform_0, window_bounds = array<i64: 16, 576>}, {pipeline_mode = #tpu.pipeline_mode<synchronous>, transform_indices = @transform_1, window_bounds = array<i64: 576, 256>}, {pipeline_mode = #tpu.pipeline_mode<synchronous>, transform_indices = @transform_2, window_bounds = array<i64: 1, 256>}, {pipeline_mode = #tpu.pipeline_mode<synchronous>, transform_indices = @transform_3, window_bounds = array<i64: 256, 256>}, {pipeline_mode = #tpu.pipeline_mode<synchronous>, transform_indices = @transform_4, window_bounds = array<i64: 1, 256>}, {pipeline_mode = #tpu.pipeline_mode<synchronous>, transform_indices = @transform_5, window_bounds = array<i64: 256, 128>}, {pipeline_mode = #tpu.pipeline_mode<synchronous>, transform_indices = @transform_6, window_bounds = array<i64: 1, 128>}, {transform_indices = @transform_7, window_bounds = array<i64: 2>}, {pipeline_mode = #tpu.pipeline_mode<synchronous>, transform_indices = @transform_8, window_bounds = array<i64: 16, 128>}]} {
    %c0 = arith.constant 0 : index
    %c0_0 = arith.constant 0 : index
    %0 = vector.load %arg1[%c0, %c0_0] : memref<16x576xbf16, #tpu.memory_space<vmem>>, vector<16x576xbf16>
    %c0_1 = arith.constant 0 : index
    %c0_2 = arith.constant 0 : index
    %1 = vector.load %arg2[%c0_1, %c0_2] : memref<576x256xbf16, #tpu.memory_space<vmem>>, vector<576x256xbf16>
    %cst = arith.constant dense<0.000000e+00> : vector<16x256xf32>
    %2 = tpu.matmul %0, %1, %cst {dimension_numbers = #tpu.dot_dimension_numbers<[1], [0], [0], [1], [0, 0, 1, 1], [], []>} : vector<16x576xbf16>, vector<576x256xbf16>, vector<16x256xf32> -> vector<16x256xf32>
    %c0_3 = arith.constant 0 : index
    %c0_4 = arith.constant 0 : index
    %3 = vector.load %arg3[%c0_3, %c0_4] : memref<1x256xf32, #tpu.memory_space<vmem>>, vector<1x256xf32>
    %4 = vector.broadcast %3 : vector<1x256xf32> to vector<16x256xf32>
    %5 = arith.addf %2, %4 : vector<16x256xf32>
    %cst_5 = arith.constant 0.000000e+00 : f32
    %6 = vector.broadcast %cst_5 : f32 to vector<16x256xf32>
    %7 = arith.cmpf oge, %5, %6 : vector<16x256xf32>
    %c0_6 = arith.constant 0 : index
    %8 = memref.load %arg8[%c0_6] : memref<2xf32, #tpu.memory_space<smem>>
    %9 = vector.broadcast %8 : f32 to vector<16x256xf32>
    %10 = arith.mulf %9, %5 : vector<16x256xf32>
    %11 = arith.select %7, %5, %10 : vector<16x256xi1>, vector<16x256xf32>
    %12 = arith.truncf %11 : vector<16x256xf32> to vector<16x256xbf16>
    %c0_7 = arith.constant 0 : index
    %c0_8 = arith.constant 0 : index
    %13 = vector.load %arg4[%c0_7, %c0_8] : memref<256x256xbf16, #tpu.memory_space<vmem>>, vector<256x256xbf16>
    %cst_9 = arith.constant dense<0.000000e+00> : vector<16x256xf32>
    %14 = tpu.matmul %12, %13, %cst_9 {dimension_numbers = #tpu.dot_dimension_numbers<[1], [0], [0], [1], [0, 0, 1, 1], [], []>} : vector<16x256xbf16>, vector<256x256xbf16>, vector<16x256xf32> -> vector<16x256xf32>
    %c0_10 = arith.constant 0 : index
    %c0_11 = arith.constant 0 : index
    %15 = vector.load %arg5[%c0_10, %c0_11] : memref<1x256xf32, #tpu.memory_space<vmem>>, vector<1x256xf32>
    %16 = vector.broadcast %15 : vector<1x256xf32> to vector<16x256xf32>
    %17 = arith.addf %14, %16 : vector<16x256xf32>
    %cst_12 = arith.constant 0.000000e+00 : f32
    %18 = vector.broadcast %cst_12 : f32 to vector<16x256xf32>
    %19 = arith.cmpf oge, %17, %18 : vector<16x256xf32>
    %c1 = arith.constant 1 : index
    %20 = memref.load %arg8[%c1] : memref<2xf32, #tpu.memory_space<smem>>
    %21 = vector.broadcast %20 : f32 to vector<16x256xf32>
    %22 = arith.mulf %21, %17 : vector<16x256xf32>
    %23 = arith.select %19, %17, %22 : vector<16x256xi1>, vector<16x256xf32>
    %24 = arith.truncf %23 : vector<16x256xf32> to vector<16x256xbf16>
    %c0_13 = arith.constant 0 : index
    %c0_14 = arith.constant 0 : index
    %25 = vector.load %arg6[%c0_13, %c0_14] : memref<256x128xbf16, #tpu.memory_space<vmem>>, vector<256x128xbf16>
    %cst_15 = arith.constant dense<0.000000e+00> : vector<16x128xf32>
    %26 = tpu.matmul %24, %25, %cst_15 {dimension_numbers = #tpu.dot_dimension_numbers<[1], [0], [0], [1], [0, 0, 1, 1], [], []>} : vector<16x256xbf16>, vector<256x128xbf16>, vector<16x128xf32> -> vector<16x128xf32>
    %c0_16 = arith.constant 0 : index
    %c0_17 = arith.constant 0 : index
    %27 = vector.load %arg7[%c0_16, %c0_17] : memref<1x128xf32, #tpu.memory_space<vmem>>, vector<1x128xf32>
    %28 = vector.broadcast %27 : vector<1x128xf32> to vector<16x128xf32>
    %29 = arith.addf %26, %28 : vector<16x128xf32>
    %c0_18 = arith.constant 0 : index
    %c0_19 = arith.constant 0 : index
    %30 = vector.load %arg9[%c0_18, %c0_19] : memref<16x128xf32, #tpu.memory_space<vmem>>, vector<16x128xf32>
    tpu.vector_store %arg9[%c0_18, %c0_19], %29 {strides = array<i32>} : memref<16x128xf32, #tpu.memory_space<vmem>>, vector<16x128xf32>,
    return
  }
  func.func @transform_0(%arg0: i32) -> (i32, i32) {
    %c0_i32 = arith.constant 0 : i32
    %c0_i32_0 = arith.constant 0 : i32
    %c0_i32_1 = arith.constant 0 : i32
    return %c0_i32, %c0_i32_0 : i32, i32
  }
  func.func @transform_1(%arg0: i32) -> (i32, i32) {
    %c0_i32 = arith.constant 0 : i32
    %c0_i32_0 = arith.constant 0 : i32
    %c0_i32_1 = arith.constant 0 : i32
    return %c0_i32, %c0_i32_0 : i32, i32
  }
  func.func @transform_2(%arg0: i32) -> (i32, i32) {
    %c0_i32 = arith.constant 0 : i32
    %c0_i32_0 = arith.constant 0 : i32
    %c0_i32_1 = arith.constant 0 : i32
    return %c0_i32, %c0_i32_0 : i32, i32
  }
  func.func @transform_3(%arg0: i32) -> (i32, i32) {
    %c0_i32 = arith.constant 0 : i32
    %c0_i32_0 = arith.constant 0 : i32
    %c0_i32_1 = arith.constant 0 : i32
    return %c0_i32, %c0_i32_0 : i32, i32
  }
  func.func @transform_4(%arg0: i32) -> (i32, i32) {
    %c0_i32 = arith.constant 0 : i32
    %c0_i32_0 = arith.constant 0 : i32
    %c0_i32_1 = arith.constant 0 : i32
    return %c0_i32, %c0_i32_0 : i32, i32
  }
  func.func @transform_5(%arg0: i32) -> (i32, i32) {
    %c0_i32 = arith.constant 0 : i32
    %c0_i32_0 = arith.constant 0 : i32
    %c0_i32_1 = arith.constant 0 : i32
    return %c0_i32, %c0_i32_0 : i32, i32
  }
  func.func @transform_6(%arg0: i32) -> (i32, i32) {
    %c0_i32 = arith.constant 0 : i32
    %c0_i32_0 = arith.constant 0 : i32
    %c0_i32_1 = arith.constant 0 : i32
    return %c0_i32, %c0_i32_0 : i32, i32
  }
  func.func @transform_7(%arg0: i32) -> i32 {
    %c0_i32 = arith.constant 0 : i32
    %c0_i32_0 = arith.constant 0 : i32
    return %c0_i32 : i32
  }
  func.func @transform_8(%arg0: i32) -> (i32, i32) {
    %c0_i32 = arith.constant 0 : i32
    %c0_i32_0 = arith.constant 0 : i32
    %c0_i32_1 = arith.constant 0 : i32
    return %c0_i32, %c0_i32_0 : i32, i32
  }
}

</mosaic_0001>

<bundles_post_ra>
// kernel: embedding_net_forward.3
= control target key start
LH: loop header
LB: loop body
LE: loop exit
PB: predicated region body
PF: predicated region fallthrough
CT: control target
= control target key end

     0   :  { %s2790_s17 = smov 0   ;;  %s2792_s18 = smov 0   ;;  %s3608_s0 = inlined_call_operand.vmem [shape: bf16[1664,256], index: 0, kind: input, shape index: {}]   ;;  %s3609_s1 = inlined_call_operand.vmem [shape: bf16[256,128], index: 1, kind: input, shape index: {}]   ;;  %s3610_s2 = inlined_call_operand.vmem [shape: f32[1,128], index: 2, kind: input, shape index: {}]   ;;  %s3611_s3 = inlined_call_operand.<no memory space> [shape: f32[1], index: 3, kind: input, shape index: {}]   ;;  %s3612_s4 = inlined_call_operand.vmem [shape: bf16[416,128], index: 4, kind: output, shape index: {}]  }
   0x1   :  { %9 = sst [smem:[#allocation2]] %s3611_s3  ;;  %s2794_s19 = smov 0  }
   0x2 LB: > { %s34_s3 = sadd.s32 1, %s2755_s18  ;;  %p2250_p0 = scmp.ge.s32.totalorder %s2759_s19, 1  ;;  %s2759_s19 = sphi %s2794_s19, %s15_s19   ;;  %s2755_s18 = sphi %s2792_s18, %s3633_s18   ;;  %s2751_s17 = sphi %s2790_s17, %s3632_s17  }
   0x3   : > { %p36_p1 = scmp.ge.s32.totalorder %s34_s3, 2  ;;  %p217_p2 = scmp.lt.s32.totalorder %s2759_s19, 3 }
   0x5   : > { %s3635_s3 = smov (%p36_p1, %s34_s3), 0  ;;  %p218_p3 = pnand %p2250_p0, %p217_p2 }
   0x7   : > { %221 = sbr.rel (%p218_p3) target bundleno = 507 (0x1fb), region = 36 }
   0xe   : > { %v2564_v0 = vld [vmem:[%s3609_s1] sm:$0xff]   ;;  %v2761_v1 = vmov 0   ;;  %s262_s22 = smul.u32 104, %s2751_s17  ;;  %v2565_v2 = vld [vmem:[%s3609_s1 + $0x8] sm:$0xff]   ;;  %v2566_v3 = vld [vmem:[%s3609_s1 + $0x10] sm:$0xff]  }
   0xf   : > { %1048 = vmatprep.subr.bf16.mxu0 %v2761_v1  ;;  %2507 = vmatprep.subr.bf16.mxu1 %v2761_v1  ;;  %v2567_v4 = vld [vmem:[%s3609_s1 + $0x18] sm:$0xff]   ;;  %v2568_v5 = vld [vmem:[%s3609_s1 + $0x20] sm:$0xff]   ;;  %v2569_v7 = vld [vmem:[%s3609_s1 + $0x28] sm:$0xff]   ;;  %s286_s11 = smul.u32 26, %s2751_s17 }
  0x10   : > { %1049 = vmatpush1.bf16.msra.mxu0 %v2564_v0  ;;  %2523 = vmatpush1.bf16.msra.mxu1 %v2564_v0  ;;  %p264_p4 = scmp.lt.s32.totalorder %s262_s22, 207  ;;  %v2570_v9 = vld [vmem:[%s3609_s1 + $0x30] sm:$0xff]   ;;  %v2571_v10 = vld [vmem:[%s3609_s1 + $0x38] sm:$0xff]   ;;  %v2572_v11 = vld [vmem:[%s3609_s1 + $0x40] sm:$0xff]  }
  0x11   : > { %1050 = vmatprep.subr.bf16.mxu0 %v2761_v1  ;;  %2508 = vmatprep.subr.bf16.mxu1 %v2761_v1  ;;  %v2573_v12 = vld [vmem:[%s3609_s1 + $0x48] sm:$0xff]   ;;  %v2574_v13 = vld [vmem:[%s3609_s1 + $0x50] sm:$0xff]   ;;  %v2575_v14 = vld [vmem:[%s3609_s1 + $0x58] sm:$0xff]   ;;  %p3242_p5 = scmp.lt.s32.totalorder %s286_s11, 51 }
  0x12   : > { %s3637_s22 = smov (!%p264_p4, %s262_s22), 207  ;;  %v2576_v15 = vld [vmem:[%s3609_s1 + $0x60] sm:$0xff]   ;;  %v2577_v16 = vld [vmem:[%s3609_s1 + $0x68] sm:$0xff]   ;;  %v2578_v17 = vld [vmem:[%s3609_s1 + $0x70] sm:$0xff]  }
  0x13   : > { %s2403_s29 = sshll.u32 %s3637_s22, 3  ;;  %v2579_v18 = vld [vmem:[%s3609_s1 + $0x78] sm:$0xff]   ;;  %s3639_s11 = smov (!%p3242_p5, %s286_s11), 51 }
  0x14   : > { %1051 = vmatpush1.bf16.msra.mxu0 %v2565_v2  ;;  %2524 = vmatpush1.bf16.msra.mxu1 %v2565_v2  ;;  %s2837_s8 = scalar_lea.vmem %s3608_s0, %s2403_s29  ;;  %s2253_s17 = sshll.u32 %s3639_s11, 2 }
  0x15   : > { %1052 = vmatprep.subr.bf16.mxu0 %v2761_v1  ;;  %2509 = vmatprep.subr.bf16.mxu1 %v2761_v1  ;;  %v2582_v6 = vld [vmem:[%s2837_s8 + $0x4] ss:$8 sps:$4 sm:$0xff]   ;;  %v2580_v19 = vld [vmem:[%s2837_s8] ss:$8 sps:$4 sm:$0xff]   ;;  %v2586_v21 = vld [vmem:[%s2837_s8 + $0x14] ss:$8 sps:$4 sm:$0xff]   ;;  %s3292_s15 = scalar_lea.vmem %s3612_s4, %s2253_s17 }
  0x16   : > { %v2585_v8 = vld [vmem:[%s2837_s8 + $0x1a4] ss:$8 sps:$4 sm:$0xff]   ;;  %1080 = vmatprep.mubr.bf16.mxu0 %v2582_v6  ;;  %v2583_v20 = vld [vmem:[%s2837_s8 + $0x1a0] ss:$8 sps:$4 sm:$0xff]   ;;  %v2588_v22 = vld [vmem:[%s2837_s8 + $0x1b4] ss:$8 sps:$4 sm:$0xff]  }
  0x17   : > { %1288 = vmatprep.mubr.bf16.mxu1 %v2585_v8  ;;  %v2590_v23 = vld [vmem:[%s2837_s8 + $0x10] ss:$8 sps:$4 sm:$0xff]   ;;  %v2592_v25 = vld [vmem:[%s2837_s8 + $0x24] ss:$8 sps:$4 sm:$0xff]   ;;  %v2596_v27 = vld [vmem:[%s2837_s8 + $0x20] ss:$8 sps:$4 sm:$0xff]  }
  0x18   : > { %1053 = vmatpush1.bf16.msra.mxu0 %v2566_v3  ;;  %2525 = vmatpush1.bf16.msra.mxu1 %v2566_v3  ;;  %v2591_v24 = vld [vmem:[%s2837_s8 + $0x1b0] ss:$8 sps:$4 sm:$0xff]   ;;  %v2594_v26 = vld [vmem:[%s2837_s8 + $0x1c4] ss:$8 sps:$4 sm:$0xff]   ;;  %v2597_v28 = vld [vmem:[%s2837_s8 + $0x1c0] ss:$8 sps:$4 sm:$0xff]  }
  0x19   : > { %1054 = vmatprep.subr.bf16.mxu0 %v2761_v1  ;;  %2510 = vmatprep.subr.bf16.mxu1 %v2761_v1  ;;  %v2598_v29 = vld [vmem:[%s2837_s8 + $0x34] ss:$8 sps:$4 sm:$0xff]   ;;  %v2602_v31 = vld [vmem:[%s2837_s8 + $0x30] ss:$8 sps:$4 sm:$0xff]   ;;  %v2604_v33 = vld [vmem:[%s2837_s8 + $0x44] ss:$8 sps:$4 sm:$0xff]  }
  0x1a   : > { %v2600_v30 = vld [vmem:[%s2837_s8 + $0x1d4] ss:$8 sps:$4 sm:$0xff]   ;;  %v2603_v32 = vld [vmem:[%s2837_s8 + $0x1d0] ss:$8 sps:$4 sm:$0xff]   ;;  %v2606_v34 = vld [vmem:[%s2837_s8 + $0x1e4] ss:$8 sps:$4 sm:$0xff]  }
  0x1b   : > { %v2608_v35 = vld [vmem:[%s2837_s8 + $0x40] ss:$8 sps:$4 sm:$0xff]   ;;  %v2610_v37 = vld [vmem:[%s2837_s8 + $0x54] ss:$8 sps:$4 sm:$0xff]   ;;  %v2614_v39 = vld [vmem:[%s2837_s8 + $0x50] ss:$8 sps:$4 sm:$0xff]  }
  0x1c   : > { %1055 = vmatpush1.bf16.msra.mxu0 %v2567_v4  ;;  %2526 = vmatpush1.bf16.msra.mxu1 %v2567_v4  ;;  %v2609_v36 = vld [vmem:[%s2837_s8 + $0x1e0] ss:$8 sps:$4 sm:$0xff]   ;;  %v2612_v38 = vld [vmem:[%s2837_s8 + $0x1f4] ss:$8 sps:$4 sm:$0xff]   ;;  %v2615_v40 = vld [vmem:[%s2837_s8 + $0x1f0] ss:$8 sps:$4 sm:$0xff]  }
  0x1d   : > { %1056 = vmatprep.subr.bf16.mxu0 %v2761_v1  ;;  %2511 = vmatprep.subr.bf16.mxu1 %v2761_v1  ;;  %v2616_v41 = vld [vmem:[%s2837_s8 + $0x64] ss:$8 sps:$4 sm:$0xff]   ;;  %v2620_v43 = vld [vmem:[%s2837_s8 + $0x60] ss:$8 sps:$4 sm:$0xff]   ;;  %v2622_v45 = vld [vmem:[%s2837_s8 + $0x74] ss:$8 sps:$4 sm:$0xff]  }
  0x1e   : > { %v2618_v42 = vld [vmem:[%s2837_s8 + $0x204] ss:$8 sps:$4 sm:$0xff]   ;;  %v2621_v44 = vld [vmem:[%s2837_s8 + $0x200] ss:$8 sps:$4 sm:$0xff]   ;;  %v2624_v46 = vld [vmem:[%s2837_s8 + $0x214] ss:$8 sps:$4 sm:$0xff]  }
  0x1f   : > { %v2626_v47 = vld [vmem:[%s2837_s8 + $0x70] ss:$8 sps:$4 sm:$0xff]   ;;  %v2628_v49 = vld [vmem:[%s2837_s8 + $0x84] ss:$8 sps:$4 sm:$0xff]   ;;  %v2632_v51 = vld [vmem:[%s2837_s8 + $0x80] ss:$8 sps:$4 sm:$0xff]  }
  0x20   : > { %1057 = vmatpush1.bf16.msra.mxu0 %v2568_v5  ;;  %2527 = vmatpush1.bf16.msra.mxu1 %v2568_v5  ;;  %v2627_v48 = vld [vmem:[%s2837_s8 + $0x210] ss:$8 sps:$4 sm:$0xff]   ;;  %v2630_v50 = vld [vmem:[%s2837_s8 + $0x224] ss:$8 sps:$4 sm:$0xff]   ;;  %v2633_v52 = vld [vmem:[%s2837_s8 + $0x220] ss:$8 sps:$4 sm:$0xff]  }
  0x21   : > { %1058 = vmatprep.subr.bf16.mxu0 %v2761_v1  ;;  %2512 = vmatprep.subr.bf16.mxu1 %v2761_v1  ;;  %v2634_v53 = vld [vmem:[%s2837_s8 + $0x94] ss:$8 sps:$4 sm:$0xff]   ;;  %v2638_v55 = vld [vmem:[%s2837_s8 + $0x90] ss:$8 sps:$4 sm:$0xff]   ;;  %v2640_v57 = vld [vmem:[%s2837_s8 + $0xa4] ss:$8 sps:$4 sm:$0xff]  }
  0x22   : > { %v2636_v54 = vld [vmem:[%s2837_s8 + $0x234] ss:$8 sps:$4 sm:$0xff]   ;;  %v2639_v56 = vld [vmem:[%s2837_s8 + $0x230] ss:$8 sps:$4 sm:$0xff]   ;;  %v2642_v58 = vld [vmem:[%s2837_s8 + $0x244] ss:$8 sps:$4 sm:$0xff]  }
  0x23   : > { %v2644_v59 = vld [vmem:[%s2837_s8 + $0xa0] ss:$8 sps:$4 sm:$0xff]   ;;  %v2646_v61 = vld [vmem:[%s2837_s8 + $0xb4] ss:$8 sps:$4 sm:$0xff]   ;;  %v2650_v63 = vld [vmem:[%s2837_s8 + $0xb0] ss:$8 sps:$4 sm:$0xff]  }
  0x24   : > { %1059 = vmatpush1.bf16.msra.mxu0 %v2569_v7  ;;  %2528 = vmatpush1.bf16.msra.mxu1 %v2569_v7  ;;  %v2645_v60 = vld [vmem:[%s2837_s8 + $0x240] ss:$8 sps:$4 sm:$0xff]   ;;  %v2648_v62 = vld [vmem:[%s2837_s8 + $0x254] ss:$8 sps:$4 sm:$0xff]   ;;  %v2651_v0 = vld [vmem:[%s2837_s8 + $0x250] ss:$8 sps:$4 sm:$0xff]  }
  0x25   : > { %1060 = vmatprep.subr.bf16.mxu0 %v2761_v1  ;;  %2513 = vmatprep.subr.bf16.mxu1 %v2761_v1  ;;  %v2654_v2 = vld [vmem:[%s2837_s8 + $0x264] ss:$8 sps:$4 sm:$0xff]   ;;  %v2656_v3 = vld [vmem:[%s2837_s8 + $0xc0] ss:$8 sps:$4 sm:$0xff]   ;;  %v2658_v5 = vld [vmem:[%s2837_s8 + $0xd4] ss:$8 sps:$4 sm:$0xff]  }
  0x26   : > { %v2657_v4 = vld [vmem:[%s2837_s8 + $0x260] ss:$8 sps:$4 sm:$0xff]   ;;  %v2660_v6 = vld [vmem:[%s2837_s8 + $0x274] ss:$8 sps:$4 sm:$0xff]   ;;  %v2662_v7 = vld [vmem:[%s2837_s8 + $0xd0] ss:$8 sps:$4 sm:$0xff]  }
  0x27   : > { %v2663_v8 = vld [vmem:[%s2837_s8 + $0x270] ss:$8 sps:$4 sm:$0xff]  }
  0x28   : > { %1061 = vmatpush1.bf16.msra.mxu0 %v2570_v9  ;;  %2529 = vmatpush1.bf16.msra.mxu1 %v2570_v9  ;;  %v2664_v9 = vld [vmem:[%s2837_s8 + $0xe4] ss:$8 sps:$4 sm:$0xff]  }
  0x29   : > { %1062 = vmatprep.subr.bf16.mxu0 %v2761_v1  ;;  %2514 = vmatprep.subr.bf16.mxu1 %v2761_v1 }
  0x2c   : > { %1063 = vmatpush1.bf16.msra.mxu0 %v2571_v10  ;;  %2530 = vmatpush1.bf16.msra.mxu1 %v2571_v10  ;;  %v2666_v10 = vld [vmem:[%s2837_s8 + $0x284] ss:$8 sps:$4 sm:$0xff]  }
  0x2d   : > { %1064 = vmatprep.subr.bf16.mxu0 %v2761_v1  ;;  %2515 = vmatprep.subr.bf16.mxu1 %v2761_v1 }
  0x30   : > { %1065 = vmatpush1.bf16.msra.mxu0 %v2572_v11  ;;  %2531 = vmatpush1.bf16.msra.mxu1 %v2572_v11  ;;  %v2668_v11 = vld [vmem:[%s2837_s8 + $0xe0] ss:$8 sps:$4 sm:$0xff]  }
  0x31   : > { %1066 = vmatprep.subr.bf16.mxu0 %v2761_v1  ;;  %2516 = vmatprep.subr.bf16.mxu1 %v2761_v1 }
  0x34   : > { %1067 = vmatpush1.bf16.msra.mxu0 %v2573_v12  ;;  %2532 = vmatpush1.bf16.msra.mxu1 %v2573_v12  ;;  %v2669_v12 = vld [vmem:[%s2837_s8 + $0x280] ss:$8 sps:$4 sm:$0xff]  }
  0x35   : > { %1068 = vmatprep.subr.bf16.mxu0 %v2761_v1  ;;  %2517 = vmatprep.subr.bf16.mxu1 %v2761_v1 }
  0x38   : > { %1069 = vmatpush1.bf16.msra.mxu0 %v2574_v13  ;;  %2533 = vmatpush1.bf16.msra.mxu1 %v2574_v13  ;;  %v2670_v13 = vld [vmem:[%s2837_s8 + $0xf4] ss:$8 sps:$4 sm:$0xff]  }
  0x39   : > { %1070 = vmatprep.subr.bf16.mxu0 %v2761_v1  ;;  %2518 = vmatprep.subr.bf16.mxu1 %v2761_v1 }
  0x3c   : > { %1071 = vmatpush1.bf16.msra.mxu0 %v2575_v14  ;;  %2534 = vmatpush1.bf16.msra.mxu1 %v2575_v14  ;;  %v2672_v14 = vld [vmem:[%s2837_s8 + $0x294] ss:$8 sps:$4 sm:$0xff]  }
  0x3d   : > { %1072 = vmatprep.subr.bf16.mxu0 %v2761_v1  ;;  %2519 = vmatprep.subr.bf16.mxu1 %v2761_v1 }
  0x40   : > { %1073 = vmatpush1.bf16.msra.mxu0 %v2576_v15  ;;  %2535 = vmatpush1.bf16.msra.mxu1 %v2576_v15  ;;  %v2674_v15 = vld [vmem:[%s2837_s8 + $0xf0] ss:$8 sps:$4 sm:$0xff]  }
  0x41   : > { %1074 = vmatprep.subr.bf16.mxu0 %v2761_v1  ;;  %2520 = vmatprep.subr.bf16.mxu1 %v2761_v1 }
  0x44   : > { %1075 = vmatpush1.bf16.msra.mxu0 %v2577_v16  ;;  %2536 = vmatpush1.bf16.msra.mxu1 %v2577_v16  ;;  %v2675_v16 = vld [vmem:[%s2837_s8 + $0x290] ss:$8 sps:$4 sm:$0xff]  }
  0x45   : > { %1076 = vmatprep.subr.bf16.mxu0 %v2761_v1  ;;  %2521 = vmatprep.subr.bf16.mxu1 %v2761_v1 }
  0x48   : > { %1077 = vmatpush1.bf16.msra.mxu0 %v2578_v17  ;;  %2537 = vmatpush1.bf16.msra.mxu1 %v2578_v17  ;;  %v2676_v17 = vld [vmem:[%s2837_s8 + $0x104] ss:$8 sps:$4 sm:$0xff]  }
  0x49   : > { %1078 = vmatprep.subr.bf16.mxu0 %v2761_v1  ;;  %2522 = vmatprep.subr.bf16.mxu1 %v2761_v1  ;;  %v2652_v1 = vld [vmem:[%s2837_s8 + $0xc4] ss:$8 sps:$4 sm:$0xff]  }
  0x4c   : > { %1079 = vmatpush1.bf16.msra.mxu0 %v2579_v18  ;;  %2538 = vmatpush1.bf16.msra.mxu1 %v2579_v18  ;;  %v2678_v18 = vld [vmem:[%s2837_s8 + $0x2a4] ss:$8 sps:$4 sm:$0xff]  }
  0x4f   : > { %1081 = vmatmul.mubr.bf16.vlgmr.msra.gmra.mrb[0].mxu0 %v2580_v19  ;;  %1289 = vmatmul.mubr.bf16.vlgmr.msra.gmra.mrb[0].mxu1 %v2583_v20  ;;  %v2680_v19 = vld [vmem:[%s2837_s8 + $0x100] ss:$8 sps:$4 sm:$0xff]  }
  0x50   : > { %1088 = vmatprep.mubr.bf16.mxu0 %v2586_v21  ;;  %1296 = vmatprep.mubr.bf16.mxu1 %v2588_v22  ;;  %v2681_v20 = vld [vmem:[%s2837_s8 + $0x2a0] ss:$8 sps:$4 sm:$0xff]   ;;  %v2682_v21 = vld [vmem:[%s2837_s8 + $0x114] ss:$8 sps:$4 sm:$0xff]  }
  0x51   : > { %v2684_v22 = vld [vmem:[%s2837_s8 + $0x2b4] ss:$8 sps:$4 sm:$0xff]  }
  0x57   : > { %1089 = vmatmul.mubr.bf16.gmra.mrb[4].mxu0 %v2590_v23  ;;  %1297 = vmatmul.mubr.bf16.gmra.mrb[4].mxu1 %v2591_v24  ;;  %v2686_v23 = vld [vmem:[%s2837_s8 + $0x110] ss:$8 sps:$4 sm:$0xff]  }
  0x58   : > { %1096 = vmatprep.mubr.bf16.mxu0 %v2592_v25  ;;  %1304 = vmatprep.mubr.bf16.mxu1 %v2594_v26  ;;  %v2687_v24 = vld [vmem:[%s2837_s8 + $0x2b0] ss:$8 sps:$4 sm:$0xff]   ;;  %v2688_v25 = vld [vmem:[%s2837_s8 + $0x124] ss:$8 sps:$4 sm:$0xff]  }
  0x59   : > { %v2690_v26 = vld [vmem:[%s2837_s8 + $0x2c4] ss:$8 sps:$4 sm:$0xff]  }
  0x5f   : > { %1097 = vmatmul.mubr.bf16.gmra.mrb[8].mxu0 %v2596_v27  ;;  %1305 = vmatmul.mubr.bf16.gmra.mrb[8].mxu1 %v2597_v28  ;;  %v2692_v27 = vld [vmem:[%s2837_s8 + $0x120] ss:$8 sps:$4 sm:$0xff]  }
  0x60   : > { %1104 = vmatprep.mubr.bf16.mxu0 %v2598_v29  ;;  %1312 = vmatprep.mubr.bf16.mxu1 %v2600_v30  ;;  %v2693_v28 = vld [vmem:[%s2837_s8 + $0x2c0] ss:$8 sps:$4 sm:$0xff]   ;;  %v2694_v29 = vld [vmem:[%s2837_s8 + $0x134] ss:$8 sps:$4 sm:$0xff]  }
  0x61   : > { %v2696_v30 = vld [vmem:[%s2837_s8 + $0x2d4] ss:$8 sps:$4 sm:$0xff]  }
  0x67   : > { %1105 = vmatmul.mubr.bf16.gmra.mrb[12].mxu0 %v2602_v31  ;;  %1313 = vmatmul.mubr.bf16.gmra.mrb[12].mxu1 %v2603_v32  ;;  %v2698_v31 = vld [vmem:[%s2837_s8 + $0x130] ss:$8 sps:$4 sm:$0xff]  }
  0x68   : > { %1112 = vmatprep.mubr.bf16.mxu0 %v2604_v33  ;;  %1320 = vmatprep.mubr.bf16.mxu1 %v2606_v34  ;;  %v2699_v32 = vld [vmem:[%s2837_s8 + $0x2d0] ss:$8 sps:$4 sm:$0xff]   ;;  %v2700_v33 = vld [vmem:[%s2837_s8 + $0x144] ss:$8 sps:$4 sm:$0xff]  }
  0x69   : > { %v2702_v34 = vld [vmem:[%s2837_s8 + $0x2e4] ss:$8 sps:$4 sm:$0xff]  }
  0x6f   : > { %1113 = vmatmul.mubr.bf16.gmra.mrb[16].mxu0 %v2608_v35  ;;  %1321 = vmatmul.mubr.bf16.gmra.mrb[16].mxu1 %v2609_v36  ;;  %v2704_v35 = vld [vmem:[%s2837_s8 + $0x140] ss:$8 sps:$4 sm:$0xff]  }
  0x70   : > { %1120 = vmatprep.mubr.bf16.mxu0 %v2610_v37  ;;  %1328 = vmatprep.mubr.bf16.mxu1 %v2612_v38  ;;  %v2705_v36 = vld [vmem:[%s2837_s8 + $0x2e0] ss:$8 sps:$4 sm:$0xff]   ;;  %v2706_v37 = vld [vmem:[%s2837_s8 + $0x154] ss:$8 sps:$4 sm:$0xff]  }
  0x71   : > { %v2708_v38 = vld [vmem:[%s2837_s8 + $0x2f4] ss:$8 sps:$4 sm:$0xff]  }
  0x77   : > { %1121 = vmatmul.mubr.bf16.gmra.mrb[20].mxu0 %v2614_v39  ;;  %1329 = vmatmul.mubr.bf16.gmra.mrb[20].mxu1 %v2615_v40  ;;  %v2710_v39 = vld [vmem:[%s2837_s8 + $0x150] ss:$8 sps:$4 sm:$0xff]  }
  0x78   : > { %1128 = vmatprep.mubr.bf16.mxu0 %v2616_v41  ;;  %1336 = vmatprep.mubr.bf16.mxu1 %v2618_v42  ;;  %v2711_v40 = vld [vmem:[%s2837_s8 + $0x2f0] ss:$8 sps:$4 sm:$0xff]   ;;  %v2712_v41 = vld [vmem:[%s2837_s8 + $0x164] ss:$8 sps:$4 sm:$0xff]  }
  0x79   : > { %v2714_v42 = vld [vmem:[%s2837_s8 + $0x304] ss:$8 sps:$4 sm:$0xff]  }
  0x7f   : > { %1129 = vmatmul.mubr.bf16.gmra.mrb[24].mxu0 %v2620_v43  ;;  %1337 = vmatmul.mubr.bf16.gmra.mrb[24].mxu1 %v2621_v44  ;;  %v2716_v43 = vld [vmem:[%s2837_s8 + $0x160] ss:$8 sps:$4 sm:$0xff]  }
  0x80   : > { %1136 = vmatprep.mubr.bf16.mxu0 %v2622_v45  ;;  %1344 = vmatprep.mubr.bf16.mxu1 %v2624_v46  ;;  %v2717_v44 = vld [vmem:[%s2837_s8 + $0x300] ss:$8 sps:$4 sm:$0xff]   ;;  %v2718_v45 = vld [vmem:[%s2837_s8 + $0x174] ss:$8 sps:$4 sm:$0xff]  }
  0x81   : > { %v2720_v46 = vld [vmem:[%s2837_s8 + $0x314] ss:$8 sps:$4 sm:$0xff]  }
  0x87   : > { %1137 = vmatmul.mubr.bf16.gmra.mrb[28].mxu0 %v2626_v47  ;;  %1345 = vmatmul.mubr.bf16.gmra.mrb[28].mxu1 %v2627_v48  ;;  %v2722_v47 = vld [vmem:[%s2837_s8 + $0x170] ss:$8 sps:$4 sm:$0xff]  }
  0x88   : > { %1144 = vmatprep.mubr.bf16.mxu0 %v2628_v49  ;;  %1352 = vmatprep.mubr.bf16.mxu1 %v2630_v50  ;;  %v2723_v48 = vld [vmem:[%s2837_s8 + $0x310] ss:$8 sps:$4 sm:$0xff]   ;;  %v2724_v49 = vld [vmem:[%s2837_s8 + $0x184] ss:$8 sps:$4 sm:$0xff]  }
  0x89   : > { %v2726_v50 = vld [vmem:[%s2837_s8 + $0x324] ss:$8 sps:$4 sm:$0xff]  }
  0x8f   : > { %1145 = vmatmul.mubr.bf16.gmra.mrb[32].mxu0 %v2632_v51  ;;  %1353 = vmatmul.mubr.bf16.gmra.mrb[32].mxu1 %v2633_v52  ;;  %v2728_v51 = vld [vmem:[%s2837_s8 + $0x180] ss:$8 sps:$4 sm:$0xff]  }
  0x90   : > { %1152 = vmatprep.mubr.bf16.mxu0 %v2634_v53  ;;  %1360 = vmatprep.mubr.bf16.mxu1 %v2636_v54  ;;  %v2729_v52 = vld [vmem:[%s2837_s8 + $0x320] ss:$8 sps:$4 sm:$0xff]   ;;  %v2730_v53 = vld [vmem:[%s2837_s8 + $0x194] ss:$8 sps:$4 sm:$0xff]  }
  0x91   : > { %v2732_v54 = vld [vmem:[%s2837_s8 + $0x334] ss:$8 sps:$4 sm:$0xff]  }
  0x97   : > { %1153 = vmatmul.mubr.bf16.gmra.mrb[36].mxu0 %v2638_v55  ;;  %1361 = vmatmul.mubr.bf16.gmra.mrb[36].mxu1 %v2639_v56  ;;  %v2734_v55 = vld [vmem:[%s2837_s8 + $0x190] ss:$8 sps:$4 sm:$0xff]  }
  0x98   : > { %1160 = vmatprep.mubr.bf16.mxu0 %v2640_v57  ;;  %1368 = vmatprep.mubr.bf16.mxu1 %v2642_v58  ;;  %v2735_v56 = vld [vmem:[%s2837_s8 + $0x330] ss:$8 sps:$4 sm:$0xff]   ;;  %s1498_s8 = sld [smem:[#allocation2]] }
  0x9f   : > { %1161 = vmatmul.mubr.bf16.gmra.mrb[40].mxu0 %v2644_v59  ;;  %1369 = vmatmul.mubr.bf16.gmra.mrb[40].mxu1 %v2645_v60 }
  0xa0   : > { %1168 = vmatprep.mubr.bf16.mxu0 %v2646_v61  ;;  %1376 = vmatprep.mubr.bf16.mxu1 %v2648_v62 }
  0xa7   : > { %1169 = vmatmul.mubr.bf16.gmra.mrb[44].mxu0 %v2650_v63  ;;  %1377 = vmatmul.mubr.bf16.gmra.mrb[44].mxu1 %v2651_v0 }
  0xa8   : > { %1176 = vmatprep.mubr.bf16.mxu0 %v2652_v1  ;;  %1384 = vmatprep.mubr.bf16.mxu1 %v2654_v2 }
  0xaf   : > { %1177 = vmatmul.mubr.bf16.gmra.mrb[48].mxu0 %v2656_v3  ;;  %1385 = vmatmul.mubr.bf16.gmra.mrb[48].mxu1 %v2657_v4 }
  0xb0   : > { %1184 = vmatprep.mubr.bf16.mxu0 %v2658_v5  ;;  %1392 = vmatprep.mubr.bf16.mxu1 %v2660_v6 }
  0xb7   : > { %1185 = vmatmul.mubr.bf16.gmra.mrb[52].mxu0 %v2662_v7  ;;  %1393 = vmatmul.mubr.bf16.gmra.mrb[52].mxu1 %v2663_v8 }
  0xb8   : > { %1192 = vmatprep.mubr.bf16.mxu0 %v2664_v9  ;;  %1400 = vmatprep.mubr.bf16.mxu1 %v2666_v10 }
  0xbf   : > { %1193 = vmatmul.mubr.bf16.gmra.mrb[56].mxu0 %v2668_v11  ;;  %1401 = vmatmul.mubr.bf16.gmra.mrb[56].mxu1 %v2669_v12 }
  0xc0   : > { %1200 = vmatprep.mubr.bf16.mxu0 %v2670_v13  ;;  %1408 = vmatprep.mubr.bf16.mxu1 %v2672_v14 }
  0xc7   : > { %1201 = vmatmul.mubr.bf16.gmra.mrb[60].mxu0 %v2674_v15  ;;  %1409 = vmatmul.mubr.bf16.gmra.mrb[60].mxu1 %v2675_v16 }
  0xc8   : > { %1208 = vmatprep.mubr.bf16.mxu0 %v2676_v17  ;;  %1416 = vmatprep.mubr.bf16.mxu1 %v2678_v18 }
  0xcf   : > { %1209 = vmatmul.mubr.bf16.gmra.mrb[64].mxu0 %v2680_v19  ;;  %1417 = vmatmul.mubr.bf16.gmra.mrb[64].mxu1 %v2681_v20 }
  0xd0   : > { %1216 = vmatprep.mubr.bf16.mxu0 %v2682_v21  ;;  %1424 = vmatprep.mubr.bf16.mxu1 %v2684_v22 }
  0xd7   : > { %1217 = vmatmul.mubr.bf16.gmra.mrb[68].mxu0 %v2686_v23  ;;  %1425 = vmatmul.mubr.bf16.gmra.mrb[68].mxu1 %v2687_v24 }
  0xd8   : > { %1224 = vmatprep.mubr.bf16.mxu0 %v2688_v25  ;;  %1432 = vmatprep.mubr.bf16.mxu1 %v2690_v26 }
  0xdf   : > { %1225 = vmatmul.mubr.bf16.gmra.mrb[72].mxu0 %v2692_v27  ;;  %1433 = vmatmul.mubr.bf16.gmra.mrb[72].mxu1 %v2693_v28 }
  0xe0   : > { %1232 = vmatprep.mubr.bf16.mxu0 %v2694_v29  ;;  %1440 = vmatprep.mubr.bf16.mxu1 %v2696_v30 }
  0xe7   : > { %1233 = vmatmul.mubr.bf16.gmra.mrb[76].mxu0 %v2698_v31  ;;  %1441 = vmatmul.mubr.bf16.gmra.mrb[76].mxu1 %v2699_v32 }
  0xe8   : > { %1240 = vmatprep.mubr.bf16.mxu0 %v2700_v33  ;;  %1448 = vmatprep.mubr.bf16.mxu1 %v2702_v34 }
  0xef   : > { %1241 = vmatmul.mubr.bf16.gmra.mrb[80].mxu0 %v2704_v35  ;;  %1449 = vmatmul.mubr.bf16.gmra.mrb[80].mxu1 %v2705_v36 }
  0xf0   : > { %1248 = vmatprep.mubr.bf16.mxu0 %v2706_v37  ;;  %1456 = vmatprep.mubr.bf16.mxu1 %v2708_v38 }
  0xf7   : > { %1249 = vmatmul.mubr.bf16.gmra.mrb[84].mxu0 %v2710_v39  ;;  %1457 = vmatmul.mubr.bf16.gmra.mrb[84].mxu1 %v2711_v40 }
  0xf8   : > { %1256 = vmatprep.mubr.bf16.mxu0 %v2712_v41  ;;  %1464 = vmatprep.mubr.bf16.mxu1 %v2714_v42 }
  0xff   : > { %1257 = vmatmul.mubr.bf16.gmra.mrb[88].mxu0 %v2716_v43  ;;  %1465 = vmatmul.mubr.bf16.gmra.mrb[88].mxu1 %v2717_v44 }
 0x100   : > { %1264 = vmatprep.mubr.bf16.mxu0 %v2718_v45  ;;  %1472 = vmatprep.mubr.bf16.mxu1 %v2720_v46 }
 0x107   : > { %1265 = vmatmul.mubr.bf16.gmra.mrb[92].mxu0 %v2722_v47  ;;  %1473 = vmatmul.mubr.bf16.gmra.mrb[92].mxu1 %v2723_v48 }
 0x108   : > { %1272 = vmatprep.mubr.bf16.mxu0 %v2724_v49  ;;  %1480 = vmatprep.mubr.bf16.mxu1 %v2726_v50 }
 0x10f   : > { %1273 = vmatmul.mubr.bf16.gmra.mrb[96].mxu0 %v2728_v51  ;;  %1481 = vmatmul.mubr.bf16.gmra.mrb[96].mxu1 %v2729_v52 }
 0x110   : > { %1280 = vmatprep.mubr.bf16.mxu0 %v2730_v53  ;;  %1488 = vmatprep.mubr.bf16.mxu1 %v2732_v54 }
 0x117   : > { %1281 = vmatmul.mubr.bf16.gmra.mrb[100].mxu0 %v2734_v55  ;;  %1489 = vmatmul.mubr.bf16.gmra.mrb[100].mxu1 %v2735_v56 }
 0x122   : > { %v3000_v57 = vpop.f32.mrb[0].mxu0  ;;  %v3002_v58 = vpop.f32.mrb[0].mxu1 }
 0x123   : > { %v1084_v59 = vpop.f32.mrb[1].mxu0  ;;  %v1292_v60 = vpop.f32.mrb[1].mxu1 }
 0x124   : > { %v3004_v61 = vpop.f32.mrb[2].mxu0  ;;  %v3006_v62 = vpop.f32.mrb[2].mxu1 }
 0x125   : > { %v1087_v63 = vpop.f32.mrb[3].mxu0  ;;  %v1295_v0 = vpop.f32.mrb[3].mxu1 }
 0x12a   : > { %v3008_v1 = vpop.f32.mrb[4].mxu0  ;;  %v3010_v2 = vpop.f32.mrb[4].mxu1 }
 0x12b   : > { %v1092_v3 = vpop.f32.mrb[5].mxu0  ;;  %v1300_v4 = vpop.f32.mrb[5].mxu1 }
 0x12c   : > { %v3012_v5 = vpop.f32.mrb[6].mxu0  ;;  %v3014_v6 = vpop.f32.mrb[6].mxu1 }
 0x12d   : > { %v1095_v7 = vpop.f32.mrb[7].mxu0  ;;  %v1303_v8 = vpop.f32.mrb[7].mxu1 }
 0x132   : > { %v3016_v9 = vpop.f32.mrb[8].mxu0  ;;  %v3018_v10 = vpop.f32.mrb[8].mxu1 }
 0x133   : > { %v1100_v11 = vpop.f32.mrb[9].mxu0  ;;  %v1308_v12 = vpop.f32.mrb[9].mxu1 }
 0x134   : > { %v3020_v13 = vpop.f32.mrb[10].mxu0  ;;  %v3022_v14 = vpop.f32.mrb[10].mxu1 }
 0x135   : > { %v1103_v15 = vpop.f32.mrb[11].mxu0  ;;  %v1311_v16 = vpop.f32.mrb[11].mxu1 }
 0x13a   : > { %v3024_v17 = vpop.f32.mrb[12].mxu0  ;;  %v3026_v18 = vpop.f32.mrb[12].mxu1 }
 0x13b   : > { %v1108_v19 = vpop.f32.mrb[13].mxu0  ;;  %v1316_v20 = vpop.f32.mrb[13].mxu1 }
 0x13c   : > { %v3028_v21 = vpop.f32.mrb[14].mxu0  ;;  %v3030_v22 = vpop.f32.mrb[14].mxu1 }
 0x13d   : > { %v1111_v23 = vpop.f32.mrb[15].mxu0  ;;  %v1319_v24 = vpop.f32.mrb[15].mxu1 }
 0x142   : > { %v3032_v25 = vpop.f32.mrb[16].mxu0  ;;  %v3034_v26 = vpop.f32.mrb[16].mxu1 }
 0x143   : > { %v1116_v27 = vpop.f32.mrb[17].mxu0  ;;  %v1324_v28 = vpop.f32.mrb[17].mxu1 }
 0x144   : > { %v3036_v29 = vpop.f32.mrb[18].mxu0  ;;  %v3038_v30 = vpop.f32.mrb[18].mxu1  ;;  %v3083_v27 = vld [vmem:[%s3610_s2] ss:$0 sm:$0xff] }
 0x145   : > { %v1119_v31 = vpop.f32.mrb[19].mxu0  ;;  %v1327_v32 = vpop.f32.mrb[19].mxu1  ;;  %v1505_v28 = vadd.f32 %v3083_v27, %v3000_v57  ;;  %v1507_v57 = vadd.f32 %v3083_v27, %v3008_v1 }
 0x147   : > { %vm1531_vm0 = vcmp.ge.f32.partialorder %v1505_v28, 0.0  ;;  %vm1533_vm4 = vcmp.ge.f32.partialorder %v1507_v57, 0.0 }
 0x14a   : > { %v3040_v33 = vpop.f32.mrb[20].mxu0  ;;  %v3042_v34 = vpop.f32.mrb[20].mxu1 }
 0x14b   : > { %v1124_v35 = vpop.f32.mrb[21].mxu0  ;;  %v1332_v36 = vpop.f32.mrb[21].mxu1 }
 0x14c   : > { %v3044_v37 = vpop.f32.mrb[22].mxu0  ;;  %v3046_v38 = vpop.f32.mrb[22].mxu1  ;;  %v3091_v35 = vstv %s1498_s8  ;;  %v1740_v36 = vadd.f32 %v3083_v27, %v3002_v58 }
 0x14d   : > { %v1127_v39 = vpop.f32.mrb[23].mxu0  ;;  %v1335_v40 = vpop.f32.mrb[23].mxu1  ;;  %v1558_v58 = vmul.f32 %v3091_v35, %v1505_v28 }
 0x14e   : > { %v1506_v39 = vadd.f32 %v3083_v27, %v3004_v61  ;;  %v1742_v61 = vadd.f32 %v3083_v27, %v3010_v2  ;;  %vm1766_vm1 = vcmp.ge.f32.partialorder %v1740_v36, 0.0  ;;  %v1509_v2 = vadd.f32 %v3083_v27, %v3016_v9 }
 0x14f   : > { %v1745_v9 = vadd.f32 %v3083_v27, %v3022_v14 }
 0x150   : > { %vm1532_vm2 = vcmp.ge.f32.partialorder %v1506_v39, 0.0  ;;  %vm1768_vm5 = vcmp.ge.f32.partialorder %v1742_v61, 0.0  ;;  %vm1535_vm8 = vcmp.ge.f32.partialorder %v1509_v2, 0.0 }
 0x151   : > { %vm1771_vm11 = vcmp.ge.f32.partialorder %v1745_v9, 0.0 }
 0x152   : > { %v3048_v41 = vpop.f32.mrb[24].mxu0  ;;  %v3050_v42 = vpop.f32.mrb[24].mxu1 }
 0x153   : > { %v1132_v43 = vpop.f32.mrb[25].mxu0  ;;  %v1340_v44 = vpop.f32.mrb[25].mxu1 }
 0x154   : > { %v3052_v45 = vpop.f32.mrb[26].mxu0  ;;  %v3054_v46 = vpop.f32.mrb[26].mxu1  ;;  %v1741_v44 = vadd.f32 %v3083_v27, %v3006_v62  ;;  %v1559_v62 = vmul.f32 %v3091_v35, %v1506_v39 }
 0x155   : > { %v1135_v47 = vpop.f32.mrb[27].mxu0  ;;  %v1343_v48 = vpop.f32.mrb[27].mxu1 }
 0x156   : > { %v1793_v1 = vmul.f32 %v1741_v44, %v3091_v35  ;;  %vm1767_vm3 = vcmp.ge.f32.partialorder %v1741_v44, 0.0 }
 0x15a   : > { %v3056_v49 = vpop.f32.mrb[28].mxu0  ;;  %v3058_v50 = vpop.f32.mrb[28].mxu1 }
 0x15b   : > { %v1140_v51 = vpop.f32.mrb[29].mxu0  ;;  %v1348_v52 = vpop.f32.mrb[29].mxu1 }
 0x15c   : > { %v3060_v53 = vpop.f32.mrb[30].mxu0  ;;  %v3062_v54 = vpop.f32.mrb[30].mxu1 }
 0x15d   : > { %v1143_v55 = vpop.f32.mrb[31].mxu0  ;;  %v1351_v56 = vpop.f32.mrb[31].mxu1 }
 0x15e   : > { %v1792_v55 = vmul.f32 %v1740_v36, %v3091_v35  ;;  %v1560_v56 = vmul.f32 %v3091_v35, %v1507_v57 }
 0x162   : > { %v3064_v59 = vpop.f32.mrb[32].mxu0  ;;  %v3066_v60 = vpop.f32.mrb[32].mxu1 }
 0x163   : > { %v1148_v63 = vpop.f32.mrb[33].mxu0  ;;  %v1356_v0 = vpop.f32.mrb[33].mxu1 }
 0x164   : > { %v3068_v3 = vpop.f32.mrb[34].mxu0  ;;  %v3070_v4 = vpop.f32.mrb[34].mxu1  ;;  %v1508_v63 = vadd.f32 %v3083_v27, %v3012_v5  ;;  %v1743_v0 = vadd.f32 %v3083_v27, %v3014_v6  ;;  %v3130_v6 = vsel %vm1766_vm1, %v1740_v36, %v1792_v55 }
 0x165   : > { %v1151_v7 = vpop.f32.mrb[35].mxu0  ;;  %v1359_v8 = vpop.f32.mrb[35].mxu1 }
 0x166   : > { %v1744_v7 = vadd.f32 %v3083_v27, %v3018_v10  ;;  %v3120_v8 = vsel %vm1531_vm0, %v1505_v28, %v1558_v58  ;;  %vm1534_vm6 = vcmp.ge.f32.partialorder %v1508_v63, 0.0  ;;  %vm1769_vm7 = vcmp.ge.f32.partialorder %v1743_v0, 0.0 }
 0x168   : > { %v1796_v14 = vmul.f32 %v1744_v7, %v3091_v35  ;;  %vm1770_vm9 = vcmp.ge.f32.partialorder %v1744_v7, 0.0 }
 0x16a   : > { %v3072_v11 = vpop.f32.mrb[36].mxu0  ;;  %v3074_v12 = vpop.f32.mrb[36].mxu1 }
 0x16b   : > { %v1156_v15 = vpop.f32.mrb[37].mxu0  ;;  %v1364_v16 = vpop.f32.mrb[37].mxu1 }
 0x16c   : > { %v3076_v19 = vpop.f32.mrb[38].mxu0  ;;  %v3078_v20 = vpop.f32.mrb[38].mxu1  ;;  %v1794_v15 = vmul.f32 %v1742_v61, %v3091_v35  ;;  %v1510_v16 = vadd.f32 %v3083_v27, %v3020_v13  ;;  %v1561_v13 = vmul.f32 %v3091_v35, %v1508_v63 }
 0x16d   : > { %v1159_v23 = vpop.f32.mrb[39].mxu0  ;;  %v1367_v24 = vpop.f32.mrb[39].mxu1 }
 0x16e   : > { %v3133_v24 = vsel %vm1532_vm2, %v1506_v39, %v1559_v62  ;;  %v1562_v39 = vmul.f32 %v3091_v35, %v1509_v2  ;;  %vm1536_vm10 = vcmp.ge.f32.partialorder %v1510_v16, 0.0  ;;  %v1797_v62 = vmul.f32 %v1745_v9, %v3091_v35 }
 0x172   : > { %v3087_v31 = vpop.f32.mrb[40].mxu0  ;;  %v3089_v32 = vpop.f32.mrb[40].mxu1 }
 0x173   : > { %v1164_v40 = vpop.f32.mrb[41].mxu0  ;;  %v1372_v43 = vpop.f32.mrb[41].mxu1 }
 0x174   : > { %v3101_v47 = vpop.f32.mrb[42].mxu0  ;;  %v3103_v48 = vpop.f32.mrb[42].mxu1  ;;  %v3137_v40 = vsel %vm1767_vm3, %v1741_v44, %v1793_v1  ;;  %v3139_v43 = vsel %vm1533_vm4, %v1507_v57, %v1560_v56  ;;  %v3150_v44 = vsel %vm1768_vm5, %v1742_v61, %v1794_v15  ;;  %v1563_v57 = vmul.f32 %v3091_v35, %v1510_v16 }
 0x175   : > { %3613 = vst [vmem:[#allocation3_spill] sm:$0xff] %v3103_v48  ;;  %v1167_v51 = vpop.f32.mrb[43].mxu0  ;;  %v1375_v52 = vpop.f32.mrb[43].mxu1  ;;  %v1511_v1 = vadd.f32 %v3083_v27, %v3024_v17  ;;  %v1746_v56 = vadd.f32 %v3083_v27, %v3026_v18  ;;  %v1512_v61 = vadd.f32 %v3083_v27, %v3028_v21  ;;  %v3164_v15 = vsel %vm1535_vm8, %v1509_v2, %v1562_v39 }
 0x176   : > { %v1795_v51 = vmul.f32 %v1743_v0, %v3091_v35  ;;  %v1513_v17 = vadd.f32 %v3083_v27, %v3032_v25  ;;  %v1748_v18 = vadd.f32 %v3083_v27, %v3034_v26  ;;  %v1749_v21 = vadd.f32 %v3083_v27, %v3038_v30 }
 0x177   : > { %vm1537_vm12 = vcmp.ge.f32.partialorder %v1511_v1, 0.0  ;;  %vm1772_vm13 = vcmp.ge.f32.partialorder %v1746_v56, 0.0  ;;  %v1798_v26 = vmul.f32 %v1746_v56, %v3091_v35  ;;  %vm1538_vm14 = vcmp.ge.f32.partialorder %v1512_v61, 0.0 }
 0x178   : > { %v1515_v30 = vadd.f32 %v3083_v27, %v3040_v33  ;;  %vm1539_vm0 = vcmp.ge.f32.partialorder %v1513_v17, 0.0  ;;  %v1566_v39 = vmul.f32 %v3091_v35, %v1513_v17  ;;  %v1750_v33 = vadd.f32 %v3083_v27, %v3042_v34 }
 0x179   : > { %vm1774_vm1 = vcmp.ge.f32.partialorder %v1748_v18, 0.0  ;;  %vm1775_vm3 = vcmp.ge.f32.partialorder %v1749_v21, 0.0 }
 0x17a   : > { %v3125_v23 = vpop.f32.mrb[44].mxu0  ;;  %v3127_v5 = vpop.f32.mrb[44].mxu1  ;;  %vm1541_vm4 = vcmp.ge.f32.partialorder %v1515_v30, 0.0  ;;  %vm1776_vm5 = vcmp.ge.f32.partialorder %v1750_v33, 0.0 }
 0x17b   : > { %3614 = vst [vmem:[#allocation4_spill] sm:$0xff] %v3125_v23  ;;  %3615 = vst [vmem:[#allocation5_spill] sm:$0xff] %v3127_v5  ;;  %v1172_v10 = vpop.f32.mrb[45].mxu0  ;;  %v1380_v28 = vpop.f32.mrb[45].mxu1 }
 0x17c   : > { %v3143_v52 = vpop.f32.mrb[46].mxu0  ;;  %v3145_v36 = vpop.f32.mrb[46].mxu1  ;;  %v3158_v10 = vsel %vm1534_vm6, %v1508_v63, %v1561_v13  ;;  %v3160_v28 = vsel %vm1769_vm7, %v1743_v0, %v1795_v51  ;;  %v1514_v63 = vadd.f32 %v3083_v27, %v3036_v29  ;;  %v1565_v29 = vmul.f32 %v3091_v35, %v1512_v61 }
 0x17d   : > { %3616 = vst [vmem:[#allocation6_spill] sm:$0xff] %v3143_v52  ;;  %3617 = vst [vmem:[#allocation7_spill] sm:$0xff] %v3145_v36  ;;  %v1175_v58 = vpop.f32.mrb[47].mxu0  ;;  %v1383_v55 = vpop.f32.mrb[47].mxu1  ;;  %v3172_v36 = vsel %vm1536_vm10, %v1510_v16, %v1563_v57 }
 0x17e   : > { %v3166_v58 = vsel %vm1770_vm9, %v1744_v7, %v1796_v14  ;;  %v1747_v55 = vadd.f32 %v3083_v27, %v3030_v22  ;;  %v3184_v7 = vsel %vm1771_vm11, %v1745_v9, %v1797_v62  ;;  %v1564_v22 = vmul.f32 %v3091_v35, %v1511_v1 }
 0x17f   : > { %v1800_v62 = vmul.f32 %v1748_v18, %v3091_v35  ;;  %vm1540_vm2 = vcmp.ge.f32.partialorder %v1514_v63, 0.0  ;;  %v3215_v34 = vsel %vm1538_vm14, %v1512_v61, %v1565_v29 }
 0x180   : > { %vm1773_vm15 = vcmp.ge.f32.partialorder %v1747_v55, 0.0  ;;  %v1799_v9 = vmul.f32 %v1747_v55, %v3091_v35 }
 0x182   : > { %v3180_v0 = vpop.f32.mrb[48].mxu0  ;;  %v3182_v2 = vpop.f32.mrb[48].mxu1 }
 0x183   : > { %3618 = vst [vmem:[#allocation8_spill] sm:$0xff] %v3180_v0  ;;  %3619 = vst [vmem:[#allocation9_spill] sm:$0xff] %v3182_v2  ;;  %v1180_v25 = vpop.f32.mrb[49].mxu0  ;;  %v1388_v16 = vpop.f32.mrb[49].mxu1  ;;  %v1751_v2 = vadd.f32 %v3083_v27, %v3046_v38  ;;  %v3218_v0 = vsel %vm1773_vm15, %v1747_v55, %v1799_v9  ;;  %v1802_v38 = vmul.f32 %v1750_v33, %v3091_v35 }
 0x184   : > { %v3191_v13 = vpop.f32.mrb[50].mxu0  ;;  %v3193_v51 = vpop.f32.mrb[50].mxu1  ;;  %v1567_v25 = vmul.f32 %v3091_v35, %v1514_v63  ;;  %v1801_v16 = vmul.f32 %v1749_v21, %v3091_v35 }
 0x185   : > { %3620 = vst [vmem:[#allocation10_spill] sm:$0xff] %v3191_v13  ;;  %3621 = vst [vmem:[#allocation11_spill] sm:$0xff] %v3193_v51  ;;  %v1183_v14 = vpop.f32.mrb[51].mxu0  ;;  %v1391_v57 = vpop.f32.mrb[51].mxu1  ;;  %v1516_v51 = vadd.f32 %v3083_v27, %v3044_v37  ;;  %v3205_v13 = vsel %vm1537_vm12, %v1511_v1, %v1564_v22  ;;  %v3221_v37 = vsel %vm1539_vm0, %v1513_v17, %v1566_v39  ;;  %vm1777_vm9 = vcmp.ge.f32.partialorder %v1751_v2, 0.0 }
 0x186   : > { %v3208_v14 = vsel %vm1772_vm13, %v1746_v56, %v1798_v26  ;;  %v1568_v57 = vmul.f32 %v3091_v35, %v1515_v30  ;;  %v3223_v1 = vsel %vm1774_vm1, %v1748_v18, %v1800_v62  ;;  %v3225_v56 = vsel %vm1540_vm2, %v1514_v63, %v1567_v25 }
 0x187   : > { %v3227_v22 = vsel %vm1775_vm3, %v1749_v21, %v1801_v16  ;;  %v1569_v61 = vmul.f32 %v3091_v35, %v1516_v51  ;;  %vm1542_vm6 = vcmp.ge.f32.partialorder %v1516_v51, 0.0  ;;  %v1803_v63 = vmul.f32 %v1751_v2, %v3091_v35 }
 0x188   : > { %v3233_v18 = vsel %vm1541_vm4, %v1515_v30, %v1568_v57  ;;  %v3238_v21 = vadd.f32 %v3083_v27, %v3048_v41  ;;  %v3249_v41 = vsel %vm1776_vm5, %v1750_v33, %v1802_v38 }
 0x189   : > { %v3267_v38 = vsel %vm1777_vm9, %v1751_v2, %v1803_v63 }
 0x18a   : > { %v1186_v26 = vpop.f32.mrb[52].mxu0  ;;  %v1394_v52 = vpop.f32.mrb[52].mxu1  ;;  %vm1543_vm11 = vcmp.ge.f32.partialorder %v3238_v21, 0.0 }
 0x18b   : > { %v1610_v55 = vadd.f32 %v3083_v27, %v1186_v26  ;;  %v1844_v17 = vadd.f32 %v3083_v27, %v1394_v52  ;;  %v1188_v29 = vpop.f32.mrb[53].mxu0  ;;  %v1396_v9 = vpop.f32.mrb[53].mxu1 }
 0x18c   : > { %v1189_v39 = vpop.f32.mrb[54].mxu0  ;;  %v1397_v62 = vpop.f32.mrb[54].mxu1  ;;  %v3254_v29 = vsel %vm1542_vm6, %v1516_v51, %v1569_v61  ;;  %v1752_v9 = vadd.f32 %v3083_v27, %v3050_v42 }
 0x18d   : > { %vm1636_vm7 = vcmp.ge.f32.partialorder %v1610_v55, 0.0  ;;  %v1662_v52 = vmul.f32 %v1610_v55, %v3091_v35  ;;  %vm1870_vm8 = vcmp.ge.f32.partialorder %v1844_v17, 0.0  ;;  %v1896_v30 = vmul.f32 %v1844_v17, %v3091_v35  ;;  %v1191_v25 = vpop.f32.mrb[55].mxu0  ;;  %v1399_v16 = vpop.f32.mrb[55].mxu1 }
 0x18e   : > { %v1611_v57 = vadd.f32 %v3083_v27, %v1189_v39  ;;  %v1845_v26 = vadd.f32 %v3083_v27, %v1397_v62  ;;  %vm1778_vm13 = vcmp.ge.f32.partialorder %v1752_v9, 0.0 }
 0x18f   : > { %v1688_v5 = vsel %vm1636_vm7, %v1610_v55, %v1662_v52  ;;  %v1922_v23 = vsel %vm1870_vm8, %v1844_v17, %v1896_v30  ;;  %v1570_v52 = vmul.f32 %v3091_v35, %v3238_v21 }
 0x190   : > { %v1714_v48 = vmax.f32 %v3120_v8, %v1688_v5  ;;  %v1948_v25 = vmax.f32 %v3130_v6, %v1922_v23  ;;  %vm1637_vm10 = vcmp.ge.f32.partialorder %v1611_v57, 0.0  ;;  %v1663_v33 = vmul.f32 %v1611_v57, %v3091_v35 }
 0x191   : > { %vm1871_vm12 = vcmp.ge.f32.partialorder %v1845_v26, 0.0  ;;  %v1897_v42 = vmul.f32 %v1845_v26, %v3091_v35  ;;  %v1518_v8 = vadd.f32 %v3083_v27, %v3052_v45  ;;  %v1753_v23 = vadd.f32 %v3083_v27, %v3054_v46 }
 0x192   : > { %v1974_v5 = vmax.f32 %v1714_v48, %v1948_v25  ;;  %v1689_v6 = vsel %vm1637_vm10, %v1611_v57, %v1663_v33  ;;  %v1194_v51 = vpop.f32.mrb[56].mxu0  ;;  %v1402_v61 = vpop.f32.mrb[56].mxu1  ;;  %v1804_v45 = vmul.f32 %v1752_v9, %v3091_v35 }
 0x193   : > { %v1715_v55 = vmax.f32 %v3133_v24, %v1689_v6  ;;  %v1923_v2 = vsel %vm1871_vm12, %v1845_v26, %v1897_v42  ;;  %v1612_v17 = vadd.f32 %v3083_v27, %v1194_v51  ;;  %v1846_v63 = vadd.f32 %v3083_v27, %v1402_v61  ;;  %v1196_v39 = vpop.f32.mrb[57].mxu0  ;;  %v1404_v62 = vpop.f32.mrb[57].mxu1 }
 0x194   : > { %v1949_v46 = vmax.f32 %v3137_v40, %v1923_v2  ;;  %v1197_v48 = vpop.f32.mrb[58].mxu0  ;;  %v1405_v30 = vpop.f32.mrb[58].mxu1  ;;  %vm1544_vm0 = vcmp.ge.f32.partialorder %v1518_v8, 0.0  ;;  %v1571_v6 = vmul.f32 %v3091_v35, %v1518_v8  ;;  %v1805_v40 = vmul.f32 %v1753_v23, %v3091_v35 }
 0x195   : > { %vm1638_vm14 = vcmp.ge.f32.partialorder %v1612_v17, 0.0  ;;  %v1664_v24 = vmul.f32 %v1612_v17, %v3091_v35  ;;  %vm1872_vm15 = vcmp.ge.f32.partialorder %v1846_v63, 0.0  ;;  %v1898_v16 = vmul.f32 %v1846_v63, %v3091_v35  ;;  %v1199_v57 = vpop.f32.mrb[59].mxu0  ;;  %v1407_v26 = vpop.f32.mrb[59].mxu1 }
 0x196   : > { %v1975_v25 = vmax.f32 %v1715_v55, %v1949_v46  ;;  %v1613_v33 = vadd.f32 %v3083_v27, %v1197_v48  ;;  %v1847_v42 = vadd.f32 %v3083_v27, %v1405_v30  ;;  %vm1779_vm2 = vcmp.ge.f32.partialorder %v1753_v23, 0.0 }
 0x197   : > { %v1690_v51 = vsel %vm1638_vm14, %v1612_v17, %v1664_v24  ;;  %v1924_v61 = vsel %vm1872_vm15, %v1846_v63, %v1898_v16  ;;  %v3301_v48 = vsel %vm1543_vm11, %v3238_v21, %v1570_v52  ;;  %v3304_v17 = vsel %vm1778_vm13, %v1752_v9, %v1804_v45 }
 0x198   : > { %v2433_v2 = vpack.c.bf16 %v1975_v25, %v1974_v5  ;;  %v1716_v39 = vmax.f32 %v3139_v43, %v1690_v51  ;;  %v1950_v55 = vmax.f32 %v3150_v44, %v1924_v61  ;;  %vm1639_vm1 = vcmp.ge.f32.partialorder %v1613_v33, 0.0 }
 0x199   : > { %v1665_v62 = vmul.f32 %v1613_v33, %v3091_v35  ;;  %vm1873_vm3 = vcmp.ge.f32.partialorder %v1847_v42, 0.0  ;;  %v1899_v46 = vmul.f32 %v1847_v42, %v3091_v35  ;;  %v3308_v43 = vadd.f32 %v3083_v27, %v3056_v49 }
 0x19a   : > { %2434 = vst [vmem:[%s3292_s15] sm:$0xff] %v2433_v2   ;;  %v1976_v44 = vmax.f32 %v1716_v39, %v1950_v55  ;;  %v1202_v5 = vpop.f32.mrb[60].mxu0  ;;  %v1410_v63 = vpop.f32.mrb[60].mxu1  ;;  %v3314_v52 = vsel %vm1544_vm0, %v1518_v8, %v1571_v6  ;;  %v3317_v9 = vsel %vm1779_vm2, %v1753_v23, %v1805_v40  ;;  %v1754_v8 = vadd.f32 %v3083_v27, %v3058_v50 }
 0x19b   : > { %v1691_v30 = vsel %vm1639_vm1, %v1613_v33, %v1665_v62  ;;  %v1925_v24 = vsel %vm1873_vm3, %v1847_v42, %v1899_v46  ;;  %v1614_v16 = vadd.f32 %v3083_v27, %v1202_v5  ;;  %v1848_v57 = vadd.f32 %v3083_v27, %v1410_v63  ;;  %v1204_v26 = vpop.f32.mrb[61].mxu0  ;;  %v1412_v21 = vpop.f32.mrb[61].mxu1 }
 0x19c   : > { %v1717_v49 = vmax.f32 %v3158_v10, %v1691_v30  ;;  %v1951_v45 = vmax.f32 %v3160_v28, %v1925_v24  ;;  %v1205_v25 = vpop.f32.mrb[62].mxu0  ;;  %v1413_v51 = vpop.f32.mrb[62].mxu1  ;;  %vm1545_vm6 = vcmp.ge.f32.partialorder %v3308_v43, 0.0  ;;  %v1520_v28 = vadd.f32 %v3083_v27, %v3060_v53 }
 0x19d   : > { %vm1640_vm4 = vcmp.ge.f32.partialorder %v1614_v16, 0.0  ;;  %v1666_v33 = vmul.f32 %v1614_v16, %v3091_v35  ;;  %vm1874_vm5 = vcmp.ge.f32.partialorder %v1848_v57, 0.0  ;;  %v1900_v42 = vmul.f32 %v1848_v57, %v3091_v35  ;;  %v1207_v61 = vpop.f32.mrb[63].mxu0  ;;  %v1415_v2 = vpop.f32.mrb[63].mxu1 }
 0x19e   : > { %v1977_v6 = vmax.f32 %v1717_v49, %v1951_v45  ;;  %v1615_v23 = vadd.f32 %v3083_v27, %v1205_v25  ;;  %v1849_v10 = vadd.f32 %v3083_v27, %v1413_v51  ;;  %v1572_v50 = vmul.f32 %v3091_v35, %v3308_v43 }
 0x19f   : > { %v1692_v40 = vsel %vm1640_vm4, %v1614_v16, %v1666_v33  ;;  %v1926_v39 = vsel %vm1874_vm5, %v1848_v57, %v1900_v42  ;;  %vm1780_vm9 = vcmp.ge.f32.partialorder %v1754_v8, 0.0  ;;  %v1806_v30 = vmul.f32 %v1754_v8, %v3091_v35 }
 0x1a0   : > { %v2438_v55 = vpack.c.bf16 %v1977_v6, %v1976_v44  ;;  %v1718_v62 = vmax.f32 %v3164_v15, %v1692_v40  ;;  %v1952_v46 = vmax.f32 %v3166_v58, %v1926_v39  ;;  %vm1641_vm7 = vcmp.ge.f32.partialorder %v1615_v23, 0.0 }
 0x1a1   : > { %v1667_v5 = vmul.f32 %v1615_v23, %v3091_v35  ;;  %vm1875_vm8 = vcmp.ge.f32.partialorder %v1849_v10, 0.0  ;;  %v1901_v63 = vmul.f32 %v1849_v10, %v3091_v35  ;;  %v1755_v53 = vadd.f32 %v3083_v27, %v3062_v54 }
 0x1a2   : > { %2495 = vst [vmem:[%s3292_s15 + $0x8] sm:$0xff] %v2438_v55   ;;  %v1978_v44 = vmax.f32 %v1718_v62, %v1952_v46  ;;  %v1210_v15 = vpop.f32.mrb[64].mxu0  ;;  %v1418_v24 = vpop.f32.mrb[64].mxu1  ;;  %vm1546_vm10 = vcmp.ge.f32.partialorder %v1520_v28, 0.0  ;;  %v1573_v45 = vmul.f32 %v3091_v35, %v1520_v28 }
 0x1a3   : > { %v1693_v58 = vsel %vm1641_vm7, %v1615_v23, %v1667_v5  ;;  %v1927_v16 = vsel %vm1875_vm8, %v1849_v10, %v1901_v63  ;;  %v1616_v57 = vadd.f32 %v3083_v27, %v1210_v15  ;;  %v1850_v26 = vadd.f32 %v3083_v27, %v1418_v24  ;;  %v1212_v21 = vpop.f32.mrb[65].mxu0  ;;  %v1420_v49 = vpop.f32.mrb[65].mxu1 }
 0x1a4   : > { %v1719_v25 = vmax.f32 %v3172_v36, %v1693_v58  ;;  %v1953_v51 = vmax.f32 %v3184_v7, %v1927_v16  ;;  %v1213_v54 = vpop.f32.mrb[66].mxu0  ;;  %v1421_v33 = vpop.f32.mrb[66].mxu1  ;;  %v1807_v23 = vmul.f32 %v1755_v53, %v3091_v35  ;;  %vm1781_vm13 = vcmp.ge.f32.partialorder %v1755_v53, 0.0 }
 0x1a5   : > { %vm1642_vm11 = vcmp.ge.f32.partialorder %v1616_v57, 0.0  ;;  %v1668_v42 = vmul.f32 %v1616_v57, %v3091_v35  ;;  %vm1876_vm12 = vcmp.ge.f32.partialorder %v1850_v26, 0.0  ;;  %v1902_v61 = vmul.f32 %v1850_v26, %v3091_v35  ;;  %v1215_v2 = vpop.f32.mrb[67].mxu0  ;;  %v1423_v6 = vpop.f32.mrb[67].mxu1 }
 0x1a6   : > { %v1979_v10 = vmax.f32 %v1719_v25, %v1953_v51  ;;  %v1617_v40 = vadd.f32 %v3083_v27, %v1213_v54  ;;  %v1851_v39 = vadd.f32 %v3083_v27, %v1421_v33  ;;  %v1521_v36 = vadd.f32 %v3083_v27, %v3064_v59 }
 0x1a7   : > { %v1694_v7 = vsel %vm1642_vm11, %v1616_v57, %v1668_v42  ;;  %v1928_v55 = vsel %vm1876_vm12, %v1850_v26, %v1902_v61  ;;  %v3357_v63 = vsel %vm1545_vm6, %v3308_v43, %v1572_v50  ;;  %v3362_v59 = vsel %vm1780_vm9, %v1754_v8, %v1806_v30 }
 0x1a8   : > { %v2443_v62 = vpack.c.bf16 %v1979_v10, %v1978_v44  ;;  %v1720_v46 = vmax.f32 %v3205_v13, %v1694_v7  ;;  %v1954_v5 = vmax.f32 %v3208_v14, %v1928_v55  ;;  %vm1643_vm14 = vcmp.ge.f32.partialorder %v1617_v40, 0.0 }
 0x1a9   : > { %v1669_v15 = vmul.f32 %v1617_v40, %v3091_v35  ;;  %vm1877_vm15 = vcmp.ge.f32.partialorder %v1851_v39, 0.0  ;;  %v1903_v24 = vmul.f32 %v1851_v39, %v3091_v35  ;;  %v3365_v44 = vsel %vm1546_vm10, %v1520_v28, %v1573_v45 }
 0x1aa   : > { %v3367_v13 = vsel %vm1781_vm13, %v1755_v53, %v1807_v23  ;;  %2496 = vst [vmem:[%s3292_s15 + $0x10] sm:$0xff] %v2443_v62   ;;  %v1980_v14 = vmax.f32 %v1720_v46, %v1954_v5  ;;  %v1218_v58 = vpop.f32.mrb[68].mxu0  ;;  %v1426_v16 = vpop.f32.mrb[68].mxu1  ;;  %v1574_v8 = vmul.f32 %v3091_v35, %v1521_v36  ;;  %v3375_v28 = vadd.f32 %v3083_v27, %v3066_v60 }
 0x1ab   : > { %v1695_v57 = vsel %vm1643_vm14, %v1617_v40, %v1669_v15  ;;  %v1929_v43 = vsel %vm1877_vm15, %v1851_v39, %v1903_v24  ;;  %v1618_v50 = vadd.f32 %v3083_v27, %v1218_v58  ;;  %v1852_v26 = vadd.f32 %v3083_v27, %v1426_v16  ;;  %v1220_v21 = vpop.f32.mrb[69].mxu0  ;;  %v1428_v49 = vpop.f32.mrb[69].mxu1 }
 0x1ac   : > { %v1721_v30 = vmax.f32 %v3215_v34, %v1695_v57  ;;  %v1955_v53 = vmax.f32 %v3218_v0, %v1929_v43  ;;  %v1221_v45 = vpop.f32.mrb[70].mxu0  ;;  %v1429_v25 = vpop.f32.mrb[70].mxu1  ;;  %v1522_v61 = vadd.f32 %v3083_v27, %v3068_v3  ;;  %vm1547_vm2 = vcmp.ge.f32.partialorder %v1521_v36, 0.0 }
 0x1ad   : > { %vm1644_vm0 = vcmp.ge.f32.partialorder %v1618_v50, 0.0  ;;  %v1670_v51 = vmul.f32 %v1618_v50, %v3091_v35  ;;  %vm1878_vm1 = vcmp.ge.f32.partialorder %v1852_v26, 0.0  ;;  %v1904_v54 = vmul.f32 %v1852_v26, %v3091_v35  ;;  %v1223_v33 = vpop.f32.mrb[71].mxu0  ;;  %v1431_v42 = vpop.f32.mrb[71].mxu1 }
 0x1ae   : > { %v1981_v2 = vmax.f32 %v1721_v30, %v1955_v53  ;;  %v1619_v60 = vadd.f32 %v3083_v27, %v1221_v45  ;;  %v1853_v34 = vadd.f32 %v3083_v27, %v1429_v25  ;;  %v1757_v0 = vadd.f32 %v3083_v27, %v3070_v4 }
 0x1af   : > { %v1696_v6 = vsel %vm1644_vm0, %v1618_v50, %v1670_v51  ;;  %v1930_v23 = vsel %vm1878_vm1, %v1852_v26, %v1904_v54  ;;  %vm1782_vm4 = vcmp.ge.f32.partialorder %v3375_v28, 0.0  ;;  %v3392_v55 = vsel %vm1547_vm2, %v1521_v36, %v1574_v8 }
 0x1b0   : > { %v2448_v10 = vpack.c.bf16 %v1981_v2, %v1980_v14  ;;  %v1722_v40 = vmax.f32 %v3221_v37, %v1696_v6  ;;  %v1956_v39 = vmax.f32 %v3223_v1, %v1930_v23  ;;  %vm1645_vm3 = vcmp.ge.f32.partialorder %v1619_v60, 0.0 }
 0x1b1   : > { %v1671_v3 = vmul.f32 %v1619_v60, %v3091_v35  ;;  %vm1879_vm5 = vcmp.ge.f32.partialorder %v1853_v34, 0.0  ;;  %v1905_v7 = vmul.f32 %v1853_v34, %v3091_v35  ;;  %v1808_v4 = vmul.f32 %v3375_v28, %v3091_v35 }
 0x1b2   : > { %vm1548_vm6 = vcmp.ge.f32.partialorder %v1522_v61, 0.0  ;;  %2497 = vst [vmem:[%s3292_s15 + $0x18] sm:$0xff] %v2448_v10   ;;  %v1982_v62 = vmax.f32 %v1722_v40, %v1956_v39  ;;  %v1226_v46 = vpop.f32.mrb[72].mxu0  ;;  %v1434_v37 = vpop.f32.mrb[72].mxu1  ;;  %v1575_v16 = vmul.f32 %v3091_v35, %v1522_v61  ;;  %v1809_v36 = vmul.f32 %v1757_v0, %v3091_v35 }
 0x1b3   : > { %v1697_v5 = vsel %vm1645_vm3, %v1619_v60, %v1671_v3  ;;  %v1931_v1 = vsel %vm1879_vm5, %v1853_v34, %v1905_v7  ;;  %v1620_v15 = vadd.f32 %v3083_v27, %v1226_v46  ;;  %v1854_v24 = vadd.f32 %v3083_v27, %v1434_v37  ;;  %v1228_v14 = vpop.f32.mrb[73].mxu0  ;;  %v1436_v58 = vpop.f32.mrb[73].mxu1 }
 0x1b4   : > { %v1723_v57 = vmax.f32 %v3225_v56, %v1697_v5  ;;  %v1957_v43 = vmax.f32 %v3227_v22, %v1931_v1  ;;  %v1229_v50 = vpop.f32.mrb[74].mxu0  ;;  %v1437_v26 = vpop.f32.mrb[74].mxu1  ;;  %v1523_v53 = vadd.f32 %v3083_v27, %v3072_v11  ;;  %vm1783_vm9 = vcmp.ge.f32.partialorder %v1757_v0, 0.0 }
 0x1b5   : > { %vm1646_vm7 = vcmp.ge.f32.partialorder %v1620_v15, 0.0  ;;  %v1672_v21 = vmul.f32 %v1620_v15, %v3091_v35  ;;  %vm1880_vm8 = vcmp.ge.f32.partialorder %v1854_v24, 0.0  ;;  %v1906_v49 = vmul.f32 %v1854_v24, %v3091_v35  ;;  %v1231_v8 = vpop.f32.mrb[75].mxu0  ;;  %v1439_v30 = vpop.f32.mrb[75].mxu1 }
 0x1b6   : > { %v1983_v45 = vmax.f32 %v1723_v57, %v1957_v43  ;;  %v1621_v25 = vadd.f32 %v3083_v27, %v1229_v50  ;;  %v1855_v56 = vadd.f32 %v3083_v27, %v1437_v26  ;;  %v1758_v22 = vadd.f32 %v3083_v27, %v3074_v12 }
 0x1b7   : > { %v1698_v51 = vsel %vm1646_vm7, %v1620_v15, %v1672_v21  ;;  %v1932_v54 = vsel %vm1880_vm8, %v1854_v24, %v1906_v49  ;;  %v3416_v11 = vsel %vm1782_vm4, %v3375_v28, %v1808_v4  ;;  %v3421_v12 = vsel %vm1548_vm6, %v1522_v61, %v1575_v16 }
 0x1b8   : > { %v2453_v33 = vpack.c.bf16 %v1983_v45, %v1982_v62  ;;  %v1724_v42 = vmax.f32 %v3233_v18, %v1698_v51  ;;  %v1958_v2 = vmax.f32 %v3249_v41, %v1932_v54  ;;  %vm1647_vm10 = vcmp.ge.f32.partialorder %v1621_v25, 0.0 }
 0x1b9   : > { %v1673_v60 = vmul.f32 %v1621_v25, %v3091_v35  ;;  %vm1881_vm11 = vcmp.ge.f32.partialorder %v1855_v56, 0.0  ;;  %v1907_v34 = vmul.f32 %v1855_v56, %v3091_v35  ;;  %v3423_v6 = vsel %vm1783_vm9, %v1757_v0, %v1809_v36 }
 0x1ba   : > { %vm1549_vm12 = vcmp.ge.f32.partialorder %v1523_v53, 0.0  ;;  %2498 = vst [vmem:[%s3292_s15 + $0x20] sm:$0xff] %v2453_v33   ;;  %v1984_v18 = vmax.f32 %v1724_v42, %v1958_v2  ;;  %v1234_v41 = vpop.f32.mrb[76].mxu0  ;;  %v1442_v23 = vpop.f32.mrb[76].mxu1  ;;  %v1576_v4 = vmul.f32 %v3091_v35, %v1523_v53  ;;  %v1810_v61 = vmul.f32 %v1758_v22, %v3091_v35 }
 0x1bb   : > { %v1699_v10 = vsel %vm1647_vm10, %v1621_v25, %v1673_v60  ;;  %v1933_v40 = vsel %vm1881_vm11, %v1855_v56, %v1907_v34  ;;  %v1622_v28 = vadd.f32 %v3083_v27, %v1234_v41  ;;  %v1856_v39 = vadd.f32 %v3083_v27, %v1442_v23  ;;  %v1236_v3 = vpop.f32.mrb[77].mxu0  ;;  %v1444_v7 = vpop.f32.mrb[77].mxu1 }
 0x1bc   : > { %v1725_v0 = vmax.f32 %v3254_v29, %v1699_v10  ;;  %v1959_v62 = vmax.f32 %v3267_v38, %v1933_v40  ;;  %v1237_v46 = vpop.f32.mrb[78].mxu0  ;;  %v1445_v37 = vpop.f32.mrb[78].mxu1  ;;  %v1524_v14 = vadd.f32 %v3083_v27, %v3076_v19  ;;  %vm1784_vm15 = vcmp.ge.f32.partialorder %v1758_v22, 0.0 }
 0x1bd   : > { %vm1648_vm13 = vcmp.ge.f32.partialorder %v1622_v28, 0.0  ;;  %v1674_v5 = vmul.f32 %v1622_v28, %v3091_v35  ;;  %vm1882_vm14 = vcmp.ge.f32.partialorder %v1856_v39, 0.0  ;;  %v1908_v1 = vmul.f32 %v1856_v39, %v3091_v35  ;;  %v1239_v15 = vpop.f32.mrb[79].mxu0  ;;  %v1447_v24 = vpop.f32.mrb[79].mxu1 }
 0x1be   : > { %v1985_v58 = vmax.f32 %v1725_v0, %v1959_v62  ;;  %v1623_v16 = vadd.f32 %v3083_v27, %v1237_v46  ;;  %v1857_v29 = vadd.f32 %v3083_v27, %v1445_v37  ;;  %v1759_v38 = vadd.f32 %v3083_v27, %v3078_v20 }
 0x1bf   : > { %v1700_v36 = vsel %vm1648_vm13, %v1622_v28, %v1674_v5  ;;  %v1934_v57 = vsel %vm1882_vm14, %v1856_v39, %v1908_v1  ;;  %v3443_v19 = vsel %vm1549_vm12, %v1523_v53, %v1576_v4  ;;  %v3447_v8 = vsel %vm1784_vm15, %v1758_v22, %v1810_v61 }
 0x1c0   : > { %v2458_v43 = vpack.c.bf16 %v1985_v58, %v1984_v18  ;;  %v1726_v50 = vmax.f32 %v3301_v48, %v1700_v36  ;;  %v1960_v26 = vmax.f32 %v3304_v17, %v1934_v57  ;;  %vm1649_vm0 = vcmp.ge.f32.partialorder %v1623_v16, 0.0 }
 0x1c1   : > { %v1675_v21 = vmul.f32 %v1623_v16, %v3091_v35  ;;  %vm1883_vm1 = vcmp.ge.f32.partialorder %v1857_v29, 0.0  ;;  %v1909_v49 = vmul.f32 %v1857_v29, %v3091_v35  ;;  %vm1550_vm2 = vcmp.ge.f32.partialorder %v1524_v14, 0.0 }
 0x1c2   : > { %v1577_v20 = vmul.f32 %v3091_v35, %v1524_v14  ;;  %2499 = vst [vmem:[%s3292_s15 + $0x28] sm:$0xff] %v2458_v43   ;;  %v1986_v30 = vmax.f32 %v1726_v50, %v1960_v26  ;;  %v1242_v45 = vpop.f32.mrb[80].mxu0  ;;  %v1450_v48 = vpop.f32.mrb[80].mxu1  ;;  %vm1785_vm3 = vcmp.ge.f32.partialorder %v1759_v38, 0.0  ;;  %v1811_v33 = vmul.f32 %v1759_v38, %v3091_v35 }
 0x1c3   : > { %v1701_v25 = vsel %vm1649_vm0, %v1623_v16, %v1675_v21  ;;  %v1935_v17 = vsel %vm1883_vm1, %v1857_v29, %v1909_v49  ;;  %v1624_v56 = vadd.f32 %v3083_v27, %v1242_v45  ;;  %v1858_v53 = vadd.f32 %v3083_v27, %v1450_v48  ;;  %v1244_v51 = vpop.f32.mrb[81].mxu0  ;;  %v1452_v54 = vpop.f32.mrb[81].mxu1  ;;  %v3623_v49 = vld [vmem:[#allocation3_spill] sm:$0xff] }
 0x1c4   : > { %v1727_v22 = vmax.f32 %v3314_v52, %v1701_v25  ;;  %v1961_v42 = vmax.f32 %v3317_v9, %v1935_v17  ;;  %v1245_v2 = vpop.f32.mrb[82].mxu0  ;;  %v1453_v60 = vpop.f32.mrb[82].mxu1  ;;  %v1525_v10 = vadd.f32 %v3083_v27, %v3087_v31  ;;  %v3463_v9 = vsel %vm1550_vm2, %v1524_v14, %v1577_v20 }
 0x1c5   : > { %vm1650_vm4 = vcmp.ge.f32.partialorder %v1624_v56, 0.0  ;;  %v1676_v34 = vmul.f32 %v1624_v56, %v3091_v35  ;;  %vm1884_vm5 = vcmp.ge.f32.partialorder %v1858_v53, 0.0  ;;  %v1910_v18 = vmul.f32 %v1858_v53, %v3091_v35  ;;  %v1247_v41 = vpop.f32.mrb[83].mxu0  ;;  %v1455_v23 = vpop.f32.mrb[83].mxu1 }
 0x1c6   : > { %v1987_v40 = vmax.f32 %v1727_v22, %v1961_v42  ;;  %v1625_v28 = vadd.f32 %v3083_v27, %v1245_v2  ;;  %v1859_v52 = vadd.f32 %v3083_v27, %v1453_v60  ;;  %v1760_v39 = vadd.f32 %v3083_v27, %v3089_v32  ;;  %v3624_v2 = vld [vmem:[#allocation4_spill] sm:$0xff] }
 0x1c7   : > { %v1702_v3 = vsel %vm1650_vm4, %v1624_v56, %v1676_v34  ;;  %v1936_v7 = vsel %vm1884_vm5, %v1858_v53, %v1910_v18  ;;  %v3470_v31 = vsel %vm1785_vm3, %v1759_v38, %v1811_v33  ;;  %vm1551_vm8 = vcmp.ge.f32.partialorder %v1525_v10, 0.0 }
 0x1c8   : > { %v2463_v4 = vpack.c.bf16 %v1987_v40, %v1986_v30  ;;  %v1728_v61 = vmax.f32 %v3357_v63, %v1702_v3  ;;  %v1962_v0 = vmax.f32 %v3362_v59, %v1936_v7  ;;  %vm1651_vm6 = vcmp.ge.f32.partialorder %v1625_v28, 0.0 }
 0x1c9   : > { %v1677_v62 = vmul.f32 %v1625_v28, %v3091_v35  ;;  %vm1885_vm7 = vcmp.ge.f32.partialorder %v1859_v52, 0.0  ;;  %v1911_v46 = vmul.f32 %v1859_v52, %v3091_v35  ;;  %v1578_v37 = vmul.f32 %v3091_v35, %v1525_v10 }
 0x1ca   : > { %v1526_v32 = vadd.f32 %v3083_v27, %v3101_v47  ;;  %2500 = vst [vmem:[%s3292_s15 + $0x30] sm:$0xff] %v2463_v4   ;;  %v1988_v5 = vmax.f32 %v1728_v61, %v1962_v0  ;;  %v1250_v63 = vpop.f32.mrb[84].mxu0  ;;  %v1458_v1 = vpop.f32.mrb[84].mxu1  ;;  %vm1786_vm9 = vcmp.ge.f32.partialorder %v1760_v39, 0.0  ;;  %v1812_v29 = vmul.f32 %v1760_v39, %v3091_v35 }
 0x1cb   : > { %v1703_v59 = vsel %vm1651_vm6, %v1625_v28, %v1677_v62  ;;  %v1937_v15 = vsel %vm1885_vm7, %v1859_v52, %v1911_v46  ;;  %v1626_v24 = vadd.f32 %v3083_v27, %v1250_v63  ;;  %v1860_v14 = vadd.f32 %v3083_v27, %v1458_v1  ;;  %v1252_v58 = vpop.f32.mrb[85].mxu0  ;;  %v1460_v16 = vpop.f32.mrb[85].mxu1 }
 0x1cc   : > { %v1729_v38 = vmax.f32 %v3365_v44, %v1703_v59  ;;  %v1963_v36 = vmax.f32 %v3367_v13, %v1937_v15  ;;  %v1253_v47 = vpop.f32.mrb[86].mxu0  ;;  %v1461_v57 = vpop.f32.mrb[86].mxu1  ;;  %v1761_v20 = vadd.f32 %v3083_v27, %v3623_v49  ;;  %v3490_v13 = vsel %vm1551_vm8, %v1525_v10, %v1578_v37  ;;  %v3625_v37 = vld [vmem:[#allocation5_spill] sm:$0xff] }
 0x1cd   : > { %vm1652_vm10 = vcmp.ge.f32.partialorder %v1626_v24, 0.0  ;;  %v1678_v43 = vmul.f32 %v1626_v24, %v3091_v35  ;;  %vm1886_vm11 = vcmp.ge.f32.partialorder %v1860_v14, 0.0  ;;  %v1912_v50 = vmul.f32 %v1860_v14, %v3091_v35  ;;  %v1255_v26 = vpop.f32.mrb[87].mxu0  ;;  %v1463_v21 = vpop.f32.mrb[87].mxu1 }
 0x1ce   : > { %v1989_v30 = vmax.f32 %v1729_v38, %v1963_v36  ;;  %v1627_v45 = vadd.f32 %v3083_v27, %v1253_v47  ;;  %v1861_v44 = vadd.f32 %v3083_v27, %v1461_v57  ;;  %v1579_v48 = vmul.f32 %v3091_v35, %v1526_v32  ;;  %v3528_v38 = vld [vmem:[%s3610_s2] ss:$0 sm:$0xff]  ;;  %v3626_v36 = vld [vmem:[#allocation6_spill] sm:$0xff] }
 0x1cf   : > { %v1704_v25 = vsel %vm1652_vm10, %v1626_v24, %v1678_v43  ;;  %v1938_v17 = vsel %vm1886_vm11, %v1860_v14, %v1912_v50  ;;  %vm1552_vm13 = vcmp.ge.f32.partialorder %v1526_v32, 0.0  ;;  %v3498_v22 = vsel %vm1786_vm9, %v1760_v39, %v1812_v29 }
 0x1d0   : > { %v2468_v56 = vpack.c.bf16 %v1989_v30, %v1988_v5  ;;  %v1730_v53 = vmax.f32 %v3392_v55, %v1704_v25  ;;  %v1964_v51 = vmax.f32 %v3416_v11, %v1938_v17  ;;  %vm1653_vm12 = vcmp.ge.f32.partialorder %v1627_v45, 0.0 }
 0x1d1   : > { %v1679_v54 = vmul.f32 %v1627_v45, %v3091_v35  ;;  %vm1887_vm14 = vcmp.ge.f32.partialorder %v1861_v44, 0.0  ;;  %v1913_v33 = vmul.f32 %v1861_v44, %v3091_v35  ;;  %v1813_v42 = vmul.f32 %v1761_v20, %v3091_v35 }
 0x1d2   : > { %v1527_v60 = vadd.f32 %v3083_v27, %v3624_v2  ;;  %2501 = vst [vmem:[%s3292_s15 + $0x38] sm:$0xff] %v2468_v56   ;;  %v1990_v34 = vmax.f32 %v1730_v53, %v1964_v51  ;;  %v1258_v55 = vpop.f32.mrb[88].mxu0  ;;  %v1466_v18 = vpop.f32.mrb[88].mxu1  ;;  %v3507_v52 = vsel %vm1552_vm13, %v1526_v32, %v1579_v48  ;;  %vm1787_vm15 = vcmp.ge.f32.partialorder %v1761_v20, 0.0 }
 0x1d3   : > { %v1705_v11 = vsel %vm1653_vm12, %v1627_v45, %v1679_v54  ;;  %v1939_v41 = vsel %vm1887_vm14, %v1861_v44, %v1913_v33  ;;  %v1628_v23 = vadd.f32 %v3083_v27, %v1258_v55  ;;  %v1862_v10 = vadd.f32 %v3083_v27, %v1466_v18  ;;  %v1260_v40 = vpop.f32.mrb[89].mxu0  ;;  %v1468_v28 = vpop.f32.mrb[89].mxu1  ;;  %v3627_v45 = vld [vmem:[#allocation7_spill] sm:$0xff] }
 0x1d4   : > { %v1731_v39 = vmax.f32 %v3421_v12, %v1705_v11  ;;  %v1965_v3 = vmax.f32 %v3423_v6, %v1939_v41  ;;  %v1261_v7 = vpop.f32.mrb[90].mxu0  ;;  %v1469_v4 = vpop.f32.mrb[90].mxu1  ;;  %v1762_v5 = vadd.f32 %v3083_v27, %v3625_v37  ;;  %v3517_v1 = vsel %vm1787_vm15, %v1761_v20, %v1813_v42 }
 0x1d5   : > { %vm1654_vm0 = vcmp.ge.f32.partialorder %v1628_v23, 0.0  ;;  %v1680_v61 = vmul.f32 %v1628_v23, %v3091_v35  ;;  %vm1888_vm1 = vcmp.ge.f32.partialorder %v1862_v10, 0.0  ;;  %v1914_v0 = vmul.f32 %v1862_v10, %v3091_v35  ;;  %v1263_v62 = vpop.f32.mrb[91].mxu0  ;;  %v1471_v46 = vpop.f32.mrb[91].mxu1 }
 0x1d6   : > { %v1991_v32 = vmax.f32 %v1731_v39, %v1965_v3  ;;  %v1629_v63 = vadd.f32 %v3083_v27, %v1261_v7  ;;  %v1863_v12 = vadd.f32 %v3083_v27, %v1469_v4  ;;  %v1580_v6 = vmul.f32 %v3091_v35, %v1527_v60  ;;  %v3629_v3 = vld [vmem:[#allocation9_spill] sm:$0xff] }
 0x1d7   : > { %v1706_v59 = vsel %vm1654_vm0, %v1628_v23, %v1680_v61  ;;  %v1940_v15 = vsel %vm1888_vm1, %v1862_v10, %v1914_v0  ;;  %vm1553_vm3 = vcmp.ge.f32.partialorder %v1527_v60, 0.0  ;;  %vm1788_vm5 = vcmp.ge.f32.partialorder %v1762_v5, 0.0 }
 0x1d8   : > { %v2473_v24 = vpack.c.bf16 %v1991_v32, %v1990_v34  ;;  %v1732_v14 = vmax.f32 %v3443_v19, %v1706_v59  ;;  %v1966_v58 = vmax.f32 %v3447_v8, %v1940_v15  ;;  %vm1655_vm2 = vcmp.ge.f32.partialorder %v1629_v63, 0.0 }
 0x1d9   : > { %v1681_v16 = vmul.f32 %v1629_v63, %v3091_v35  ;;  %vm1889_vm4 = vcmp.ge.f32.partialorder %v1863_v12, 0.0  ;;  %v1915_v29 = vmul.f32 %v1863_v12, %v3091_v35  ;;  %v1814_v27 = vmul.f32 %v1762_v5, %v3091_v35 }
 0x1da   : > { %v1528_v19 = vadd.f32 %v3528_v38, %v3626_v36  ;;  %2502 = vst [vmem:[%s3292_s15 + $0x40] sm:$0xff] %v2473_v24   ;;  %v1992_v8 = vmax.f32 %v1732_v14, %v1966_v58  ;;  %v1266_v47 = vpop.f32.mrb[92].mxu0  ;;  %v1474_v57 = vpop.f32.mrb[92].mxu1  ;;  %v3536_v30 = vsel %vm1553_vm3, %v1527_v60, %v1580_v6  ;;  %v3540_v44 = vadd.f32 %v3528_v38, %v3627_v45  ;;  %v3631_v45 = vld [vmem:[#allocation11_spill] sm:$0xff] }
 0x1db   : > { %v1707_v43 = vsel %vm1655_vm2, %v1629_v63, %v1681_v16  ;;  %v1941_v50 = vsel %vm1889_vm4, %v1863_v12, %v1915_v29  ;;  %v1630_v26 = vadd.f32 %v3528_v38, %v1266_v47  ;;  %v1864_v21 = vadd.f32 %v3528_v38, %v1474_v57  ;;  %v1268_v49 = vpop.f32.mrb[93].mxu0  ;;  %v1476_v20 = vpop.f32.mrb[93].mxu1 }
 0x1dc   : > { %v1733_v48 = vmax.f32 %v3463_v9, %v1707_v43  ;;  %v1967_v25 = vmax.f32 %v3470_v31, %v1941_v50  ;;  %v1269_v17 = vpop.f32.mrb[94].mxu0  ;;  %v1477_v56 = vpop.f32.mrb[94].mxu1  ;;  %v1840_v42 = vsel %vm1788_vm5, %v1762_v5, %v1814_v27  ;;  %v1581_v9 = vmul.f32 %v3091_v35, %v1528_v19  ;;  %v3628_v31 = vld [vmem:[#allocation8_spill] sm:$0xff] }
 0x1dd   : > { %vm1656_vm6 = vcmp.ge.f32.partialorder %v1630_v26, 0.0  ;;  %v1682_v53 = vmul.f32 %v1630_v26, %v3091_v35  ;;  %vm1890_vm7 = vcmp.ge.f32.partialorder %v1864_v21, 0.0  ;;  %v1916_v51 = vmul.f32 %v1864_v21, %v3091_v35  ;;  %v1271_v54 = vpop.f32.mrb[95].mxu0  ;;  %v1479_v33 = vpop.f32.mrb[95].mxu1 }
 0x1de   : > { %v1993_v2 = vmax.f32 %v1733_v48, %v1967_v25  ;;  %v1631_v60 = vadd.f32 %v3528_v38, %v1269_v17  ;;  %v1865_v34 = vadd.f32 %v3528_v38, %v1477_v56  ;;  %v1529_v55 = vadd.f32 %v3528_v38, %v3628_v31 }
 0x1df   : > { %v1708_v18 = vsel %vm1656_vm6, %v1630_v26, %v1682_v53  ;;  %v1942_v11 = vsel %vm1890_vm7, %v1864_v21, %v1916_v51  ;;  %vm1554_vm9 = vcmp.ge.f32.partialorder %v1528_v19, 0.0  ;;  %vm1789_vm11 = vcmp.ge.f32.partialorder %v3540_v44, 0.0 }
 0x1e0   : > { %v2478_v41 = vpack.c.bf16 %v1993_v2, %v1992_v8  ;;  %v1734_v23 = vmax.f32 %v3490_v13, %v1708_v18  ;;  %v1968_v10 = vmax.f32 %v3498_v22, %v1942_v11  ;;  %vm1657_vm8 = vcmp.ge.f32.partialorder %v1631_v60, 0.0 }
 0x1e1   : > { %v1683_v40 = vmul.f32 %v1631_v60, %v3091_v35  ;;  %vm1891_vm10 = vcmp.ge.f32.partialorder %v1865_v34, 0.0  ;;  %v1917_v28 = vmul.f32 %v1865_v34, %v3091_v35  ;;  %v1815_v39 = vmul.f32 %v3540_v44, %v3091_v35 }
 0x1e2   : > { %v1764_v7 = vadd.f32 %v3528_v38, %v3629_v3  ;;  %2503 = vst [vmem:[%s3292_s15 + $0x48] sm:$0xff] %v2478_v41   ;;  %v1994_v4 = vmax.f32 %v1734_v23, %v1968_v10  ;;  %v1274_v13 = vpop.f32.mrb[96].mxu0  ;;  %v1482_v61 = vpop.f32.mrb[96].mxu1  ;;  %v1607_v32 = vsel %vm1554_vm9, %v1528_v19, %v1581_v9  ;;  %vm1555_vm12 = vcmp.ge.f32.partialorder %v1529_v55, 0.0 }
 0x1e3   : > { %v1709_v22 = vsel %vm1657_vm8, %v1631_v60, %v1683_v40  ;;  %v1943_v0 = vsel %vm1891_vm10, %v1865_v34, %v1917_v28  ;;  %v1632_v62 = vadd.f32 %v3528_v38, %v1274_v13  ;;  %v1866_v46 = vadd.f32 %v3528_v38, %v1482_v61  ;;  %v1276_v37 = vpop.f32.mrb[97].mxu0  ;;  %v1484_v5 = vpop.f32.mrb[97].mxu1 }
 0x1e4   : > { %v1735_v63 = vmax.f32 %v3507_v52, %v1709_v22  ;;  %v1969_v12 = vmax.f32 %v3517_v1, %v1943_v0  ;;  %v1277_v6 = vpop.f32.mrb[98].mxu0  ;;  %v1485_v59 = vpop.f32.mrb[98].mxu1  ;;  %v1582_v16 = vmul.f32 %v3091_v35, %v1529_v55  ;;  %v1816_v52 = vmul.f32 %v1764_v7, %v3091_v35  ;;  %v3630_v1 = vld [vmem:[#allocation10_spill] sm:$0xff] }
 0x1e5   : > { %vm1658_vm13 = vcmp.ge.f32.partialorder %v1632_v62, 0.0  ;;  %v1684_v15 = vmul.f32 %v1632_v62, %v3091_v35  ;;  %vm1892_vm14 = vcmp.ge.f32.partialorder %v1866_v46, 0.0  ;;  %v1918_v24 = vmul.f32 %v1866_v46, %v3091_v35  ;;  %v1279_v14 = vpop.f32.mrb[99].mxu0  ;;  %v1487_v58 = vpop.f32.mrb[99].mxu1 }
 0x1e6   : > { %v1995_v29 = vmax.f32 %v1735_v63, %v1969_v12  ;;  %v1633_v27 = vadd.f32 %v3528_v38, %v1277_v6  ;;  %v1867_v36 = vadd.f32 %v3528_v38, %v1485_v59  ;;  %v1530_v19 = vadd.f32 %v3528_v38, %v3630_v1 }
 0x1e7   : > { %v1710_v8 = vsel %vm1658_vm13, %v1632_v62, %v1684_v15  ;;  %v1944_v47 = vsel %vm1892_vm14, %v1866_v46, %v1918_v24  ;;  %vm1790_vm0 = vcmp.ge.f32.partialorder %v1764_v7, 0.0  ;;  %v1841_v49 = vsel %vm1789_vm11, %v3540_v44, %v1815_v39 }
 0x1e8   : > { %v2483_v57 = vpack.c.bf16 %v1995_v29, %v1994_v4  ;;  %v1736_v43 = vmax.f32 %v3536_v30, %v1710_v8  ;;  %v1970_v50 = vmax.f32 %v1840_v42, %v1944_v47  ;;  %vm1659_vm15 = vcmp.ge.f32.partialorder %v1633_v27, 0.0 }
 0x1e9   : > { %v1685_v26 = vmul.f32 %v1633_v27, %v3091_v35  ;;  %vm1893_vm1 = vcmp.ge.f32.partialorder %v1867_v36, 0.0  ;;  %v1919_v21 = vmul.f32 %v1867_v36, %v3091_v35  ;;  %v1608_v20 = vsel %vm1555_vm12, %v1529_v55, %v1582_v16 }
 0x1ea   : > { %v1765_v48 = vadd.f32 %v3528_v38, %v3631_v45  ;;  %2504 = vst [vmem:[%s3292_s15 + $0x50] sm:$0xff] %v2483_v57   ;;  %v1996_v25 = vmax.f32 %v1736_v43, %v1970_v50  ;;  %v1282_v30 = vpop.f32.mrb[100].mxu0  ;;  %v1490_v17 = vpop.f32.mrb[100].mxu1  ;;  %v1842_v2 = vsel %vm1790_vm0, %v1764_v7, %v1816_v52  ;;  %vm1556_vm2 = vcmp.ge.f32.partialorder %v1530_v19, 0.0 }
 0x1eb   : > { %v1711_v56 = vsel %vm1659_vm15, %v1633_v27, %v1685_v26  ;;  %v1945_v53 = vsel %vm1893_vm1, %v1867_v36, %v1919_v21  ;;  %v1634_v51 = vadd.f32 %v3528_v38, %v1282_v30  ;;  %v1868_v54 = vadd.f32 %v3528_v38, %v1490_v17  ;;  %v1284_v33 = vpop.f32.mrb[101].mxu0  ;;  %v1492_v42 = vpop.f32.mrb[101].mxu1 }
 0x1ec   : > { %v1737_v44 = vmax.f32 %v1607_v32, %v1711_v56  ;;  %v1971_v60 = vmax.f32 %v1841_v49, %v1945_v53  ;;  %v1285_v34 = vpop.f32.mrb[102].mxu0  ;;  %v1493_v9 = vpop.f32.mrb[102].mxu1  ;;  %v1583_v41 = vmul.f32 %v3091_v35, %v1530_v19  ;;  %vm1791_vm5 = vcmp.ge.f32.partialorder %v1765_v48, 0.0 }
 0x1ed   : > { %vm1660_vm3 = vcmp.ge.f32.partialorder %v1634_v51, 0.0  ;;  %v1686_v31 = vmul.f32 %v1634_v51, %v3091_v35  ;;  %vm1894_vm4 = vcmp.ge.f32.partialorder %v1868_v54, 0.0  ;;  %v1920_v55 = vmul.f32 %v1868_v54, %v3091_v35  ;;  %v1287_v18 = vpop.f32.mrb[103].mxu0  ;;  %v1495_v11 = vpop.f32.mrb[103].mxu1 }
 0x1ee   : > { %v1997_v23 = vmax.f32 %v1737_v44, %v1971_v60  ;;  %v1635_v10 = vadd.f32 %v3528_v38, %v1285_v34  ;;  %v1869_v40 = vadd.f32 %v3528_v38, %v1493_v9  ;;  %v1817_v28 = vmul.f32 %v1765_v48, %v3091_v35 }
 0x1ef   : > { %v1712_v39 = vsel %vm1660_vm3, %v1634_v51, %v1686_v31  ;;  %v1946_v3 = vsel %vm1894_vm4, %v1868_v54, %v1920_v55  ;;  %v1609_v62 = vsel %vm1556_vm2, %v1530_v19, %v1583_v41 }
 0x1f0   : > { %v2488_v7 = vpack.c.bf16 %v1997_v23, %v1996_v25  ;;  %v1738_v4 = vmax.f32 %v1608_v20, %v1712_v39  ;;  %v1972_v13 = vmax.f32 %v1842_v2, %v1946_v3  ;;  %vm1661_vm6 = vcmp.ge.f32.partialorder %v1635_v10, 0.0 }
 0x1f1   : > { %v1687_v61 = vmul.f32 %v1635_v10, %v3091_v35  ;;  %vm1895_vm7 = vcmp.ge.f32.partialorder %v1869_v40, 0.0  ;;  %v1921_v22 = vmul.f32 %v1869_v40, %v3091_v35  ;;  %v1843_v38 = vsel %vm1791_vm5, %v1765_v48, %v1817_v28 }
 0x1f2   : > { %2505 = vst [vmem:[%s3292_s15 + $0x58] sm:$0xff] %v2488_v7   ;;  %v1998_v0 = vmax.f32 %v1738_v4, %v1972_v13 }
 0x1f3   : > { %v1713_v46 = vsel %vm1661_vm6, %v1635_v10, %v1687_v61  ;;  %v1947_v37 = vsel %vm1895_vm7, %v1869_v40, %v1921_v22 }
 0x1f4   : > { %v1739_v5 = vmax.f32 %v1609_v62, %v1713_v46  ;;  %v1973_v32 = vmax.f32 %v1843_v38, %v1947_v37 }
 0x1f6   : > { %v1999_v63 = vmax.f32 %v1739_v5, %v1973_v32 }
 0x1f8   : > { %v2493_v12 = vpack.c.bf16 %v1999_v63, %v1998_v0 }
 0x1fa   : > { %2506 = vst [vmem:[%s3292_s15 + $0x60] sm:$0xff] %v2493_v12  }
 0x1fb PF: > { %s15_s19 = sadd.s32 1, %s2759_s19   ;;  %s3632_s17 = smov %s2755_s18 }
 0x1fc   : > { %p12_p6 = scmp.ge.s32.totalorder %s15_s19, 4   ;;  %s3633_s18 = smov %s3635_s3 }
 0x1fe   :  { %14 = sbr.rel (!%p12_p6) target bundleno = 2 (0x2), region = 72 }

// kernel: embedding_net_forward.5
= control target key start
LH: loop header
LB: loop body
LE: loop exit
PB: predicated region body
PF: predicated region fallthrough
CT: control target
= control target key end

     0   :  { %13 = vsyncpa [#allocation3], 0  ;;  %s1922_s0 = inlined_call_operand.vmem [shape: bf16[16,576], index: 0, kind: input, shape index: {}]   ;;  %s1923_s1 = inlined_call_operand.vmem [shape: bf16[576,256], index: 1, kind: input, shape index: {}]   ;;  %s1924_s2 = inlined_call_operand.vmem [shape: f32[1,256], index: 2, kind: input, shape index: {}]   ;;  %s1925_s3 = inlined_call_operand.vmem [shape: bf16[256,256], index: 3, kind: input, shape index: {}]   ;;  %s1926_s4 = inlined_call_operand.vmem [shape: f32[1,256], index: 4, kind: input, shape index: {}]   ;;  %s1927_s5 = inlined_call_operand.vmem [shape: bf16[256,128], index: 5, kind: input, shape index: {}]   ;;  %s1928_s6 = inlined_call_operand.vmem [shape: f32[1,128], index: 6, kind: input, shape index: {}]   ;;  %s1929_s7 = inlined_call_operand.vmem [shape: f32[2], index: 7, kind: input, shape index: {}]   ;;  %s1930_s8 = inlined_call_operand.vmem [shape: f32[16,128], index: 8, kind: output, shape index: {}]  }
   0x1   :  { %s34_s29 = sshll.u32 %s1929_s7, 4  ;;  %s35_s29 = int_to_ptr.vmem [resolvable:$true] %s34_s29 }
   0x2   :  { %s1456_s30 = scalar_lea.vmem %s35_s29, 16  ;;  %p1461_p1 = scmp.lt.s32.totalorder %s35_s29, %s35_s29 }
   0x3   :  { %p1457_p0 = scmp.ne.s32.totalorder %s35_s29, %s1456_s30  ;;  %p1462_p2 = scmp.lt.s32.totalorder %s1456_s30, %s1456_s30 }
   0x5   :  { %p1463_p3 = por %p1462_p2, %p1461_p1 }
   0x7   :  { %p1464_p4 = pnand %p1463_p3, %p1457_p0 }
   0x9   :  { %1467 = shalt.err (!%p1464_p4)
}
   0xa   :  { %s1470_s9 = smov [#allocation2]  }
   0xb   :  { %37 = dma.vmem_to_smem %s35_s29, 16, %s1470_s9, [#allocation3]  }
   0xc   :  { %1468 = dma.done.wait [#allocation3], 16  }
   0xd   :  { %1469 = vsyncadd [#allocation3], 4294967280 }
   0xe   :  { %41 = sfence }
   0xf   :  { %v1277_v0 = vld [vmem:[%s1923_s1 + $0x4] ss:$8 sps:$4 sm:$0xff]   ;;  %v1279_v1 = vld [vmem:[%s1923_s1] ss:$8 sps:$4 sm:$0xff]   ;;  %v1471_v2 = vmov 0   ;;  %vm518_vm0 = vcmask 523264  }
  0x10   :  { %640 = vmatprep.mubr.bf16.mxu1 %v1471_v2  ;;  %522 = vmatprep.subr.bf16.mxu0 %v1277_v0  ;;  %v1280_v3 = vld [vmem:[%s1923_s1 + $0x14] ss:$8 sps:$4 sm:$0xff]   ;;  %v1282_v4 = vld [vmem:[%s1923_s1 + $0x10] ss:$8 sps:$4 sm:$0xff]   ;;  %v1283_v5 = vld [vmem:[%s1923_s1 + $0x24] ss:$8 sps:$4 sm:$0xff]  }
  0x11   :  { %523 = vmatpush1.bf16.msra.mxu0 %v1279_v1  ;;  %v1285_v6 = vld [vmem:[%s1923_s1 + $0x20] ss:$8 sps:$4 sm:$0xff]   ;;  %v1286_v7 = vld [vmem:[%s1923_s1 + $0x34] ss:$8 sps:$4 sm:$0xff]   ;;  %v1288_v8 = vld [vmem:[%s1923_s1 + $0x30] ss:$8 sps:$4 sm:$0xff]  }
  0x12   :  { %524 = vmatprep.subr.bf16.mxu0 %v1280_v3  ;;  %v1289_v9 = vld [vmem:[%s1923_s1 + $0x44] ss:$8 sps:$4 sm:$0xff]   ;;  %v1291_v10 = vld [vmem:[%s1923_s1 + $0x40] ss:$8 sps:$4 sm:$0xff]   ;;  %v1292_v11 = vld [vmem:[%s1923_s1 + $0x54] ss:$8 sps:$4 sm:$0xff]  }
  0x13   :  { %v1294_v12 = vld [vmem:[%s1923_s1 + $0x50] ss:$8 sps:$4 sm:$0xff]   ;;  %v1295_v13 = vld [vmem:[%s1923_s1 + $0x64] ss:$8 sps:$4 sm:$0xff]   ;;  %v1297_v15 = vld [vmem:[%s1923_s1 + $0x60] ss:$8 sps:$4 sm:$0xff]  }
  0x14   :  { %v1327_v14 = vld [vmem:[%s1922_s0 + $0x4] ss:$20 sps:$4 sm:$0xff]   ;;  %v1298_v16 = vld [vmem:[%s1923_s1 + $0x74] ss:$8 sps:$4 sm:$0xff]   ;;  %v1303_v19 = vld [vmem:[%s1923_s1 + $0x80] ss:$8 sps:$4 sm:$0xff]  }
  0x15   :  { %525 = vmatpush1.bf16.msra.mxu0 %v1282_v4  ;;  %554 = vmatprep.mubr.bf16.mxu0 %v1327_v14  ;;  %v1300_v17 = vld [vmem:[%s1923_s1 + $0x70] ss:$8 sps:$4 sm:$0xff]   ;;  %v1301_v18 = vld [vmem:[%s1923_s1 + $0x84] ss:$8 sps:$4 sm:$0xff]   ;;  %v1304_v20 = vld [vmem:[%s1923_s1 + $0x94] ss:$8 sps:$4 sm:$0xff]  }
  0x16   :  { %526 = vmatprep.subr.bf16.mxu0 %v1283_v5  ;;  %v1306_v21 = vld [vmem:[%s1923_s1 + $0x90] ss:$8 sps:$4 sm:$0xff]   ;;  %v1307_v22 = vld [vmem:[%s1923_s1 + $0xa4] ss:$8 sps:$4 sm:$0xff]   ;;  %v1309_v23 = vld [vmem:[%s1923_s1 + $0xa0] ss:$8 sps:$4 sm:$0xff]  }
  0x17   :  { %v1364_v24 = vld [vmem:[%s1923_s1 + $0x204] ss:$8 sps:$4 sm:$0xff]   ;;  %v1310_v25 = vld [vmem:[%s1923_s1 + $0xb4] ss:$8 sps:$4 sm:$0xff]   ;;  %v1369_v26 = vld [vmem:[%s1923_s1 + $0x200] ss:$8 sps:$4 sm:$0xff]  }
  0x18   :  { %608 = vmatprep.subr.bf16.mxu1 %v1364_v24  ;;  %v1370_v27 = vld [vmem:[%s1923_s1 + $0x214] ss:$8 sps:$4 sm:$0xff]   ;;  %v1312_v28 = vld [vmem:[%s1923_s1 + $0xb0] ss:$8 sps:$4 sm:$0xff]   ;;  %v1313_v29 = vld [vmem:[%s1923_s1 + $0xc4] ss:$8 sps:$4 sm:$0xff]  }
  0x19   :  { %527 = vmatpush1.bf16.msra.mxu0 %v1285_v6  ;;  %609 = vmatpush1.bf16.msra.mxu1 %v1369_v26  ;;  %v1375_v30 = vld [vmem:[%s1923_s1 + $0x210] ss:$8 sps:$4 sm:$0xff]   ;;  %v1376_v31 = vld [vmem:[%s1923_s1 + $0x224] ss:$8 sps:$4 sm:$0xff]   ;;  %v1315_v32 = vld [vmem:[%s1923_s1 + $0xc0] ss:$8 sps:$4 sm:$0xff]  }
  0x1a   :  { %528 = vmatprep.subr.bf16.mxu0 %v1286_v7  ;;  %610 = vmatprep.subr.bf16.mxu1 %v1370_v27  ;;  %v1381_v33 = vld [vmem:[%s1923_s1 + $0x220] ss:$8 sps:$4 sm:$0xff]   ;;  %v1316_v34 = vld [vmem:[%s1923_s1 + $0xd4] ss:$8 sps:$4 sm:$0xff]   ;;  %v1318_v36 = vld [vmem:[%s1923_s1 + $0xd0] ss:$8 sps:$4 sm:$0xff]  }
  0x1b   :  { %v1382_v35 = vld [vmem:[%s1923_s1 + $0x234] ss:$8 sps:$4 sm:$0xff]   ;;  %v1387_v37 = vld [vmem:[%s1923_s1 + $0x230] ss:$8 sps:$4 sm:$0xff]   ;;  %v1319_v38 = vld [vmem:[%s1923_s1 + $0xe4] ss:$8 sps:$4 sm:$0xff]  }
  0x1c   :  { %v1394_v39 = vld [vmem:[%s1925_s3 + $0x4] ss:$8 sps:$4 sm:$0xff]   ;;  %v1321_v41 = vld [vmem:[%s1923_s1 + $0xe0] ss:$8 sps:$4 sm:$0xff]   ;;  %v1322_v43 = vld [vmem:[%s1923_s1 + $0xf4] ss:$8 sps:$4 sm:$0xff]  }
  0x1d   :  { %529 = vmatpush1.bf16.msra.mxu0 %v1288_v8  ;;  %611 = vmatpush1.bf16.msra.mxu1 %v1375_v30  ;;  %v1391_v40 = vld [vmem:[%s1922_s0 + $0x10] ss:$20 sps:$4 sm:$0xff]   ;;  %v1392_v42 = vld [vmem:[%s1925_s3] ss:$8 sps:$4 sm:$0xff]   ;;  %v1397_v44 = vld [vmem:[%s1925_s3 + $0x14] ss:$8 sps:$4 sm:$0xff]  }
  0x1e   :  { %530 = vmatprep.subr.bf16.mxu0 %v1289_v9  ;;  %612 = vmatprep.subr.bf16.mxu1 %v1376_v31  ;;  %v1324_v45 = vld [vmem:[%s1923_s1 + $0xf0] ss:$8 sps:$4 sm:$0xff]   ;;  %v1330_v47 = vld [vmem:[%s1923_s1 + $0x104] ss:$8 sps:$4 sm:$0xff]   ;;  %v1325_v49 = vld [vmem:[%s1922_s0] ss:$20 sps:$4 sm:$0xff]  }
  0x1f   :  { %v1395_v46 = vld [vmem:[%s1925_s3 + $0x10] ss:$8 sps:$4 sm:$0xff]   ;;  %v1400_v48 = vld [vmem:[%s1925_s3 + $0x24] ss:$8 sps:$4 sm:$0xff]   ;;  %v1328_v50 = vld [vmem:[%s1923_s1 + $0x100] ss:$8 sps:$4 sm:$0xff]  }
  0x20   :  { %v1390_v51 = vld [vmem:[%s1922_s0 + $0xc] ss:$20 sps:$4 sm:$0xff]   ;;  %v1333_v52 = vld [vmem:[%s1923_s1 + $0x114] ss:$8 sps:$4 sm:$0xff]   ;;  %v1331_v55 = vld [vmem:[%s1923_s1 + $0x110] ss:$8 sps:$4 sm:$0xff]  }
  0x21   :  { %531 = vmatpush1.bf16.msra.mxu0 %v1291_v10  ;;  %613 = vmatpush1.bf16.msra.mxu1 %v1381_v33  ;;  %v1398_v53 = vld [vmem:[%s1925_s3 + $0x20] ss:$8 sps:$4 sm:$0xff]   ;;  %v1403_v54 = vld [vmem:[%s1925_s3 + $0x34] ss:$8 sps:$4 sm:$0xff]   ;;  %v1336_v56 = vld [vmem:[%s1923_s1 + $0x124] ss:$8 sps:$4 sm:$0xff]  }
  0x22   :  { %532 = vmatprep.subr.bf16.mxu0 %v1292_v11  ;;  %614 = vmatprep.subr.bf16.mxu1 %v1382_v35  ;;  %v1401_v57 = vld [vmem:[%s1925_s3 + $0x30] ss:$8 sps:$4 sm:$0xff]   ;;  %v1406_v58 = vld [vmem:[%s1925_s3 + $0x44] ss:$8 sps:$4 sm:$0xff]   ;;  %v1334_v59 = vld [vmem:[%s1923_s1 + $0x120] ss:$8 sps:$4 sm:$0xff]  }
  0x23   :  { %v1339_v60 = vld [vmem:[%s1923_s1 + $0x134] ss:$8 sps:$4 sm:$0xff]   ;;  %v1404_v61 = vld [vmem:[%s1925_s3 + $0x40] ss:$8 sps:$4 sm:$0xff]   ;;  %v1337_v63 = vld [vmem:[%s1923_s1 + $0x130] ss:$8 sps:$4 sm:$0xff]  }
  0x24   :  { %v1409_v62 = vld [vmem:[%s1925_s3 + $0x54] ss:$8 sps:$4 sm:$0xff]   ;;  %v1342_v0 = vld [vmem:[%s1923_s1 + $0x144] ss:$8 sps:$4 sm:$0xff]   ;;  %v1407_v1 = vld [vmem:[%s1925_s3 + $0x50] ss:$8 sps:$4 sm:$0xff]  }
  0x25   :  { %533 = vmatpush1.bf16.msra.mxu0 %v1294_v12  ;;  %615 = vmatpush1.bf16.msra.mxu1 %v1387_v37  ;;  %v1412_v2 = vld [vmem:[%s1925_s3 + $0x64] ss:$8 sps:$4 sm:$0xff]   ;;  %v1340_v3 = vld [vmem:[%s1923_s1 + $0x140] ss:$8 sps:$4 sm:$0xff]   ;;  %v1345_v4 = vld [vmem:[%s1923_s1 + $0x154] ss:$8 sps:$4 sm:$0xff]  }
  0x26   :  { %534 = vmatprep.subr.bf16.mxu0 %v1295_v13  ;;  %871 = vmatprep.subr.bf16.mxu1 %v1394_v39  ;;  %v1410_v5 = vld [vmem:[%s1925_s3 + $0x60] ss:$8 sps:$4 sm:$0xff]   ;;  %v1415_v6 = vld [vmem:[%s1925_s3 + $0x74] ss:$8 sps:$4 sm:$0xff]   ;;  %v1343_v7 = vld [vmem:[%s1923_s1 + $0x150] ss:$8 sps:$4 sm:$0xff]  }
  0x27   :  { %v1348_v8 = vld [vmem:[%s1923_s1 + $0x164] ss:$8 sps:$4 sm:$0xff]   ;;  %v1413_v9 = vld [vmem:[%s1925_s3 + $0x70] ss:$8 sps:$4 sm:$0xff]   ;;  %v1346_v11 = vld [vmem:[%s1923_s1 + $0x160] ss:$8 sps:$4 sm:$0xff]  }
  0x28   :  { %1190 = vmatmul.mubr.msk.bf16.vlgmr.msra.gmra.mrb[0].mxu1 %vm518_vm0, %v1391_v40  ;;  %v1418_v10 = vld [vmem:[%s1925_s3 + $0x84] ss:$8 sps:$4 sm:$0xff]   ;;  %v1351_v12 = vld [vmem:[%s1923_s1 + $0x174] ss:$8 sps:$4 sm:$0xff]   ;;  %v1416_v13 = vld [vmem:[%s1925_s3 + $0x80] ss:$8 sps:$4 sm:$0xff]  }
  0x29   :  { %535 = vmatpush1.bf16.msra.mxu0 %v1297_v15  ;;  %872 = vmatpush1.bf16.msra.mxu1 %v1392_v42  ;;  %v1421_v14 = vld [vmem:[%s1925_s3 + $0x94] ss:$8 sps:$4 sm:$0xff]   ;;  %v1349_v15 = vld [vmem:[%s1923_s1 + $0x170] ss:$8 sps:$4 sm:$0xff]   ;;  %v1360_v24 = vld [vmem:[%s1923_s1 + $0x1a4] ss:$8 sps:$4 sm:$0xff]  }
  0x2a   :  { %536 = vmatprep.subr.bf16.mxu0 %v1298_v16  ;;  %873 = vmatprep.subr.bf16.mxu1 %v1397_v44  ;;  %v1354_v16 = vld [vmem:[%s1923_s1 + $0x184] ss:$8 sps:$4 sm:$0xff]   ;;  %v1358_v27 = vld [vmem:[%s1923_s1 + $0x1a0] ss:$8 sps:$4 sm:$0xff]   ;;  %v1361_v30 = vld [vmem:[%s1923_s1 + $0x1b0] ss:$8 sps:$4 sm:$0xff]  }
  0x2b   :  { %v1430_v26 = vld [vmem:[%s1925_s3 + $0xc4] ss:$8 sps:$4 sm:$0xff]   ;;  %v1374_v33 = vld [vmem:[%s1923_s1 + $0x1d4] ss:$8 sps:$4 sm:$0xff]   ;;  %s1223_s24 = sld [smem:[#allocation2 + $0x1]] }
  0x2c   :  { %v1368_v31 = vld [vmem:[%s1923_s1 + $0x1c4] ss:$8 sps:$4 sm:$0xff]   ;;  %v1386_v37 = vld [vmem:[%s1923_s1 + $0x1f4] ss:$8 sps:$4 sm:$0xff]  }
  0x2d   :  { %537 = vmatpush1.bf16.msra.mxu0 %v1300_v17  ;;  %874 = vmatpush1.bf16.msra.mxu1 %v1395_v46  ;;  %v1419_v17 = vld [vmem:[%s1925_s3 + $0x90] ss:$8 sps:$4 sm:$0xff]   ;;  %v1380_v35 = vld [vmem:[%s1923_s1 + $0x1e4] ss:$8 sps:$4 sm:$0xff]   ;;  %v1388_v39 = vld [vmem:[%s1922_s0 + $0x8] ss:$20 sps:$4 sm:$0xff]  }
  0x2e   :  { %538 = vmatprep.subr.bf16.mxu0 %v1301_v18  ;;  %875 = vmatprep.subr.bf16.mxu1 %v1400_v48  ;;  %v1424_v18 = vld [vmem:[%s1925_s3 + $0xa4] ss:$8 sps:$4 sm:$0xff]   ;;  %v1433_v40 = vld [vmem:[%s1925_s3 + $0xd4] ss:$8 sps:$4 sm:$0xff]  }
  0x2f   :  { %v1436_v42 = vld [vmem:[%s1925_s3 + $0xe4] ss:$8 sps:$4 sm:$0xff]   ;;  %v1439_v44 = vld [vmem:[%s1925_s3 + $0xf4] ss:$8 sps:$4 sm:$0xff]  }
  0x30   :  { %v1440_v46 = vld [vmem:[%s1927_s5 + $0x40] sm:$0xff]  }
  0x31   :  { %539 = vmatpush1.bf16.msra.mxu0 %v1303_v19  ;;  %876 = vmatpush1.bf16.msra.mxu1 %v1398_v53  ;;  %v1352_v19 = vld [vmem:[%s1923_s1 + $0x180] ss:$8 sps:$4 sm:$0xff]  }
  0x32   :  { %540 = vmatprep.subr.bf16.mxu0 %v1304_v20  ;;  %877 = vmatprep.subr.bf16.mxu1 %v1403_v54  ;;  %v1357_v20 = vld [vmem:[%s1923_s1 + $0x194] ss:$8 sps:$4 sm:$0xff]   ;;  %v121_v54 = vld [vmem:[%s1924_s2] sm:$0x3] }
  0x35   :  { %541 = vmatpush1.bf16.msra.mxu0 %v1306_v21  ;;  %878 = vmatpush1.bf16.msra.mxu1 %v1401_v57  ;;  %v1422_v21 = vld [vmem:[%s1925_s3 + $0xa0] ss:$8 sps:$4 sm:$0xff]  }
  0x36   :  { %542 = vmatprep.subr.bf16.mxu0 %v1307_v22  ;;  %879 = vmatprep.subr.bf16.mxu1 %v1406_v58  ;;  %v1427_v22 = vld [vmem:[%s1925_s3 + $0xb4] ss:$8 sps:$4 sm:$0xff]  }
  0x39   :  { %543 = vmatpush1.bf16.msra.mxu0 %v1309_v23  ;;  %880 = vmatpush1.bf16.msra.mxu1 %v1404_v61  ;;  %v1355_v23 = vld [vmem:[%s1923_s1 + $0x190] ss:$8 sps:$4 sm:$0xff]  }
  0x3a   :  { %544 = vmatprep.subr.bf16.mxu0 %v1310_v25  ;;  %881 = vmatprep.subr.bf16.mxu1 %v1409_v62  ;;  %v1425_v25 = vld [vmem:[%s1925_s3 + $0xb0] ss:$8 sps:$4 sm:$0xff]  }
  0x3d   :  { %545 = vmatpush1.bf16.msra.mxu0 %v1312_v28  ;;  %882 = vmatpush1.bf16.msra.mxu1 %v1407_v1  ;;  %v1363_v28 = vld [vmem:[%s1923_s1 + $0x1b4] ss:$8 sps:$4 sm:$0xff]  }
  0x3e   :  { %546 = vmatprep.subr.bf16.mxu0 %v1313_v29  ;;  %883 = vmatprep.subr.bf16.mxu1 %v1412_v2  ;;  %v1428_v29 = vld [vmem:[%s1925_s3 + $0xc0] ss:$8 sps:$4 sm:$0xff]  }
  0x41   :  { %547 = vmatpush1.bf16.msra.mxu0 %v1315_v32  ;;  %884 = vmatpush1.bf16.msra.mxu1 %v1410_v5  ;;  %v1366_v32 = vld [vmem:[%s1923_s1 + $0x1c0] ss:$8 sps:$4 sm:$0xff]  }
  0x42   :  { %548 = vmatprep.subr.bf16.mxu0 %v1316_v34  ;;  %885 = vmatprep.subr.bf16.mxu1 %v1415_v6  ;;  %v1372_v34 = vld [vmem:[%s1923_s1 + $0x1d0] ss:$8 sps:$4 sm:$0xff]  }
  0x45   :  { %549 = vmatpush1.bf16.msra.mxu0 %v1318_v36  ;;  %886 = vmatpush1.bf16.msra.mxu1 %v1413_v9  ;;  %v1378_v36 = vld [vmem:[%s1923_s1 + $0x1e0] ss:$8 sps:$4 sm:$0xff]  }
  0x46   :  { %550 = vmatprep.subr.bf16.mxu0 %v1319_v38  ;;  %887 = vmatprep.subr.bf16.mxu1 %v1418_v10  ;;  %v1384_v38 = vld [vmem:[%s1923_s1 + $0x1f0] ss:$8 sps:$4 sm:$0xff]  }
  0x49   :  { %551 = vmatpush1.bf16.msra.mxu0 %v1321_v41  ;;  %888 = vmatpush1.bf16.msra.mxu1 %v1416_v13  ;;  %v1431_v41 = vld [vmem:[%s1925_s3 + $0xd0] ss:$8 sps:$4 sm:$0xff]  }
  0x4a   :  { %552 = vmatprep.subr.bf16.mxu0 %v1322_v43  ;;  %889 = vmatprep.subr.bf16.mxu1 %v1421_v14  ;;  %v1434_v43 = vld [vmem:[%s1925_s3 + $0xe0] ss:$8 sps:$4 sm:$0xff]  }
  0x4d   :  { %553 = vmatpush1.bf16.msra.mxu0 %v1324_v45  ;;  %890 = vmatpush1.bf16.msra.mxu1 %v1419_v17  ;;  %v1437_v45 = vld [vmem:[%s1925_s3 + $0xf0] ss:$8 sps:$4 sm:$0xff]   ;;  %s655_s3 = sld [smem:[#allocation2]]  ;;  %v1441_v17 = vld [vmem:[%s1927_s5] sm:$0xff]  }
  0x4e   :  { %565 = vmatprep.subr.bf16.mxu0 %v1330_v47  ;;  %891 = vmatprep.subr.bf16.mxu1 %v1424_v18  ;;  %v1442_v18 = vld [vmem:[%s1927_s5 + $0x48] sm:$0xff]  }
  0x50   :  { %555 = vmatmul.mubr.bf16.vlgmr.msra.gmra.mrb[0].mxu0 %v1325_v49 }
  0x51   :  { %566 = vmatpush1.bf16.msra.mxu0 %v1328_v50  ;;  %597 = vmatprep.mubr.bf16.mxu0 %v1390_v51  ;;  %v123_v51 = vlaneseq }
  0x52   :  { %567 = vmatprep.subr.bf16.mxu0 %v1333_v52  ;;  %892 = vmatpush1.bf16.msra.mxu1 %v1422_v21  ;;  %v1445_v21 = vld [vmem:[%s1927_s5 + $0x10] sm:$0xff]  }
  0x53   :  { %893 = vmatprep.subr.bf16.mxu1 %v1427_v22  ;;  %v1850_v52 = vshrl.u32 %v123_v51, 7  ;;  %v656_v61 = vstv %s655_s3  ;;  %v1446_v22 = vld [vmem:[%s1927_s5 + $0x58] sm:$0xff]  }
  0x55   :  { %568 = vmatpush1.bf16.msra.mxu0 %v1331_v55  ;;  %v125_v53 = vsub.s32 0, %v1850_v52  ;;  %v129_v55 = vsub.s32 1, %v1850_v52 }
  0x56   :  { %569 = vmatprep.subr.bf16.mxu0 %v1336_v56  ;;  %894 = vmatpush1.bf16.msra.mxu1 %v1425_v25  ;;  %v1449_v25 = vld [vmem:[%s1927_s5 + $0x20] sm:$0xff]  }
  0x57   :  { %895 = vmatprep.subr.bf16.mxu1 %v1430_v26  ;;  %v126_v56 = vrot.slane %v121_v54, %v125_v53  ;;  %v130_v57 = vrot.slane %v121_v54, %v129_v55  ;;  %v1450_v26 = vld [vmem:[%s1927_s5 + $0x68] sm:$0xff]  }
  0x59   :  { %570 = vmatpush1.bf16.msra.mxu0 %v1334_v59 }
  0x5a   :  { %571 = vmatprep.subr.bf16.mxu0 %v1339_v60  ;;  %896 = vmatpush1.bf16.msra.mxu1 %v1428_v29  ;;  %v1453_v29 = vld [vmem:[%s1927_s5 + $0x30] sm:$0xff]  }
  0x5b   :  { %897 = vmatprep.subr.bf16.mxu1 %v1433_v40 }
  0x5d   :  { %572 = vmatpush1.bf16.msra.mxu0 %v1337_v63 }
  0x5e   :  { %573 = vmatprep.subr.bf16.mxu0 %v1342_v0  ;;  %898 = vmatpush1.bf16.msra.mxu1 %v1431_v41 }
  0x5f   :  { %899 = vmatprep.subr.bf16.mxu1 %v1436_v42 }
  0x61   :  { %574 = vmatpush1.bf16.msra.mxu0 %v1340_v3 }
  0x62   :  { %575 = vmatprep.subr.bf16.mxu0 %v1345_v4  ;;  %900 = vmatpush1.bf16.msra.mxu1 %v1434_v43 }
  0x63   :  { %901 = vmatprep.subr.bf16.mxu1 %v1439_v44 }
  0x65   :  { %576 = vmatpush1.bf16.msra.mxu0 %v1343_v7 }
  0x66   :  { %577 = vmatprep.subr.bf16.mxu0 %v1348_v8  ;;  %902 = vmatpush1.bf16.msra.mxu1 %v1437_v45 }
  0x67   :  { %1241 = vmatprep.subr.bf16.mxu1 %v1440_v46 }
  0x69   :  { %578 = vmatpush1.bf16.msra.mxu0 %v1346_v11 }
  0x6a   :  { %579 = vmatprep.subr.bf16.mxu0 %v1351_v12 }
  0x6d   :  { %580 = vmatpush1.bf16.msra.mxu0 %v1349_v15 }
  0x6e   :  { %581 = vmatprep.subr.bf16.mxu0 %v1354_v16 }
  0x71   :  { %582 = vmatpush1.bf16.msra.mxu0 %v1352_v19  ;;  %v1443_v19 = vld [vmem:[%s1927_s5 + $0x8] sm:$0xff]  }
  0x72   :  { %583 = vmatprep.subr.bf16.mxu0 %v1357_v20  ;;  %v1444_v20 = vld [vmem:[%s1927_s5 + $0x50] sm:$0xff]  }
  0x75   :  { %584 = vmatpush1.bf16.msra.mxu0 %v1355_v23  ;;  %v1447_v23 = vld [vmem:[%s1927_s5 + $0x18] sm:$0xff]  }
  0x76   :  { %585 = vmatprep.subr.bf16.mxu0 %v1360_v24  ;;  %v1448_v24 = vld [vmem:[%s1927_s5 + $0x60] sm:$0xff]  }
  0x79   :  { %586 = vmatpush1.bf16.msra.mxu0 %v1358_v27  ;;  %v1451_v27 = vld [vmem:[%s1927_s5 + $0x28] sm:$0xff]  }
  0x7a   :  { %587 = vmatprep.subr.bf16.mxu0 %v1363_v28  ;;  %v1452_v28 = vld [vmem:[%s1927_s5 + $0x70] sm:$0xff]  }
  0x7d   :  { %588 = vmatpush1.bf16.msra.mxu0 %v1361_v30  ;;  %v1454_v30 = vld [vmem:[%s1927_s5 + $0x78] sm:$0xff]  }
  0x7e   :  { %589 = vmatprep.subr.bf16.mxu0 %v1368_v31  ;;  %v1455_v31 = vld [vmem:[%s1927_s5 + $0x38] sm:$0xff]  }
  0x81   :  { %590 = vmatpush1.bf16.msra.mxu0 %v1366_v32  ;;  %v699_v32 = vld [vmem:[%s1926_s4] sm:$0x3] }
  0x82   :  { %591 = vmatprep.subr.bf16.mxu0 %v1374_v33  ;;  %v704_v33 = vrot.slane %v699_v32, %v125_v53 }
  0x85   :  { %592 = vmatpush1.bf16.msra.mxu0 %v1372_v34  ;;  %v708_v34 = vrot.slane %v699_v32, %v129_v55  ;;  %v1224_v55 = vld [vmem:[%s1928_s6] ss:$0 sm:$0xff] }
  0x86   :  { %593 = vmatprep.subr.bf16.mxu0 %v1380_v35 }
  0x89   :  { %594 = vmatpush1.bf16.msra.mxu0 %v1378_v36  ;;  %v919_v36 = vstv %s1223_s24 }
  0x8a   :  { %595 = vmatprep.subr.bf16.mxu0 %v1386_v37 }
  0x8d   :  { %596 = vmatpush1.bf16.msra.mxu0 %v1384_v38 }
  0x90   :  { %598 = vmatmul.mubr.bf16.vlgmr.msra.gmra.mrb[0].mxu0 %v1388_v39 }
  0xfb   :  { %v642_v47 = vpop.f32.mrb[0].mxu1 }
  0xfc   :  { %v644_v48 = vpop.f32.mrb[1].mxu1 }
  0xfd   :  { %v646_v49 = vpop.f32.mrb[2].mxu1 }
  0xfe   :  { %v648_v50 = vpop.f32.mrb[3].mxu1 }
 0x163   :  { %v599_v58 = vpop.f32.mrb[0].mxu0 }
 0x164   :  { %v1263_v59 = vadd.f32 %v599_v58, %v126_v56  ;;  %v601_v60 = vpop.f32.mrb[1].mxu0 }
 0x165   :  { %v1265_v62 = vadd.f32 %v601_v60, %v130_v57  ;;  %v603_v63 = vpop.f32.mrb[2].mxu0 }
 0x166   :  { %v1264_v0 = vadd.f32 %v1263_v59, %v642_v47  ;;  %v1267_v1 = vadd.f32 %v603_v63, %v126_v56  ;;  %v605_v2 = vpop.f32.mrb[3].mxu0 }
 0x167   :  { %v1266_v3 = vadd.f32 %v1265_v62, %v644_v48  ;;  %v1269_v4 = vadd.f32 %v605_v2, %v130_v57 }
 0x168   :  { %v657_v5 = vmul.f32 %v1264_v0, %v656_v61  ;;  %v1268_v6 = vadd.f32 %v1267_v1, %v646_v49  ;;  %vm651_vm1 = vcmp.ge.f32.partialorder %v1264_v0, 0.0 }
 0x169   :  { %v658_v7 = vmul.f32 %v1266_v3, %v656_v61  ;;  %v1270_v8 = vadd.f32 %v1269_v4, %v648_v50  ;;  %vm652_vm2 = vcmp.ge.f32.partialorder %v1266_v3, 0.0 }
 0x16a   :  { %vm653_vm3 = vcmp.ge.f32.partialorder %v1268_v6, 0.0  ;;  %v659_v9 = vmul.f32 %v1268_v6, %v656_v61  ;;  %v661_v11 = vsel %vm651_vm1, %v1264_v0, %v657_v5 }
 0x16b   :  { %vm654_vm4 = vcmp.ge.f32.partialorder %v1270_v8, 0.0  ;;  %v660_v10 = vmul.f32 %v1270_v8, %v656_v61  ;;  %v662_v13 = vsel %vm652_vm2, %v1266_v3, %v658_v7 }
 0x16c   :  { %v663_v12 = vsel %vm653_vm3, %v1268_v6, %v659_v9 }
 0x16d   :  { %v664_v14 = vsel %vm654_vm4, %v1270_v8, %v660_v10  ;;  %v665_v15 = vpack.c.bf16 %v663_v12, %v661_v11 }
 0x16e   :  { %v666_v16 = vpack.c.bf16 %v664_v14, %v662_v13 }
 0x170   :  { %903 = vmatprep.mubr.bf16.mxu1 %v666_v16 }
 0x171   :  { %904 = vmatmul.mubr.bf16.vlgmr.msra.gmra.mrb[4].mxu1 %v665_v15 }
 0x172   :  { %1242 = vmatpush3.bf16.msra.mxu1 %v1441_v17 }
 0x173   :  { %1243 = vmatprep.subr.bf16.mxu1 %v1442_v18 }
 0x176   :  { %1244 = vmatpush3.bf16.msra.mxu1 %v1443_v19 }
 0x177   :  { %1245 = vmatprep.subr.bf16.mxu1 %v1444_v20 }
 0x17a   :  { %1246 = vmatpush3.bf16.msra.mxu1 %v1445_v21 }
 0x17b   :  { %1247 = vmatprep.subr.bf16.mxu1 %v1446_v22 }
 0x17e   :  { %1248 = vmatpush3.bf16.msra.mxu1 %v1447_v23 }
 0x17f   :  { %1249 = vmatprep.subr.bf16.mxu1 %v1448_v24 }
 0x182   :  { %1250 = vmatpush3.bf16.msra.mxu1 %v1449_v25 }
 0x183   :  { %1251 = vmatprep.subr.bf16.mxu1 %v1450_v26 }
 0x186   :  { %1252 = vmatpush3.bf16.msra.mxu1 %v1451_v27 }
 0x187   :  { %1253 = vmatprep.subr.bf16.mxu1 %v1452_v28 }
 0x18a   :  { %1254 = vmatpush3.bf16.msra.mxu1 %v1453_v29 }
 0x18b   :  { %1255 = vmatprep.subr.bf16.mxu1 %v1454_v30 }
 0x18e   :  { %1256 = vmatpush3.bf16.msra.mxu1 %v1455_v31 }
 0x244   :  { %v905_v35 = vpop.f32.mrb[4].mxu1 }
 0x245   :  { %v906_v37 = vadd.f32 %v905_v35, %v704_v33  ;;  %v907_v38 = vpop.f32.mrb[5].mxu1 }
 0x246   :  { %v908_v39 = vadd.f32 %v907_v38, %v708_v34  ;;  %v909_v40 = vpop.f32.mrb[6].mxu1 }
 0x247   :  { %v920_v41 = vmul.f32 %v919_v36, %v906_v37  ;;  %v910_v42 = vadd.f32 %v909_v40, %v704_v33  ;;  %v911_v43 = vpop.f32.mrb[7].mxu1  ;;  %vm914_vm5 = vcmp.ge.f32.partialorder %v906_v37, 0.0 }
 0x248   :  { %v921_v44 = vmul.f32 %v919_v36, %v908_v39  ;;  %v912_v45 = vadd.f32 %v911_v43, %v708_v34  ;;  %vm915_vm6 = vcmp.ge.f32.partialorder %v908_v39, 0.0 }
 0x249   :  { %vm916_vm7 = vcmp.ge.f32.partialorder %v910_v42, 0.0  ;;  %v922_v46 = vmul.f32 %v919_v36, %v910_v42  ;;  %v924_v48 = vsel %vm914_vm5, %v906_v37, %v920_v41 }
 0x24a   :  { %vm917_vm8 = vcmp.ge.f32.partialorder %v912_v45, 0.0  ;;  %v923_v47 = vmul.f32 %v919_v36, %v912_v45  ;;  %v925_v51 = vsel %vm915_vm6, %v908_v39, %v921_v44 }
 0x24b   :  { %v926_v49 = vsel %vm916_vm7, %v910_v42, %v922_v46 }
 0x24c   :  { %v928_v50 = vpack.c.bf16 %v926_v49, %v924_v48  ;;  %v927_v52 = vsel %vm917_vm8, %v912_v45, %v923_v47 }
 0x24d   :  { %v929_v53 = vpack.c.bf16 %v927_v52, %v925_v51 }
 0x24f   :  { %1097 = vmatprep.mubr.bf16.mxu1 %v929_v53 }
 0x250   :  { %1098 = vmatmul.mubr.bf16.vlgmr.msra.gmra.mrb[8].mxu1 %v928_v50 }
 0x323   :  { %v1257_v54 = vpop.f32.mrb[8].mxu1 }
 0x324   :  { %v1258_v56 = vpop.f32.mrb[9].mxu1 }
 0x325   :  { %v1259_v57 = vadd.f32 %v1258_v56, %v1257_v54  ;;  %v1260_v58 = vpop.f32.mrb[10].mxu1 }
 0x326   :  { %v1261_v59 = vpop.f32.mrb[11].mxu1 }
 0x327   :  { %v1100_v60 = vadd.f32 %v1259_v57, %v1224_v55  ;;  %v1262_v61 = vadd.f32 %v1261_v59, %v1260_v58 }
 0x329   :  { %1106 = vst [vmem:[%s1930_s8] sm:$0xff] %v1100_v60  ;;  %v1103_v62 = vadd.f32 %v1262_v61, %v1224_v55 }
 0x32b   :  { %1107 = vst [vmem:[%s1930_s8 + $0x8] sm:$0xff] %v1103_v62 }
 0x32c   :  { %1112 = vsyncpa [#allocation3], 1 }

// kernel: embedding_net_forward.4
= control target key start
LH: loop header
LB: loop body
LE: loop exit
PB: predicated region body
PF: predicated region fallthrough
CT: control target
= control target key end

     0   :  { %s4134_s17 = smov 0   ;;  %s4136_s18 = smov 0   ;;  %s4794_s0 = inlined_call_operand.vmem [shape: bf16[128,2688], index: 0, kind: input, shape index: {}]   ;;  %s4795_s1 = inlined_call_operand.vmem [shape: bf16[2688,128], index: 1, kind: input, shape index: {}]   ;;  %s4796_s2 = inlined_call_operand.vmem [shape: f32[1,128], index: 2, kind: input, shape index: {}]   ;;  %s4797_s3 = inlined_call_operand.<no memory space> [shape: f32[1], index: 3, kind: input, shape index: {}]   ;;  %s4798_s4 = inlined_call_operand.vmem [shape: bf16[32,128], index: 4, kind: output, shape index: {}]  }
   0x1   :  { %9 = sst [smem:[#allocation2]] %s4797_s3  ;;  %s4138_s19 = smov 0  }
   0x2 LB: > { %s34_s3 = sadd.s32 1, %s4100_s18  ;;  %p3044_p0 = scmp.ge.s32.totalorder %s4104_s19, 1  ;;  %s4104_s19 = sphi %s4138_s19, %s15_s19   ;;  %s4100_s18 = sphi %s4136_s18, %s4800_s18   ;;  %s4096_s17 = sphi %s4134_s17, %s4799_s17  }
   0x3   : > { %p36_p1 = scmp.ge.s32.totalorder %s34_s3, 2  ;;  %p217_p2 = scmp.lt.s32.totalorder %s4104_s19, 3 }
   0x5   : > { %s4802_s3 = smov (%p36_p1, %s34_s3), 0  ;;  %p218_p3 = pnand %p3044_p0, %p217_p2 }
   0x6   : > { %v3790_v0 = vld [vmem:[%s4795_s1 + $0x40] sm:$0xff] (!%p218_p3)   ;;  %v3794_v4 = vld [vmem:[%s4795_s1 + $0x48] sm:$0xff] (!%p218_p3)   ;;  %v3798_v8 = vld [vmem:[%s4795_s1 + $0x50] sm:$0xff] (!%p218_p3)   ;;  %s3045_s27 = sshll.u32 (!%p218_p3), %s4096_s17, 3  ;;  %s3047_s5 = sshll.u32 (!%p218_p3), %s4096_s17, 1 }
   0x7   : > { %221 = sbr.rel (%p218_p3) target bundleno = 435 (0x1b3), region = 36  ;;  %v3791_v1 = vld [vmem:[%s4795_s1 + $0xc0] sm:$0xff] (!%p218_p3)   ;;  %3313 = vmatprep.subr.bf16.mxu0 (!%p218_p3), %v3790_v0  ;;  %v3795_v5 = vld [vmem:[%s4795_s1 + $0xc8] sm:$0xff] (!%p218_p3)   ;;  %v3799_v9 = vld [vmem:[%s4795_s1 + $0xd0] sm:$0xff] (!%p218_p3)   ;;  %p264_p4 = scmp.lt.s32.totalorder (!%p218_p3), %s3045_s27, 15 }
   0x8   : > { %v3792_v2 = vld [vmem:[%s4795_s1] sm:$0xff] (!%p218_p3)   ;;  %3353 = vmatprep.subr.bf16.mxu1 (!%p218_p3), %v3791_v1  ;;  %v3796_v6 = vld [vmem:[%s4795_s1 + $0x8] sm:$0xff] (!%p218_p3)   ;;  %v3800_v10 = vld [vmem:[%s4795_s1 + $0x10] sm:$0xff] (!%p218_p3)   ;;  %p287_p5 = scmp.lt.s32.totalorder (!%p218_p3), %s3047_s5, 3 }
   0x9   : > { %v3793_v3 = vld [vmem:[%s4795_s1 + $0x80] sm:$0xff] (!%p218_p3)   ;;  %3314 = vmatpush3.bf16.msra.mxu0 (!%p218_p3), %v3792_v2  ;;  %v3797_v7 = vld [vmem:[%s4795_s1 + $0x88] sm:$0xff] (!%p218_p3)   ;;  %v3801_v11 = vld [vmem:[%s4795_s1 + $0x90] sm:$0xff] (!%p218_p3)  }
   0xa   : > { %3354 = vmatpush3.bf16.msra.mxu1 (!%p218_p3), %v3793_v3  ;;  %3315 = vmatprep.subr.bf16.mxu0 (!%p218_p3), %v3794_v4  ;;  %v3802_v12 = vld [vmem:[%s4795_s1 + $0x58] sm:$0xff] (!%p218_p3)   ;;  %v3806_v16 = vld [vmem:[%s4795_s1 + $0x60] sm:$0xff] (!%p218_p3)   ;;  %v3810_v20 = vld [vmem:[%s4795_s1 + $0x68] sm:$0xff] (!%p218_p3)  }
   0xb   : > { %3355 = vmatprep.subr.bf16.mxu1 (!%p218_p3), %v3795_v5  ;;  %v3803_v13 = vld [vmem:[%s4795_s1 + $0xd8] sm:$0xff] (!%p218_p3)   ;;  %v3807_v17 = vld [vmem:[%s4795_s1 + $0xe0] sm:$0xff] (!%p218_p3)   ;;  %v3811_v21 = vld [vmem:[%s4795_s1 + $0xe8] sm:$0xff] (!%p218_p3)  }
   0xc   : > { %v3804_v14 = vld [vmem:[%s4795_s1 + $0x18] sm:$0xff] (!%p218_p3)   ;;  %v3808_v18 = vld [vmem:[%s4795_s1 + $0x20] sm:$0xff] (!%p218_p3)   ;;  %v3812_v22 = vld [vmem:[%s4795_s1 + $0x28] sm:$0xff] (!%p218_p3)  }
   0xd   : > { %3316 = vmatpush3.bf16.msra.mxu0 (!%p218_p3), %v3796_v6  ;;  %v3805_v15 = vld [vmem:[%s4795_s1 + $0x98] sm:$0xff] (!%p218_p3)   ;;  %v3809_v19 = vld [vmem:[%s4795_s1 + $0xa0] sm:$0xff] (!%p218_p3)   ;;  %v3813_v23 = vld [vmem:[%s4795_s1 + $0xa8] sm:$0xff] (!%p218_p3)  }
   0xe   : > { %3356 = vmatpush3.bf16.msra.mxu1 %v3797_v7  ;;  %3317 = vmatprep.subr.bf16.mxu0 %v3798_v8  ;;  %s4804_s27 = smov (!%p264_p4, %s3045_s27), 15  ;;  %v3814_v24 = vld [vmem:[%s4795_s1 + $0x70] sm:$0xff]   ;;  %v3818_v28 = vld [vmem:[%s4795_s1 + $0x78] sm:$0xff]   ;;  %v3828_v36 = vld [vmem:[%s4795_s1 + $0x140] sm:$0xff]   ;;  %s4806_s5 = smov (!%p287_p5, %s3047_s5), 3 }
   0xf   : > { %3357 = vmatprep.subr.bf16.mxu1 %v3799_v9  ;;  %v3815_v25 = vld [vmem:[%s4795_s1 + $0xf0] sm:$0xff]   ;;  %s3765_s28 = smul.u32 84, %s4804_s27  ;;  %v3819_v29 = vld [vmem:[%s4795_s1 + $0xf8] sm:$0xff]   ;;  %v3829_v37 = vld [vmem:[%s4795_s1 + $0x1c0] sm:$0xff]   ;;  %s3048_s17 = sshll.u32 %s4806_s5, 2 }
  0x10   : > { %v3816_v26 = vld [vmem:[%s4795_s1 + $0x30] sm:$0xff]   ;;  %v3820_v30 = vld [vmem:[%s4795_s1 + $0x38] sm:$0xff]   ;;  %v3830_v38 = vld [vmem:[%s4795_s1 + $0x100] sm:$0xff]   ;;  %s293_s8 = scalar_lea.vmem %s4798_s4, %s3048_s17 }
  0x11   : > { %3318 = vmatpush3.bf16.msra.mxu0 %v3800_v10  ;;  %v3817_v27 = vld [vmem:[%s4795_s1 + $0xb0] sm:$0xff]   ;;  %s4248_s12 = scalar_lea.vmem %s4794_s0, %s3765_s28  ;;  %v3821_v31 = vld [vmem:[%s4795_s1 + $0xb8] sm:$0xff]   ;;  %v3831_v39 = vld [vmem:[%s4795_s1 + $0x180] sm:$0xff]  }
  0x12   : > { %3358 = vmatpush3.bf16.msra.mxu1 %v3801_v11  ;;  %3319 = vmatprep.subr.bf16.mxu0 %v3802_v12  ;;  %v3822_v32 = vld [vmem:[%s4248_s12] ss:$84 sps:$4 sm:$0xff]   ;;  %v3824_v33 = vld [vmem:[%s4248_s12 + $0x4] ss:$84 sps:$4 sm:$0xff]   ;;  %v3825_v34 = vld [vmem:[%s4248_s12 + $0x8] ss:$84 sps:$4 sm:$0xff]  }
  0x13   : > { %3359 = vmatprep.subr.bf16.mxu1 %v3803_v13  ;;  %v3827_v35 = vld [vmem:[%s4248_s12 + $0xc] ss:$84 sps:$4 sm:$0xff]   ;;  %2184 = vmatprep.mubr.bf16.mxu0 %v3824_v33  ;;  %v3838_v45 = vld [vmem:[%s4248_s12 + $0xb4] ss:$84 sps:$4 sm:$0xff]   ;;  %v3841_v47 = vld [vmem:[%s4248_s12 + $0xb0] ss:$84 sps:$4 sm:$0xff]  }
  0x14   : > { %2249 = vmatprep.mubr.bf16.mxu1 %v3827_v35  ;;  %v3832_v40 = vld [vmem:[%s4795_s1 + $0x148] sm:$0xff]   ;;  %v3842_v48 = vld [vmem:[%s4795_s1 + $0x150] sm:$0xff]   ;;  %v3846_v52 = vld [vmem:[%s4795_s1 + $0x158] sm:$0xff]  }
  0x15   : > { %3320 = vmatpush3.bf16.msra.mxu0 %v3804_v14  ;;  %v3833_v41 = vld [vmem:[%s4795_s1 + $0x1c8] sm:$0xff]   ;;  %v3843_v49 = vld [vmem:[%s4795_s1 + $0x1d0] sm:$0xff]   ;;  %v3847_v53 = vld [vmem:[%s4795_s1 + $0x1d8] sm:$0xff]  }
  0x16   : > { %3360 = vmatpush3.bf16.msra.mxu1 %v3805_v15  ;;  %3321 = vmatprep.subr.bf16.mxu0 %v3806_v16  ;;  %v3834_v42 = vld [vmem:[%s4795_s1 + $0x108] sm:$0xff]   ;;  %v3844_v50 = vld [vmem:[%s4795_s1 + $0x110] sm:$0xff]   ;;  %v3848_v54 = vld [vmem:[%s4795_s1 + $0x118] sm:$0xff]  }
  0x17   : > { %3361 = vmatprep.subr.bf16.mxu1 %v3807_v17  ;;  %v3835_v43 = vld [vmem:[%s4795_s1 + $0x188] sm:$0xff]   ;;  %v3845_v51 = vld [vmem:[%s4795_s1 + $0x190] sm:$0xff]   ;;  %v3849_v55 = vld [vmem:[%s4795_s1 + $0x198] sm:$0xff]  }
  0x18   : > { %v3836_v44 = vld [vmem:[%s4248_s12 + $0xac] ss:$84 sps:$4 sm:$0xff]   ;;  %v3840_v46 = vld [vmem:[%s4248_s12 + $0xa8] ss:$84 sps:$4 sm:$0xff]   ;;  %v3854_v58 = vld [vmem:[%s4248_s12 + $0x150] ss:$84 sps:$4 sm:$0xff]  }
  0x19   : > { %3322 = vmatpush3.bf16.msra.mxu0 %v3808_v18  ;;  %v3850_v56 = vld [vmem:[%s4248_s12 + $0x154] ss:$84 sps:$4 sm:$0xff]   ;;  %v3852_v57 = vld [vmem:[%s4248_s12 + $0x15c] ss:$84 sps:$4 sm:$0xff]   ;;  %v3855_v59 = vld [vmem:[%s4248_s12 + $0x158] ss:$84 sps:$4 sm:$0xff]  }
  0x1a   : > { %3362 = vmatpush3.bf16.msra.mxu1 %v3809_v19  ;;  %3323 = vmatprep.subr.bf16.mxu0 %v3810_v20  ;;  %v3856_v60 = vld [vmem:[%s4795_s1 + $0x160] sm:$0xff]   ;;  %v3860_v0 = vld [vmem:[%s4795_s1 + $0x168] sm:$0xff]   ;;  %v3864_v4 = vld [vmem:[%s4248_s12 + $0x1fc] ss:$84 sps:$4 sm:$0xff]  }
  0x1b   : > { %3363 = vmatprep.subr.bf16.mxu1 %v3811_v21  ;;  %v3857_v61 = vld [vmem:[%s4795_s1 + $0x1e0] sm:$0xff]   ;;  %v3861_v1 = vld [vmem:[%s4795_s1 + $0x1e8] sm:$0xff]   ;;  %v3870_v8 = vld [vmem:[%s4795_s1 + $0x170] sm:$0xff]  }
  0x1c   : > { %v3858_v62 = vld [vmem:[%s4795_s1 + $0x120] sm:$0xff]   ;;  %v3862_v2 = vld [vmem:[%s4795_s1 + $0x128] sm:$0xff]   ;;  %v3871_v9 = vld [vmem:[%s4795_s1 + $0x1f0] sm:$0xff]  }
  0x1d   : > { %3324 = vmatpush3.bf16.msra.mxu0 %v3812_v22  ;;  %v3859_v63 = vld [vmem:[%s4795_s1 + $0x1a0] sm:$0xff]   ;;  %v3863_v3 = vld [vmem:[%s4795_s1 + $0x1a8] sm:$0xff]   ;;  %v3872_v10 = vld [vmem:[%s4795_s1 + $0x130] sm:$0xff]  }
  0x1e   : > { %3364 = vmatpush3.bf16.msra.mxu1 %v3813_v23  ;;  %3325 = vmatprep.subr.bf16.mxu0 %v3814_v24  ;;  %v3866_v5 = vld [vmem:[%s4248_s12 + $0x204] ss:$84 sps:$4 sm:$0xff]   ;;  %v3869_v7 = vld [vmem:[%s4248_s12 + $0x200] ss:$84 sps:$4 sm:$0xff]   ;;  %v3883_v19 = vld [vmem:[%s4248_s12 + $0x1c] ss:$84 sps:$4 sm:$0xff]  }
  0x1f   : > { %3365 = vmatprep.subr.bf16.mxu1 %v3815_v25  ;;  %v3868_v6 = vld [vmem:[%s4248_s12 + $0x1f8] ss:$84 sps:$4 sm:$0xff]   ;;  %v3873_v11 = vld [vmem:[%s4795_s1 + $0x1b0] sm:$0xff]   ;;  %v3884_v20 = vld [vmem:[%s4795_s1 + $0x240] sm:$0xff]  }
  0x20   : > { %v3874_v12 = vld [vmem:[%s4795_s1 + $0x178] sm:$0xff]   ;;  %v3878_v16 = vld [vmem:[%s4248_s12 + $0x10] ss:$84 sps:$4 sm:$0xff]   ;;  %v3880_v17 = vld [vmem:[%s4248_s12 + $0x14] ss:$84 sps:$4 sm:$0xff]  }
  0x21   : > { %3326 = vmatpush3.bf16.msra.mxu0 %v3816_v26  ;;  %v3875_v13 = vld [vmem:[%s4795_s1 + $0x1f8] sm:$0xff]   ;;  %v3885_v21 = vld [vmem:[%s4795_s1 + $0x2c0] sm:$0xff]   ;;  %v3888_v24 = vld [vmem:[%s4795_s1 + $0x248] sm:$0xff]  }
  0x22   : > { %3366 = vmatpush3.bf16.msra.mxu1 %v3817_v27  ;;  %3327 = vmatprep.subr.bf16.mxu0 %v3818_v28  ;;  %v3876_v14 = vld [vmem:[%s4795_s1 + $0x138] sm:$0xff]   ;;  %v3886_v22 = vld [vmem:[%s4795_s1 + $0x200] sm:$0xff]   ;;  %v3889_v25 = vld [vmem:[%s4795_s1 + $0x2c8] sm:$0xff]  }
  0x23   : > { %3367 = vmatprep.subr.bf16.mxu1 %v3819_v29  ;;  %v3877_v15 = vld [vmem:[%s4795_s1 + $0x1b8] sm:$0xff]   ;;  %v3887_v23 = vld [vmem:[%s4795_s1 + $0x280] sm:$0xff]   ;;  %v3890_v26 = vld [vmem:[%s4795_s1 + $0x208] sm:$0xff]  }
  0x24   : > { %v3881_v18 = vld [vmem:[%s4248_s12 + $0x18] ss:$84 sps:$4 sm:$0xff]   ;;  %v3892_v28 = vld [vmem:[%s4248_s12 + $0xbc] ss:$84 sps:$4 sm:$0xff]  }
  0x25   : > { %3328 = vmatpush3.bf16.msra.mxu0 %v3820_v30  ;;  %v3891_v27 = vld [vmem:[%s4795_s1 + $0x288] sm:$0xff]   ;;  %v3894_v29 = vld [vmem:[%s4248_s12 + $0xc4] ss:$84 sps:$4 sm:$0xff]   ;;  %v3899_v33 = vld [vmem:[%s4795_s1 + $0x2d0] sm:$0xff]  }
  0x26   : > { %3368 = vmatpush3.bf16.msra.mxu1 %v3821_v31  ;;  %3393 = vmatprep.subr.bf16.mxu0 %v3828_v36  ;;  %v3896_v30 = vld [vmem:[%s4248_s12 + $0xb8] ss:$84 sps:$4 sm:$0xff]   ;;  %v3897_v31 = vld [vmem:[%s4248_s12 + $0xc0] ss:$84 sps:$4 sm:$0xff]  }
  0x27   : > { %3433 = vmatprep.subr.bf16.mxu1 %v3829_v37  ;;  %v3901_v35 = vld [vmem:[%s4795_s1 + $0x290] sm:$0xff]   ;;  %v3902_v36 = vld [vmem:[%s4795_s1 + $0x258] sm:$0xff]  }
  0x28   : > { %2185 = vmatmul.mubr.bf16.vlgmr.msra.gmra.mrb[0].mxu0 %v3822_v32  ;;  %v3898_v32 = vld [vmem:[%s4795_s1 + $0x250] sm:$0xff]   ;;  %v3903_v37 = vld [vmem:[%s4795_s1 + $0x2d8] sm:$0xff]  }
  0x29   : > { %2250 = vmatmul.mubr.bf16.vlgmr.msra.gmra.mrb[0].mxu1 %v3825_v34  ;;  %3394 = vmatpush3.bf16.msra.mxu0 %v3830_v38  ;;  %v3900_v34 = vld [vmem:[%s4795_s1 + $0x210] sm:$0xff]   ;;  %v3904_v38 = vld [vmem:[%s4795_s1 + $0x218] sm:$0xff]  }
  0x2a   : > { %3434 = vmatpush3.bf16.msra.mxu1 %v3831_v39  ;;  %3395 = vmatprep.subr.bf16.mxu0 %v3832_v40  ;;  %v3905_v39 = vld [vmem:[%s4795_s1 + $0x298] sm:$0xff]  }
  0x2b   : > { %3435 = vmatprep.subr.bf16.mxu1 %v3833_v41  ;;  %2192 = vmatprep.mubr.bf16.mxu0 %v3836_v44  ;;  %v3906_v40 = vld [vmem:[%s4248_s12 + $0x164] ss:$84 sps:$4 sm:$0xff]   ;;  %v3908_v41 = vld [vmem:[%s4248_s12 + $0x16c] ss:$84 sps:$4 sm:$0xff]  }
  0x2c   : > { %2257 = vmatprep.mubr.bf16.mxu1 %v3838_v45  ;;  %v3912_v44 = vld [vmem:[%s4795_s1 + $0x260] sm:$0xff]  }
  0x2d   : > { %3396 = vmatpush3.bf16.msra.mxu0 %v3834_v42  ;;  %v3910_v42 = vld [vmem:[%s4248_s12 + $0x160] ss:$84 sps:$4 sm:$0xff]  }
  0x2e   : > { %3436 = vmatpush3.bf16.msra.mxu1 %v3835_v43  ;;  %3397 = vmatprep.subr.bf16.mxu0 %v3842_v48  ;;  %v3911_v43 = vld [vmem:[%s4248_s12 + $0x168] ss:$84 sps:$4 sm:$0xff]   ;;  %v3913_v45 = vld [vmem:[%s4795_s1 + $0x2e0] sm:$0xff]  }
  0x2f   : > { %3437 = vmatprep.subr.bf16.mxu1 %v3843_v49  ;;  %v3916_v48 = vld [vmem:[%s4795_s1 + $0x268] sm:$0xff]  }
  0x30   : > { %2193 = vmatmul.mubr.bf16.gmra.mrb[4].mxu0 %v3840_v46  ;;  %v3914_v46 = vld [vmem:[%s4795_s1 + $0x220] sm:$0xff]   ;;  %v3917_v49 = vld [vmem:[%s4795_s1 + $0x2e8] sm:$0xff]  }
  0x31   : > { %2258 = vmatmul.mubr.bf16.gmra.mrb[4].mxu1 %v3841_v47  ;;  %3398 = vmatpush3.bf16.msra.mxu0 %v3844_v50  ;;  %v3915_v47 = vld [vmem:[%s4795_s1 + $0x2a0] sm:$0xff]   ;;  %v3918_v50 = vld [vmem:[%s4795_s1 + $0x228] sm:$0xff]  }
  0x32   : > { %3438 = vmatpush3.bf16.msra.mxu1 %v3845_v51  ;;  %3399 = vmatprep.subr.bf16.mxu0 %v3846_v52  ;;  %v3919_v51 = vld [vmem:[%s4795_s1 + $0x2a8] sm:$0xff]  }
  0x33   : > { %3439 = vmatprep.subr.bf16.mxu1 %v3847_v53  ;;  %2200 = vmatprep.mubr.bf16.mxu0 %v3850_v56  ;;  %v3920_v52 = vld [vmem:[%s4248_s12 + $0x20c] ss:$84 sps:$4 sm:$0xff]   ;;  %v3922_v53 = vld [vmem:[%s4248_s12 + $0x214] ss:$84 sps:$4 sm:$0xff]  }
  0x34   : > { %2265 = vmatprep.mubr.bf16.mxu1 %v3852_v57  ;;  %v3926_v56 = vld [vmem:[%s4795_s1 + $0x270] sm:$0xff]  }
  0x35   : > { %3400 = vmatpush3.bf16.msra.mxu0 %v3848_v54  ;;  %v3924_v54 = vld [vmem:[%s4248_s12 + $0x208] ss:$84 sps:$4 sm:$0xff]   ;;  %v3927_v57 = vld [vmem:[%s4795_s1 + $0x2f0] sm:$0xff]  }
  0x36   : > { %3440 = vmatpush3.bf16.msra.mxu1 %v3849_v55  ;;  %3401 = vmatprep.subr.bf16.mxu0 %v3856_v60  ;;  %v3925_v55 = vld [vmem:[%s4248_s12 + $0x210] ss:$84 sps:$4 sm:$0xff]   ;;  %v3930_v60 = vld [vmem:[%s4795_s1 + $0x278] sm:$0xff]  }
  0x37   : > { %3441 = vmatprep.subr.bf16.mxu1 %v3857_v61  ;;  %v3931_v61 = vld [vmem:[%s4795_s1 + $0x2f8] sm:$0xff]  }
  0x38   : > { %2201 = vmatmul.mubr.bf16.gmra.mrb[8].mxu0 %v3854_v58  ;;  %v3928_v58 = vld [vmem:[%s4795_s1 + $0x230] sm:$0xff]  }
  0x39   : > { %2266 = vmatmul.mubr.bf16.gmra.mrb[8].mxu1 %v3855_v59  ;;  %3402 = vmatpush3.bf16.msra.mxu0 %v3858_v62  ;;  %v3929_v59 = vld [vmem:[%s4795_s1 + $0x2b0] sm:$0xff]   ;;  %v3932_v62 = vld [vmem:[%s4795_s1 + $0x238] sm:$0xff]  }
  0x3a   : > { %3442 = vmatpush3.bf16.msra.mxu1 %v3859_v63  ;;  %3403 = vmatprep.subr.bf16.mxu0 %v3860_v0  ;;  %v3933_v63 = vld [vmem:[%s4795_s1 + $0x2b8] sm:$0xff]   ;;  %v3934_v0 = vld [vmem:[%s4248_s12 + $0x20] ss:$84 sps:$4 sm:$0xff]  }
  0x3b   : > { %3443 = vmatprep.subr.bf16.mxu1 %v3861_v1  ;;  %2208 = vmatprep.mubr.bf16.mxu0 %v3864_v4  ;;  %v3936_v1 = vld [vmem:[%s4248_s12 + $0x24] ss:$84 sps:$4 sm:$0xff]  }
  0x3c   : > { %2273 = vmatprep.mubr.bf16.mxu1 %v3866_v5  ;;  %v3940_v4 = vld [vmem:[%s4795_s1 + $0x340] sm:$0xff]  }
  0x3d   : > { %3404 = vmatpush3.bf16.msra.mxu0 %v3862_v2  ;;  %v3937_v2 = vld [vmem:[%s4248_s12 + $0x28] ss:$84 sps:$4 sm:$0xff]   ;;  %v3941_v5 = vld [vmem:[%s4795_s1 + $0x3c0] sm:$0xff]  }
  0x3e   : > { %3444 = vmatpush3.bf16.msra.mxu1 %v3863_v3  ;;  %3405 = vmatprep.subr.bf16.mxu0 %v3870_v8  ;;  %v3939_v3 = vld [vmem:[%s4248_s12 + $0x2c] ss:$84 sps:$4 sm:$0xff]  }
  0x3f   : > { %3445 = vmatprep.subr.bf16.mxu1 %v3871_v9  ;;  %v3944_v8 = vld [vmem:[%s4795_s1 + $0x348] sm:$0xff]  }
  0x40   : > { %2209 = vmatmul.mubr.bf16.gmra.mrb[12].mxu0 %v3868_v6  ;;  %v3942_v6 = vld [vmem:[%s4795_s1 + $0x300] sm:$0xff]   ;;  %v3945_v9 = vld [vmem:[%s4795_s1 + $0x3c8] sm:$0xff]  }
  0x41   : > { %2274 = vmatmul.mubr.bf16.gmra.mrb[12].mxu1 %v3869_v7  ;;  %3406 = vmatpush3.bf16.msra.mxu0 %v3872_v10  ;;  %v3943_v7 = vld [vmem:[%s4795_s1 + $0x380] sm:$0xff]   ;;  %v3946_v10 = vld [vmem:[%s4795_s1 + $0x308] sm:$0xff]  }
  0x42   : > { %3446 = vmatpush3.bf16.msra.mxu1 %v3873_v11  ;;  %3407 = vmatprep.subr.bf16.mxu0 %v3874_v12  ;;  %v3947_v11 = vld [vmem:[%s4795_s1 + $0x388] sm:$0xff]  }
  0x43   : > { %3447 = vmatprep.subr.bf16.mxu1 %v3875_v13  ;;  %2314 = vmatprep.mubr.bf16.mxu0 %v3880_v17  ;;  %v3948_v12 = vld [vmem:[%s4248_s12 + $0xcc] ss:$84 sps:$4 sm:$0xff]   ;;  %v3950_v13 = vld [vmem:[%s4248_s12 + $0xd4] ss:$84 sps:$4 sm:$0xff]  }
  0x44   : > { %2379 = vmatprep.mubr.bf16.mxu1 %v3883_v19  ;;  %v3955_v17 = vld [vmem:[%s4795_s1 + $0x3d0] sm:$0xff]  }
  0x45   : > { %3408 = vmatpush3.bf16.msra.mxu0 %v3876_v14  ;;  %v3952_v14 = vld [vmem:[%s4248_s12 + $0xc8] ss:$84 sps:$4 sm:$0xff]   ;;  %v3957_v19 = vld [vmem:[%s4795_s1 + $0x390] sm:$0xff]  }
  0x46   : > { %3448 = vmatpush3.bf16.msra.mxu1 %v3877_v15  ;;  %3473 = vmatprep.subr.bf16.mxu0 %v3884_v20  ;;  %v3953_v15 = vld [vmem:[%s4248_s12 + $0xd0] ss:$84 sps:$4 sm:$0xff]   ;;  %v3958_v20 = vld [vmem:[%s4795_s1 + $0x358] sm:$0xff]  }
  0x47   : > { %3513 = vmatprep.subr.bf16.mxu1 %v3885_v21  ;;  %v3959_v21 = vld [vmem:[%s4795_s1 + $0x3d8] sm:$0xff]  }
  0x48   : > { %2315 = vmatmul.mubr.bf16.vlgmr.msra.gmra.mrb[16].mxu0 %v3878_v16  ;;  %v3954_v16 = vld [vmem:[%s4795_s1 + $0x350] sm:$0xff]  }
  0x49   : > { %2380 = vmatmul.mubr.bf16.vlgmr.msra.gmra.mrb[16].mxu1 %v3881_v18  ;;  %3474 = vmatpush3.bf16.msra.mxu0 %v3886_v22  ;;  %v3956_v18 = vld [vmem:[%s4795_s1 + $0x310] sm:$0xff]   ;;  %v3960_v22 = vld [vmem:[%s4795_s1 + $0x318] sm:$0xff]  }
  0x4a   : > { %3514 = vmatpush3.bf16.msra.mxu1 %v3887_v23  ;;  %3475 = vmatprep.subr.bf16.mxu0 %v3888_v24  ;;  %v3961_v23 = vld [vmem:[%s4795_s1 + $0x398] sm:$0xff]   ;;  %v3962_v24 = vld [vmem:[%s4248_s12 + $0x174] ss:$84 sps:$4 sm:$0xff]  }
  0x4b   : > { %3515 = vmatprep.subr.bf16.mxu1 %v3889_v25  ;;  %2322 = vmatprep.mubr.bf16.mxu0 %v3892_v28  ;;  %v3964_v25 = vld [vmem:[%s4248_s12 + $0x17c] ss:$84 sps:$4 sm:$0xff]   ;;  %v3968_v28 = vld [vmem:[%s4795_s1 + $0x360] sm:$0xff]  }
  0x4c   : > { %2387 = vmatprep.mubr.bf16.mxu1 %v3894_v29  ;;  %v3969_v29 = vld [vmem:[%s4795_s1 + $0x3e0] sm:$0xff]  }
  0x4d   : > { %3476 = vmatpush3.bf16.msra.mxu0 %v3890_v26  ;;  %v3966_v26 = vld [vmem:[%s4248_s12 + $0x170] ss:$84 sps:$4 sm:$0xff]  }
  0x4e   : > { %3516 = vmatpush3.bf16.msra.mxu1 %v3891_v27  ;;  %3477 = vmatprep.subr.bf16.mxu0 %v3898_v32  ;;  %v3967_v27 = vld [vmem:[%s4248_s12 + $0x178] ss:$84 sps:$4 sm:$0xff]  }
  0x4f   : > { %3517 = vmatprep.subr.bf16.mxu1 %v3899_v33  ;;  %v3972_v32 = vld [vmem:[%s4795_s1 + $0x368] sm:$0xff]  }
  0x50   : > { %2323 = vmatmul.mubr.bf16.gmra.mrb[20].mxu0 %v3896_v30  ;;  %v3970_v30 = vld [vmem:[%s4795_s1 + $0x320] sm:$0xff]   ;;  %v3973_v33 = vld [vmem:[%s4795_s1 + $0x3e8] sm:$0xff]  }
  0x51   : > { %2388 = vmatmul.mubr.bf16.gmra.mrb[20].mxu1 %v3897_v31  ;;  %3478 = vmatpush3.bf16.msra.mxu0 %v3900_v34  ;;  %v3971_v31 = vld [vmem:[%s4795_s1 + $0x3a0] sm:$0xff]   ;;  %v3974_v34 = vld [vmem:[%s4795_s1 + $0x328] sm:$0xff]  }
  0x52   : > { %3518 = vmatpush3.bf16.msra.mxu1 %v3901_v35  ;;  %3479 = vmatprep.subr.bf16.mxu0 %v3902_v36  ;;  %v3975_v35 = vld [vmem:[%s4795_s1 + $0x3a8] sm:$0xff]   ;;  %v3976_v36 = vld [vmem:[%s4248_s12 + $0x21c] ss:$84 sps:$4 sm:$0xff]  }
  0x53   : > { %3519 = vmatprep.subr.bf16.mxu1 %v3903_v37  ;;  %2330 = vmatprep.mubr.bf16.mxu0 %v3906_v40  ;;  %v3978_v37 = vld [vmem:[%s4248_s12 + $0x224] ss:$84 sps:$4 sm:$0xff]   ;;  %v3982_v40 = vld [vmem:[%s4795_s1 + $0x370] sm:$0xff]  }
  0x54   : > { %2395 = vmatprep.mubr.bf16.mxu1 %v3908_v41  ;;  %v3983_v41 = vld [vmem:[%s4795_s1 + $0x3f0] sm:$0xff]  }
  0x55   : > { %3480 = vmatpush3.bf16.msra.mxu0 %v3904_v38  ;;  %v3980_v38 = vld [vmem:[%s4248_s12 + $0x218] ss:$84 sps:$4 sm:$0xff]  }
  0x56   : > { %3520 = vmatpush3.bf16.msra.mxu1 %v3905_v39  ;;  %3481 = vmatprep.subr.bf16.mxu0 %v3912_v44  ;;  %v3981_v39 = vld [vmem:[%s4248_s12 + $0x220] ss:$84 sps:$4 sm:$0xff]   ;;  %v3986_v44 = vld [vmem:[%s4795_s1 + $0x378] sm:$0xff]  }
  0x57   : > { %3521 = vmatprep.subr.bf16.mxu1 %v3913_v45  ;;  %v3987_v45 = vld [vmem:[%s4795_s1 + $0x3f8] sm:$0xff]  }
  0x58   : > { %2331 = vmatmul.mubr.bf16.gmra.mrb[24].mxu0 %v3910_v42  ;;  %v3984_v42 = vld [vmem:[%s4795_s1 + $0x330] sm:$0xff]  }
  0x59   : > { %2396 = vmatmul.mubr.bf16.gmra.mrb[24].mxu1 %v3911_v43  ;;  %3482 = vmatpush3.bf16.msra.mxu0 %v3914_v46  ;;  %v3985_v43 = vld [vmem:[%s4795_s1 + $0x3b0] sm:$0xff]   ;;  %v3988_v46 = vld [vmem:[%s4795_s1 + $0x338] sm:$0xff]  }
  0x5a   : > { %3522 = vmatpush3.bf16.msra.mxu1 %v3915_v47  ;;  %3483 = vmatprep.subr.bf16.mxu0 %v3916_v48  ;;  %v3989_v47 = vld [vmem:[%s4795_s1 + $0x3b8] sm:$0xff]   ;;  %v3990_v48 = vld [vmem:[%s4248_s12 + $0x30] ss:$84 sps:$4 sm:$0xff]  }
  0x5b   : > { %3523 = vmatprep.subr.bf16.mxu1 %v3917_v49  ;;  %2338 = vmatprep.mubr.bf16.mxu0 %v3920_v52  ;;  %v3992_v49 = vld [vmem:[%s4248_s12 + $0x34] ss:$84 sps:$4 sm:$0xff]   ;;  %v3996_v52 = vld [vmem:[%s4795_s1 + $0x440] sm:$0xff]  }
  0x5c   : > { %2403 = vmatprep.mubr.bf16.mxu1 %v3922_v53  ;;  %v3997_v53 = vld [vmem:[%s4795_s1 + $0x4c0] sm:$0xff]  }
  0x5d   : > { %3484 = vmatpush3.bf16.msra.mxu0 %v3918_v50  ;;  %v3993_v50 = vld [vmem:[%s4248_s12 + $0x38] ss:$84 sps:$4 sm:$0xff]  }
  0x5e   : > { %3524 = vmatpush3.bf16.msra.mxu1 %v3919_v51  ;;  %3485 = vmatprep.subr.bf16.mxu0 %v3926_v56  ;;  %v3995_v51 = vld [vmem:[%s4248_s12 + $0x3c] ss:$84 sps:$4 sm:$0xff]   ;;  %v4000_v56 = vld [vmem:[%s4795_s1 + $0x448] sm:$0xff]  }
  0x5f   : > { %3525 = vmatprep.subr.bf16.mxu1 %v3927_v57  ;;  %v4001_v57 = vld [vmem:[%s4795_s1 + $0x4c8] sm:$0xff]  }
  0x60   : > { %2339 = vmatmul.mubr.bf16.gmra.mrb[28].mxu0 %v3924_v54  ;;  %v3998_v54 = vld [vmem:[%s4795_s1 + $0x400] sm:$0xff]  }
  0x61   : > { %2404 = vmatmul.mubr.bf16.gmra.mrb[28].mxu1 %v3925_v55  ;;  %3486 = vmatpush3.bf16.msra.mxu0 %v3928_v58  ;;  %v3999_v55 = vld [vmem:[%s4795_s1 + $0x480] sm:$0xff]   ;;  %v4002_v58 = vld [vmem:[%s4795_s1 + $0x408] sm:$0xff]  }
  0x62   : > { %3526 = vmatpush3.bf16.msra.mxu1 %v3929_v59  ;;  %3487 = vmatprep.subr.bf16.mxu0 %v3930_v60  ;;  %v4003_v59 = vld [vmem:[%s4795_s1 + $0x488] sm:$0xff]   ;;  %v4004_v60 = vld [vmem:[%s4248_s12 + $0xdc] ss:$84 sps:$4 sm:$0xff]  }
  0x63   : > { %3527 = vmatprep.subr.bf16.mxu1 %v3931_v61  ;;  %2444 = vmatprep.mubr.bf16.mxu0 %v3936_v1  ;;  %v4006_v61 = vld [vmem:[%s4248_s12 + $0xe4] ss:$84 sps:$4 sm:$0xff]   ;;  %v4011_v1 = vld [vmem:[%s4795_s1 + $0x4d0] sm:$0xff]  }
  0x64   : > { %2509 = vmatprep.mubr.bf16.mxu1 %v3939_v3  ;;  %v4013_v3 = vld [vmem:[%s4795_s1 + $0x490] sm:$0xff]  }
  0x65   : > { %3488 = vmatpush3.bf16.msra.mxu0 %v3932_v62  ;;  %v4008_v62 = vld [vmem:[%s4248_s12 + $0xd8] ss:$84 sps:$4 sm:$0xff]  }
  0x66   : > { %3528 = vmatpush3.bf16.msra.mxu1 %v3933_v63  ;;  %3553 = vmatprep.subr.bf16.mxu0 %v3940_v4  ;;  %v4009_v63 = vld [vmem:[%s4248_s12 + $0xe0] ss:$84 sps:$4 sm:$0xff]   ;;  %v4014_v4 = vld [vmem:[%s4795_s1 + $0x458] sm:$0xff]  }
  0x67   : > { %3593 = vmatprep.subr.bf16.mxu1 %v3941_v5  ;;  %v4015_v5 = vld [vmem:[%s4795_s1 + $0x4d8] sm:$0xff]  }
  0x68   : > { %2445 = vmatmul.mubr.bf16.vlgmr.msra.gmra.mrb[32].mxu0 %v3934_v0  ;;  %v4010_v0 = vld [vmem:[%s4795_s1 + $0x450] sm:$0xff]  }
  0x69   : > { %2510 = vmatmul.mubr.bf16.vlgmr.msra.gmra.mrb[32].mxu1 %v3937_v2  ;;  %3554 = vmatpush3.bf16.msra.mxu0 %v3942_v6  ;;  %v4012_v2 = vld [vmem:[%s4795_s1 + $0x410] sm:$0xff]   ;;  %v4016_v6 = vld [vmem:[%s4795_s1 + $0x418] sm:$0xff]  }
  0x6a   : > { %3594 = vmatpush3.bf16.msra.mxu1 %v3943_v7  ;;  %3555 = vmatprep.subr.bf16.mxu0 %v3944_v8  ;;  %v4017_v7 = vld [vmem:[%s4795_s1 + $0x498] sm:$0xff]  }
  0x6b   : > { %3595 = vmatprep.subr.bf16.mxu1 %v3945_v9  ;;  %2452 = vmatprep.mubr.bf16.mxu0 %v3948_v12  ;;  %v4018_v8 = vld [vmem:[%s4248_s12 + $0x184] ss:$84 sps:$4 sm:$0xff]   ;;  %v4020_v9 = vld [vmem:[%s4248_s12 + $0x18c] ss:$84 sps:$4 sm:$0xff]  }
  0x6c   : > { %2517 = vmatprep.mubr.bf16.mxu1 %v3950_v13  ;;  %v4024_v12 = vld [vmem:[%s4795_s1 + $0x460] sm:$0xff]  }
  0x6d   : > { %3556 = vmatpush3.bf16.msra.mxu0 %v3946_v10  ;;  %v4022_v10 = vld [vmem:[%s4248_s12 + $0x180] ss:$84 sps:$4 sm:$0xff]  }
  0x6e   : > { %3596 = vmatpush3.bf16.msra.mxu1 %v3947_v11  ;;  %3557 = vmatprep.subr.bf16.mxu0 %v3954_v16  ;;  %v4023_v11 = vld [vmem:[%s4248_s12 + $0x188] ss:$84 sps:$4 sm:$0xff]   ;;  %v4025_v13 = vld [vmem:[%s4795_s1 + $0x4e0] sm:$0xff]  }
  0x6f   : > { %3597 = vmatprep.subr.bf16.mxu1 %v3955_v17  ;;  %v4028_v16 = vld [vmem:[%s4795_s1 + $0x468] sm:$0xff]  }
  0x70   : > { %2453 = vmatmul.mubr.bf16.gmra.mrb[36].mxu0 %v3952_v14  ;;  %v4026_v14 = vld [vmem:[%s4795_s1 + $0x420] sm:$0xff]   ;;  %v4029_v17 = vld [vmem:[%s4795_s1 + $0x4e8] sm:$0xff]  }
  0x71   : > { %2518 = vmatmul.mubr.bf16.gmra.mrb[36].mxu1 %v3953_v15  ;;  %3558 = vmatpush3.bf16.msra.mxu0 %v3956_v18  ;;  %v4027_v15 = vld [vmem:[%s4795_s1 + $0x4a0] sm:$0xff]   ;;  %v4030_v18 = vld [vmem:[%s4795_s1 + $0x428] sm:$0xff]  }
  0x72   : > { %3598 = vmatpush3.bf16.msra.mxu1 %v3957_v19  ;;  %3559 = vmatprep.subr.bf16.mxu0 %v3958_v20  ;;  %v4031_v19 = vld [vmem:[%s4795_s1 + $0x4a8] sm:$0xff]  }
  0x73   : > { %3599 = vmatprep.subr.bf16.mxu1 %v3959_v21  ;;  %2460 = vmatprep.mubr.bf16.mxu0 %v3962_v24  ;;  %v4032_v20 = vld [vmem:[%s4248_s12 + $0x22c] ss:$84 sps:$4 sm:$0xff]   ;;  %v4034_v21 = vld [vmem:[%s4248_s12 + $0x234] ss:$84 sps:$4 sm:$0xff]  }
  0x74   : > { %2525 = vmatprep.mubr.bf16.mxu1 %v3964_v25  ;;  %v4038_v24 = vld [vmem:[%s4795_s1 + $0x470] sm:$0xff]  }
  0x75   : > { %3560 = vmatpush3.bf16.msra.mxu0 %v3960_v22  ;;  %v4036_v22 = vld [vmem:[%s4248_s12 + $0x228] ss:$84 sps:$4 sm:$0xff]   ;;  %v4039_v25 = vld [vmem:[%s4795_s1 + $0x4f0] sm:$0xff]  }
  0x76   : > { %3600 = vmatpush3.bf16.msra.mxu1 %v3961_v23  ;;  %3561 = vmatprep.subr.bf16.mxu0 %v3968_v28  ;;  %v4037_v23 = vld [vmem:[%s4248_s12 + $0x230] ss:$84 sps:$4 sm:$0xff]   ;;  %v4042_v28 = vld [vmem:[%s4795_s1 + $0x478] sm:$0xff]  }
  0x77   : > { %3601 = vmatprep.subr.bf16.mxu1 %v3969_v29  ;;  %v4043_v29 = vld [vmem:[%s4795_s1 + $0x4f8] sm:$0xff]  }
  0x78   : > { %2461 = vmatmul.mubr.bf16.gmra.mrb[40].mxu0 %v3966_v26  ;;  %v4040_v26 = vld [vmem:[%s4795_s1 + $0x430] sm:$0xff]  }
  0x79   : > { %2526 = vmatmul.mubr.bf16.gmra.mrb[40].mxu1 %v3967_v27  ;;  %3562 = vmatpush3.bf16.msra.mxu0 %v3970_v30  ;;  %v4041_v27 = vld [vmem:[%s4795_s1 + $0x4b0] sm:$0xff]   ;;  %v4044_v30 = vld [vmem:[%s4795_s1 + $0x438] sm:$0xff]  }
  0x7a   : > { %3602 = vmatpush3.bf16.msra.mxu1 %v3971_v31  ;;  %3563 = vmatprep.subr.bf16.mxu0 %v3972_v32  ;;  %v4045_v31 = vld [vmem:[%s4795_s1 + $0x4b8] sm:$0xff]   ;;  %v4046_v32 = vld [vmem:[%s4248_s12 + $0x40] ss:$84 sps:$4 sm:$0xff]  }
  0x7b   : > { %3603 = vmatprep.subr.bf16.mxu1 %v3973_v33  ;;  %2468 = vmatprep.mubr.bf16.mxu0 %v3976_v36  ;;  %v4048_v33 = vld [vmem:[%s4248_s12 + $0x44] ss:$84 sps:$4 sm:$0xff]  }
  0x7c   : > { %2533 = vmatprep.mubr.bf16.mxu1 %v3978_v37  ;;  %v4052_v36 = vld [vmem:[%s4795_s1 + $0x500] sm:$0xff]   ;;  %v4053_v37 = vld [vmem:[%s4795_s1 + $0x508] sm:$0xff]  }
  0x7d   : > { %3564 = vmatpush3.bf16.msra.mxu0 %v3974_v34  ;;  %v4049_v34 = vld [vmem:[%s4248_s12 + $0x48] ss:$84 sps:$4 sm:$0xff]  }
  0x7e   : > { %3604 = vmatpush3.bf16.msra.mxu1 %v3975_v35  ;;  %3565 = vmatprep.subr.bf16.mxu0 %v3982_v40  ;;  %v4051_v35 = vld [vmem:[%s4248_s12 + $0x4c] ss:$84 sps:$4 sm:$0xff]   ;;  %v4058_v40 = vld [vmem:[%s4248_s12 + $0xe8] ss:$84 sps:$4 sm:$0xff]  }
  0x7f   : > { %3605 = vmatprep.subr.bf16.mxu1 %v3983_v41  ;;  %v4059_v41 = vld [vmem:[%s4248_s12 + $0xf0] ss:$84 sps:$4 sm:$0xff]  }
  0x80   : > { %2469 = vmatmul.mubr.bf16.gmra.mrb[44].mxu0 %v3980_v38  ;;  %v4054_v38 = vld [vmem:[%s4248_s12 + $0xec] ss:$84 sps:$4 sm:$0xff]  }
  0x81   : > { %2534 = vmatmul.mubr.bf16.gmra.mrb[44].mxu1 %v3981_v39  ;;  %3566 = vmatpush3.bf16.msra.mxu0 %v3984_v42  ;;  %v4056_v39 = vld [vmem:[%s4248_s12 + $0xf4] ss:$84 sps:$4 sm:$0xff]  }
  0x82   : > { %3606 = vmatpush3.bf16.msra.mxu1 %v3985_v43  ;;  %3567 = vmatprep.subr.bf16.mxu0 %v3986_v44  ;;  %v4060_v42 = vld [vmem:[%s4795_s1 + $0x510] sm:$0xff]  }
  0x83   : > { %3607 = vmatprep.subr.bf16.mxu1 %v3987_v45  ;;  %2574 = vmatprep.mubr.bf16.mxu0 %v3992_v49  ;;  %v4062_v43 = vld [vmem:[%s4248_s12 + $0x194] ss:$84 sps:$4 sm:$0xff]   ;;  %v4064_v44 = vld [vmem:[%s4248_s12 + $0x19c] ss:$84 sps:$4 sm:$0xff]  }
  0x84   : > { %2639 = vmatprep.mubr.bf16.mxu1 %v3995_v51  ;;  %v4061_v45 = vld [vmem:[%s4795_s1 + $0x518] sm:$0xff]   ;;  %v4069_v51 = vld [vmem:[%s4795_s1 + $0x528] sm:$0xff]  }
  0x85   : > { %3568 = vmatpush3.bf16.msra.mxu0 %v3988_v46  ;;  %v4066_v46 = vld [vmem:[%s4248_s12 + $0x190] ss:$84 sps:$4 sm:$0xff]  }
  0x86   : > { %3608 = vmatpush3.bf16.msra.mxu1 %v3989_v47  ;;  %3633 = vmatprep.subr.bf16.mxu0 %v3996_v52  ;;  %v4067_v47 = vld [vmem:[%s4248_s12 + $0x198] ss:$84 sps:$4 sm:$0xff]   ;;  %v4070_v49 = vld [vmem:[%s4248_s12 + $0x23c] ss:$84 sps:$4 sm:$0xff]  }
  0x87   : > { %3673 = vmatprep.subr.bf16.mxu1 %v3997_v53  ;;  %v4074_v52 = vld [vmem:[%s4248_s12 + $0x238] ss:$84 sps:$4 sm:$0xff]   ;;  %v4076_v53 = vld [vmem:[%s4795_s1 + $0x530] sm:$0xff]  }
  0x88   : > { %2575 = vmatmul.mubr.bf16.vlgmr.msra.gmra.mrb[48].mxu0 %v3990_v48  ;;  %v4068_v48 = vld [vmem:[%s4795_s1 + $0x520] sm:$0xff]  }
  0x89   : > { %2640 = vmatmul.mubr.bf16.vlgmr.msra.gmra.mrb[48].mxu1 %v3993_v50  ;;  %3634 = vmatpush3.bf16.msra.mxu0 %v3998_v54  ;;  %v4072_v50 = vld [vmem:[%s4248_s12 + $0x244] ss:$84 sps:$4 sm:$0xff]   ;;  %v4075_v54 = vld [vmem:[%s4248_s12 + $0x240] ss:$84 sps:$4 sm:$0xff]  }
  0x8a   : > { %3674 = vmatpush3.bf16.msra.mxu1 %v3999_v55  ;;  %3635 = vmatprep.subr.bf16.mxu0 %v4000_v56  ;;  %v4078_v55 = vld [vmem:[%s4248_s12 + $0x50] ss:$84 sps:$4 sm:$0xff]   ;;  %v4079_v56 = vld [vmem:[%s4248_s12 + $0x1a0] ss:$84 sps:$4 sm:$0xff]  }
  0x8b   : > { %3675 = vmatprep.subr.bf16.mxu1 %v4001_v57  ;;  %2582 = vmatprep.mubr.bf16.mxu0 %v4004_v60  ;;  %v4077_v57 = vld [vmem:[%s4795_s1 + $0x538] sm:$0xff]  }
  0x8c   : > { %2647 = vmatprep.mubr.bf16.mxu1 %v4006_v61 }
  0x8d   : > { %3636 = vmatpush3.bf16.msra.mxu0 %v4002_v58  ;;  %v4080_v58 = vld [vmem:[%s4248_s12 + $0xf8] ss:$84 sps:$4 sm:$0xff]  }
  0x8e   : > { %3676 = vmatpush3.bf16.msra.mxu1 %v4003_v59  ;;  %3637 = vmatprep.subr.bf16.mxu0 %v4010_v0  ;;  %v4081_v59 = vld [vmem:[%s4248_s12 + $0x248] ss:$84 sps:$4 sm:$0xff]   ;;  %s2868_s12 = sld [smem:[#allocation2]] }
  0x8f   : > { %3677 = vmatprep.subr.bf16.mxu1 %v4011_v1 }
  0x90   : > { %2583 = vmatmul.mubr.bf16.gmra.mrb[52].mxu0 %v4008_v62 }
  0x91   : > { %2648 = vmatmul.mubr.bf16.gmra.mrb[52].mxu1 %v4009_v63  ;;  %3638 = vmatpush3.bf16.msra.mxu0 %v4012_v2 }
  0x92   : > { %3678 = vmatpush3.bf16.msra.mxu1 %v4013_v3  ;;  %3639 = vmatprep.subr.bf16.mxu0 %v4014_v4 }
  0x93   : > { %3679 = vmatprep.subr.bf16.mxu1 %v4015_v5  ;;  %2590 = vmatprep.mubr.bf16.mxu0 %v4018_v8 }
  0x94   : > { %2655 = vmatprep.mubr.bf16.mxu1 %v4020_v9 }
  0x95   : > { %3640 = vmatpush3.bf16.msra.mxu0 %v4016_v6 }
  0x96   : > { %3680 = vmatpush3.bf16.msra.mxu1 %v4017_v7  ;;  %3641 = vmatprep.subr.bf16.mxu0 %v4024_v12 }
  0x97   : > { %3681 = vmatprep.subr.bf16.mxu1 %v4025_v13 }
  0x98   : > { %2591 = vmatmul.mubr.bf16.gmra.mrb[56].mxu0 %v4022_v10 }
  0x99   : > { %2656 = vmatmul.mubr.bf16.gmra.mrb[56].mxu1 %v4023_v11  ;;  %3642 = vmatpush3.bf16.msra.mxu0 %v4026_v14 }
  0x9a   : > { %3682 = vmatpush3.bf16.msra.mxu1 %v4027_v15  ;;  %3643 = vmatprep.subr.bf16.mxu0 %v4028_v16 }
  0x9b   : > { %3683 = vmatprep.subr.bf16.mxu1 %v4029_v17  ;;  %2598 = vmatprep.mubr.bf16.mxu0 %v4032_v20 }
  0x9c   : > { %2663 = vmatprep.mubr.bf16.mxu1 %v4034_v21 }
  0x9d   : > { %3644 = vmatpush3.bf16.msra.mxu0 %v4030_v18 }
  0x9e   : > { %3684 = vmatpush3.bf16.msra.mxu1 %v4031_v19  ;;  %3645 = vmatprep.subr.bf16.mxu0 %v4038_v24 }
  0x9f   : > { %3685 = vmatprep.subr.bf16.mxu1 %v4039_v25 }
  0xa0   : > { %2599 = vmatmul.mubr.bf16.gmra.mrb[60].mxu0 %v4036_v22 }
  0xa1   : > { %2664 = vmatmul.mubr.bf16.gmra.mrb[60].mxu1 %v4037_v23  ;;  %3646 = vmatpush3.bf16.msra.mxu0 %v4040_v26 }
  0xa2   : > { %3686 = vmatpush3.bf16.msra.mxu1 %v4041_v27  ;;  %3647 = vmatprep.subr.bf16.mxu0 %v4042_v28 }
  0xa3   : > { %3687 = vmatprep.subr.bf16.mxu1 %v4043_v29  ;;  %2704 = vmatprep.mubr.bf16.mxu0 %v4048_v33 }
  0xa4   : > { %2769 = vmatprep.mubr.bf16.mxu1 %v4051_v35 }
  0xa5   : > { %3648 = vmatpush3.bf16.msra.mxu0 %v4044_v30 }
  0xa6   : > { %3688 = vmatpush3.bf16.msra.mxu1 %v4045_v31  ;;  %3725 = vmatprep.subr.bf16.mxu0 %v4052_v36 }
  0xa7   : > { %3749 = vmatprep.subr.bf16.mxu1 %v4052_v36 }
  0xa8   : > { %2705 = vmatmul.mubr.bf16.vlgmr.msra.gmra.mrb[64].mxu0 %v4046_v32 }
  0xa9   : > { %2770 = vmatmul.mubr.bf16.vlgmr.msra.gmra.mrb[64].mxu1 %v4049_v34  ;;  %3726 = vmatpush3.bf16.msra.mxu0 %v4052_v36 }
  0xaa   : > { %3757 = vmatpush3.bf16.msra.mxu1 %v4052_v36  ;;  %3727 = vmatprep.subr.bf16.mxu0 %v4053_v37 }
  0xab   : > { %3750 = vmatprep.subr.bf16.mxu1 %v4053_v37  ;;  %2712 = vmatprep.mubr.bf16.mxu0 %v4054_v38 }
  0xac   : > { %2777 = vmatprep.mubr.bf16.mxu1 %v4056_v39 }
  0xad   : > { %3728 = vmatpush3.bf16.msra.mxu0 %v4053_v37 }
  0xae   : > { %3758 = vmatpush3.bf16.msra.mxu1 %v4053_v37  ;;  %3729 = vmatprep.subr.bf16.mxu0 %v4060_v42 }
  0xaf   : > { %3751 = vmatprep.subr.bf16.mxu1 %v4060_v42 }
  0xb0   : > { %2713 = vmatmul.mubr.bf16.gmra.mrb[68].mxu0 %v4058_v40 }
  0xb1   : > { %2778 = vmatmul.mubr.bf16.gmra.mrb[68].mxu1 %v4059_v41  ;;  %2720 = vmatprep.mubr.bf16.mxu0 %v4062_v43 }
  0xb2   : > { %3730 = vmatpush3.bf16.msra.mxu0 %v4060_v42  ;;  %2785 = vmatprep.mubr.bf16.mxu1 %v4064_v44 }
  0xb3   : > { %3759 = vmatpush3.bf16.msra.mxu1 %v4060_v42  ;;  %3731 = vmatprep.subr.bf16.mxu0 %v4061_v45 }
  0xb4   : > { %3752 = vmatprep.subr.bf16.mxu1 %v4061_v45 }
  0xb6   : > { %3732 = vmatpush3.bf16.msra.mxu0 %v4061_v45 }
  0xb7   : > { %3760 = vmatpush3.bf16.msra.mxu1 %v4061_v45  ;;  %3733 = vmatprep.subr.bf16.mxu0 %v4068_v48 }
  0xb8   : > { %2721 = vmatmul.mubr.bf16.gmra.mrb[72].mxu0 %v4066_v46  ;;  %3753 = vmatprep.subr.bf16.mxu1 %v4068_v48 }
  0xb9   : > { %2786 = vmatmul.mubr.bf16.gmra.mrb[72].mxu1 %v4067_v47  ;;  %2728 = vmatprep.mubr.bf16.mxu0 %v4070_v49 }
  0xba   : > { %3734 = vmatpush3.bf16.msra.mxu0 %v4068_v48  ;;  %2793 = vmatprep.mubr.bf16.mxu1 %v4072_v50 }
  0xbb   : > { %3761 = vmatpush3.bf16.msra.mxu1 %v4068_v48  ;;  %3735 = vmatprep.subr.bf16.mxu0 %v4069_v51 }
  0xbc   : > { %3754 = vmatprep.subr.bf16.mxu1 %v4069_v51 }
  0xbe   : > { %3736 = vmatpush3.bf16.msra.mxu0 %v4069_v51 }
  0xbf   : > { %3762 = vmatpush3.bf16.msra.mxu1 %v4069_v51  ;;  %3737 = vmatprep.subr.bf16.mxu0 %v4076_v53 }
  0xc0   : > { %2729 = vmatmul.mubr.bf16.gmra.mrb[76].mxu0 %v4074_v52  ;;  %3755 = vmatprep.subr.bf16.mxu1 %v4076_v53 }
  0xc1   : > { %2794 = vmatmul.mubr.bf16.gmra.mrb[76].mxu1 %v4075_v54  ;;  %3741 = vmatprep.mubr.bf16.mxu0 %v4078_v55 }
  0xc2   : > { %3738 = vmatpush3.bf16.msra.mxu0 %v4076_v53  ;;  %3745 = vmatprep.mubr.bf16.mxu1 %v4079_v56 }
  0xc3   : > { %3763 = vmatpush3.bf16.msra.mxu1 %v4076_v53  ;;  %3739 = vmatprep.subr.bf16.mxu0 %v4077_v57 }
  0xc4   : > { %3756 = vmatprep.subr.bf16.mxu1 %v4077_v57 }
  0xc6   : > { %3740 = vmatpush3.bf16.msra.mxu0 %v4077_v57 }
  0xc7   : > { %3764 = vmatpush3.bf16.msra.mxu1 %v4077_v57 }
  0xc9   : > { %3742 = vmatmul.mubr.bf16.vlgmr.msra.gmra.mrb[80].mxu0 %v4080_v58 }
  0xca   : > { %3746 = vmatmul.mubr.bf16.vlgmr.msra.gmra.mrb[80].mxu1 %v4081_v59 }
  0xfb   : > { %v3329_v60 = vpop.f32.mrb[0].mxu0 }
  0xfc   : > { %v3369_v61 = vpop.f32.mrb[0].mxu1  ;;  %v3330_v62 = vpop.f32.mrb[1].mxu0 }
  0xfd   : > { %v3331_v63 = vadd.f32 %v3330_v62, %v3329_v60  ;;  %v3370_v0 = vpop.f32.mrb[1].mxu1  ;;  %v3332_v1 = vpop.f32.mrb[2].mxu0 }
  0xfe   : > { %v3371_v2 = vadd.f32 %v3370_v0, %v3369_v61  ;;  %v3372_v3 = vpop.f32.mrb[2].mxu1  ;;  %v3333_v4 = vpop.f32.mrb[3].mxu0 }
  0xff   : > { %v3334_v5 = vadd.f32 %v3333_v4, %v3332_v1  ;;  %v3373_v6 = vpop.f32.mrb[3].mxu1 }
 0x100   : > { %v2252_v7 = vadd.f32 %v3371_v2, %v3331_v63  ;;  %v3374_v8 = vadd.f32 %v3373_v6, %v3372_v3 }
 0x102   : > { %v2255_v9 = vadd.f32 %v3374_v8, %v3334_v5 }
 0x103   : > { %v3335_v10 = vpop.f32.mrb[4].mxu0 }
 0x104   : > { %v3375_v11 = vpop.f32.mrb[4].mxu1  ;;  %v3336_v12 = vpop.f32.mrb[5].mxu0 }
 0x105   : > { %v3337_v13 = vadd.f32 %v3336_v12, %v3335_v10  ;;  %v3376_v14 = vpop.f32.mrb[5].mxu1  ;;  %v3338_v15 = vpop.f32.mrb[6].mxu0 }
 0x106   : > { %v3377_v16 = vadd.f32 %v3376_v14, %v3375_v11  ;;  %v3378_v17 = vpop.f32.mrb[6].mxu1  ;;  %v3339_v18 = vpop.f32.mrb[7].mxu0 }
 0x107   : > { %v3340_v19 = vadd.f32 %v3339_v18, %v3338_v15  ;;  %v3379_v20 = vpop.f32.mrb[7].mxu1 }
 0x108   : > { %v2260_v21 = vadd.f32 %v3377_v16, %v3337_v13  ;;  %v3380_v22 = vadd.f32 %v3379_v20, %v3378_v17 }
 0x10a   : > { %v2263_v23 = vadd.f32 %v3380_v22, %v3340_v19 }
 0x10b   : > { %v3341_v24 = vpop.f32.mrb[8].mxu0 }
 0x10c   : > { %v3381_v25 = vpop.f32.mrb[8].mxu1  ;;  %v3342_v26 = vpop.f32.mrb[9].mxu0 }
 0x10d   : > { %v3343_v27 = vadd.f32 %v3342_v26, %v3341_v24  ;;  %v3382_v28 = vpop.f32.mrb[9].mxu1  ;;  %v3344_v29 = vpop.f32.mrb[10].mxu0 }
 0x10e   : > { %v3383_v30 = vadd.f32 %v3382_v28, %v3381_v25  ;;  %v3384_v31 = vpop.f32.mrb[10].mxu1  ;;  %v3345_v32 = vpop.f32.mrb[11].mxu0 }
 0x10f   : > { %v3346_v33 = vadd.f32 %v3345_v32, %v3344_v29  ;;  %v3385_v34 = vpop.f32.mrb[11].mxu1 }
 0x110   : > { %v2268_v35 = vadd.f32 %v3383_v30, %v3343_v27  ;;  %v3386_v36 = vadd.f32 %v3385_v34, %v3384_v31 }
 0x112   : > { %v2271_v37 = vadd.f32 %v3386_v36, %v3346_v33 }
 0x113   : > { %v3347_v38 = vpop.f32.mrb[12].mxu0 }
 0x114   : > { %v3387_v39 = vpop.f32.mrb[12].mxu1  ;;  %v3348_v40 = vpop.f32.mrb[13].mxu0 }
 0x115   : > { %v3388_v41 = vpop.f32.mrb[13].mxu1  ;;  %v3349_v42 = vadd.f32 %v3348_v40, %v3347_v38  ;;  %v3350_v44 = vpop.f32.mrb[14].mxu0 }
 0x116   : > { %v3389_v43 = vadd.f32 %v3388_v41, %v3387_v39  ;;  %v3390_v45 = vpop.f32.mrb[14].mxu1  ;;  %v3351_v46 = vpop.f32.mrb[15].mxu0 }
 0x117   : > { %v3391_v47 = vpop.f32.mrb[15].mxu1  ;;  %v3352_v49 = vadd.f32 %v3351_v46, %v3350_v44 }
 0x118   : > { %v2276_v48 = vadd.f32 %v3389_v43, %v3349_v42  ;;  %v3392_v50 = vadd.f32 %v3391_v47, %v3390_v45 }
 0x11a   : > { %v4748_v51 = vadd.f32 %v3392_v50, %v3352_v49 }
 0x11b   : > { %v3409_v52 = vpop.f32.mrb[16].mxu0 }
 0x11c   : > { %v3410_v53 = vpop.f32.mrb[17].mxu0  ;;  %v3449_v54 = vpop.f32.mrb[16].mxu1 }
 0x11d   : > { %v3411_v55 = vadd.f32 %v3410_v53, %v3409_v52  ;;  %v3412_v56 = vpop.f32.mrb[18].mxu0  ;;  %v3450_v57 = vpop.f32.mrb[17].mxu1 }
 0x11e   : > { %v3413_v58 = vpop.f32.mrb[19].mxu0  ;;  %v3451_v60 = vadd.f32 %v3450_v57, %v3449_v54  ;;  %v3452_v61 = vpop.f32.mrb[18].mxu1 }
 0x11f   : > { %v2317_v59 = vadd.f32 %v3411_v55, %v2252_v7  ;;  %v3414_v62 = vadd.f32 %v3413_v58, %v3412_v56  ;;  %v3453_v63 = vpop.f32.mrb[19].mxu1 }
 0x120   : > { %v3454_v2 = vadd.f32 %v3453_v63, %v3452_v61 }
 0x121   : > { %v2382_v0 = vadd.f32 %v3451_v60, %v2317_v59  ;;  %v2320_v1 = vadd.f32 %v3414_v62, %v2255_v9 }
 0x123   : > { %v4750_v3 = vadd.f32 %v3454_v2, %v2320_v1  ;;  %v3415_v4 = vpop.f32.mrb[20].mxu0 }
 0x124   : > { %v3455_v5 = vpop.f32.mrb[20].mxu1  ;;  %v3416_v6 = vpop.f32.mrb[21].mxu0 }
 0x125   : > { %v3417_v8 = vadd.f32 %v3416_v6, %v3415_v4  ;;  %v3456_v10 = vpop.f32.mrb[21].mxu1  ;;  %v3418_v11 = vpop.f32.mrb[22].mxu0 }
 0x126   : > { %v3457_v12 = vadd.f32 %v3456_v10, %v3455_v5  ;;  %v3458_v13 = vpop.f32.mrb[22].mxu1  ;;  %v3419_v14 = vpop.f32.mrb[23].mxu0 }
 0x127   : > { %v2325_v15 = vadd.f32 %v3417_v8, %v2260_v21  ;;  %v3420_v7 = vadd.f32 %v3419_v14, %v3418_v11  ;;  %v3459_v16 = vpop.f32.mrb[23].mxu1 }
 0x128   : > { %v3460_v17 = vadd.f32 %v3459_v16, %v3458_v13 }
 0x129   : > { %v2390_v18 = vadd.f32 %v3457_v12, %v2325_v15  ;;  %v2328_v19 = vadd.f32 %v3420_v7, %v2263_v23 }
 0x12b   : > { %v4752_v20 = vadd.f32 %v3460_v17, %v2328_v19  ;;  %v3421_v9 = vpop.f32.mrb[24].mxu0 }
 0x12c   : > { %v3461_v22 = vpop.f32.mrb[24].mxu1  ;;  %v3422_v24 = vpop.f32.mrb[25].mxu0 }
 0x12d   : > { %v3462_v25 = vpop.f32.mrb[25].mxu1  ;;  %v3423_v26 = vadd.f32 %v3422_v24, %v3421_v9  ;;  %v3424_v28 = vpop.f32.mrb[26].mxu0 }
 0x12e   : > { %v3463_v27 = vadd.f32 %v3462_v25, %v3461_v22  ;;  %v3464_v29 = vpop.f32.mrb[26].mxu1  ;;  %v3425_v30 = vpop.f32.mrb[27].mxu0 }
 0x12f   : > { %v3465_v31 = vpop.f32.mrb[27].mxu1  ;;  %v2333_v32 = vadd.f32 %v3423_v26, %v2268_v35  ;;  %v3426_v33 = vadd.f32 %v3425_v30, %v3424_v28 }
 0x130   : > { %v3466_v21 = vadd.f32 %v3465_v31, %v3464_v29 }
 0x131   : > { %v2398_v34 = vadd.f32 %v3463_v27, %v2333_v32  ;;  %v2336_v36 = vadd.f32 %v3426_v33, %v2271_v37 }
 0x133   : > { %v4754_v38 = vadd.f32 %v3466_v21, %v2336_v36  ;;  %v3427_v23 = vpop.f32.mrb[28].mxu0 }
 0x134   : > { %v3467_v39 = vpop.f32.mrb[28].mxu1  ;;  %v3428_v40 = vpop.f32.mrb[29].mxu0 }
 0x135   : > { %v3429_v41 = vadd.f32 %v3428_v40, %v3427_v23  ;;  %v3468_v42 = vpop.f32.mrb[29].mxu1  ;;  %v3430_v43 = vpop.f32.mrb[30].mxu0 }
 0x136   : > { %v3469_v44 = vadd.f32 %v3468_v42, %v3467_v39  ;;  %v3470_v45 = vpop.f32.mrb[30].mxu1  ;;  %v3431_v46 = vpop.f32.mrb[31].mxu0 }
 0x137   : > { %v2341_v47 = vadd.f32 %v3429_v41, %v2276_v48  ;;  %v3432_v49 = vadd.f32 %v3431_v46, %v3430_v43  ;;  %v3471_v50 = vpop.f32.mrb[31].mxu1 }
 0x138   : > { %v3472_v52 = vadd.f32 %v3471_v50, %v3470_v45 }
 0x139   : > { %v2406_v35 = vadd.f32 %v3469_v44, %v2341_v47  ;;  %v2344_v53 = vadd.f32 %v3432_v49, %v4748_v51 }
 0x13b   : > { %v4757_v54 = vadd.f32 %v3472_v52, %v2344_v53  ;;  %v3489_v37 = vpop.f32.mrb[32].mxu0 }
 0x13c   : > { %v3529_v55 = vpop.f32.mrb[32].mxu1  ;;  %v3490_v56 = vpop.f32.mrb[33].mxu0 }
 0x13d   : > { %v3491_v57 = vadd.f32 %v3490_v56, %v3489_v37  ;;  %v3530_v58 = vpop.f32.mrb[33].mxu1  ;;  %v3492_v59 = vpop.f32.mrb[34].mxu0 }
 0x13e   : > { %v3531_v60 = vadd.f32 %v3530_v58, %v3529_v55  ;;  %v3532_v61 = vpop.f32.mrb[34].mxu1  ;;  %v3493_v62 = vpop.f32.mrb[35].mxu0 }
 0x13f   : > { %v2447_v63 = vadd.f32 %v3491_v57, %v2382_v0  ;;  %v3494_v1 = vadd.f32 %v3493_v62, %v3492_v59  ;;  %v3533_v48 = vpop.f32.mrb[35].mxu1 }
 0x140   : > { %v3534_v2 = vadd.f32 %v3533_v48, %v3532_v61 }
 0x141   : > { %v2512_v4 = vadd.f32 %v3531_v60, %v2447_v63  ;;  %v2450_v5 = vadd.f32 %v3494_v1, %v4750_v3 }
 0x143   : > { %v4760_v6 = vadd.f32 %v3534_v2, %v2450_v5  ;;  %v3495_v51 = vpop.f32.mrb[36].mxu0 }
 0x144   : > { %v3535_v8 = vpop.f32.mrb[36].mxu1  ;;  %v3496_v10 = vpop.f32.mrb[37].mxu0 }
 0x145   : > { %v3536_v11 = vpop.f32.mrb[37].mxu1  ;;  %v3497_v12 = vadd.f32 %v3496_v10, %v3495_v51  ;;  %v3498_v14 = vpop.f32.mrb[38].mxu0 }
 0x146   : > { %v3537_v13 = vadd.f32 %v3536_v11, %v3535_v8  ;;  %v3538_v15 = vpop.f32.mrb[38].mxu1  ;;  %v3499_v7 = vpop.f32.mrb[39].mxu0 }
 0x147   : > { %v3539_v16 = vpop.f32.mrb[39].mxu1  ;;  %v2455_v17 = vadd.f32 %v3497_v12, %v2390_v18  ;;  %v3500_v0 = vadd.f32 %v3499_v7, %v3498_v14 }
 0x148   : > { %v3540_v19 = vadd.f32 %v3539_v16, %v3538_v15 }
 0x149   : > { %v2520_v9 = vadd.f32 %v3537_v13, %v2455_v17  ;;  %v2458_v22 = vadd.f32 %v3500_v0, %v4752_v20 }
 0x14b   : > { %v4763_v24 = vadd.f32 %v3540_v19, %v2458_v22  ;;  %v3501_v3 = vpop.f32.mrb[40].mxu0 }
 0x14c   : > { %v3541_v25 = vpop.f32.mrb[40].mxu1  ;;  %v3502_v26 = vpop.f32.mrb[41].mxu0 }
 0x14d   : > { %v3503_v27 = vadd.f32 %v3502_v26, %v3501_v3  ;;  %v3542_v28 = vpop.f32.mrb[41].mxu1  ;;  %v3504_v29 = vpop.f32.mrb[42].mxu0 }
 0x14e   : > { %v3543_v30 = vadd.f32 %v3542_v28, %v3541_v25  ;;  %v3544_v31 = vpop.f32.mrb[42].mxu1  ;;  %v3505_v32 = vpop.f32.mrb[43].mxu0 }
 0x14f   : > { %v2463_v33 = vadd.f32 %v3503_v27, %v2398_v34  ;;  %v3506_v21 = vadd.f32 %v3505_v32, %v3504_v29  ;;  %v3545_v36 = vpop.f32.mrb[43].mxu1 }
 0x150   : > { %v3546_v18 = vadd.f32 %v3545_v36, %v3544_v31 }
 0x151   : > { %v2528_v23 = vadd.f32 %v3543_v30, %v2463_v33  ;;  %v2466_v39 = vadd.f32 %v3506_v21, %v4754_v38 }
 0x153   : > { %v4766_v40 = vadd.f32 %v3546_v18, %v2466_v39  ;;  %v3507_v20 = vpop.f32.mrb[44].mxu0 }
 0x154   : > { %v3547_v41 = vpop.f32.mrb[44].mxu1  ;;  %v3508_v42 = vpop.f32.mrb[45].mxu0 }
 0x155   : > { %v3509_v43 = vadd.f32 %v3508_v42, %v3507_v20  ;;  %v3548_v44 = vpop.f32.mrb[45].mxu1  ;;  %v3510_v45 = vpop.f32.mrb[46].mxu0 }
 0x156   : > { %v3549_v46 = vadd.f32 %v3548_v44, %v3547_v41  ;;  %v3550_v47 = vpop.f32.mrb[46].mxu1  ;;  %v3511_v49 = vpop.f32.mrb[47].mxu0 }
 0x157   : > { %v2471_v50 = vadd.f32 %v3509_v43, %v2406_v35  ;;  %v3512_v52 = vadd.f32 %v3511_v49, %v3510_v45  ;;  %v3551_v34 = vpop.f32.mrb[47].mxu1 }
 0x158   : > { %v3552_v53 = vadd.f32 %v3551_v34, %v3550_v47 }
 0x159   : > { %v2536_v37 = vadd.f32 %v3549_v46, %v2471_v50  ;;  %v2474_v55 = vadd.f32 %v3512_v52, %v4757_v54 }
 0x15b   : > { %v4769_v56 = vadd.f32 %v3552_v53, %v2474_v55  ;;  %v3569_v38 = vpop.f32.mrb[48].mxu0 }
 0x15c   : > { %v3609_v57 = vpop.f32.mrb[48].mxu1  ;;  %v3570_v58 = vpop.f32.mrb[49].mxu0 }
 0x15d   : > { %v3571_v59 = vadd.f32 %v3570_v58, %v3569_v38  ;;  %v3610_v60 = vpop.f32.mrb[49].mxu1  ;;  %v3572_v61 = vpop.f32.mrb[50].mxu0 }
 0x15e   : > { %v3611_v62 = vadd.f32 %v3610_v60, %v3609_v57  ;;  %v3612_v63 = vpop.f32.mrb[50].mxu1  ;;  %v3573_v1 = vpop.f32.mrb[51].mxu0 }
 0x15f   : > { %v2577_v48 = vadd.f32 %v3571_v59, %v2512_v4  ;;  %v3574_v2 = vadd.f32 %v3573_v1, %v3572_v61  ;;  %v3613_v35 = vpop.f32.mrb[51].mxu1 }
 0x160   : > { %v3614_v5 = vadd.f32 %v3613_v35, %v3612_v63 }
 0x161   : > { %v2642_v51 = vadd.f32 %v3611_v62, %v2577_v48  ;;  %v2580_v8 = vadd.f32 %v3574_v2, %v4760_v6 }
 0x163   : > { %v2645_v10 = vadd.f32 %v3614_v5, %v2580_v8  ;;  %v3575_v54 = vpop.f32.mrb[52].mxu0 }
 0x164   : > { %v3615_v11 = vpop.f32.mrb[52].mxu1  ;;  %v3576_v12 = vpop.f32.mrb[53].mxu0 }
 0x165   : > { %v3577_v13 = vadd.f32 %v3576_v12, %v3575_v54  ;;  %v3616_v14 = vpop.f32.mrb[53].mxu1  ;;  %v3578_v15 = vpop.f32.mrb[54].mxu0 }
 0x166   : > { %v3617_v7 = vadd.f32 %v3616_v14, %v3615_v11  ;;  %v3618_v16 = vpop.f32.mrb[54].mxu1  ;;  %v3579_v17 = vpop.f32.mrb[55].mxu0 }
 0x167   : > { %v2585_v0 = vadd.f32 %v3577_v13, %v2520_v9  ;;  %v3580_v19 = vadd.f32 %v3579_v17, %v3578_v15  ;;  %v3619_v22 = vpop.f32.mrb[55].mxu1 }
 0x168   : > { %v3620_v4 = vadd.f32 %v3619_v22, %v3618_v16 }
 0x169   : > { %v2650_v3 = vadd.f32 %v3617_v7, %v2585_v0  ;;  %v2588_v25 = vadd.f32 %v3580_v19, %v4763_v24 }
 0x16b   : > { %v2653_v26 = vadd.f32 %v3620_v4, %v2588_v25  ;;  %v3581_v27 = vpop.f32.mrb[56].mxu0 }
 0x16c   : > { %v3621_v6 = vpop.f32.mrb[56].mxu1  ;;  %v3582_v28 = vpop.f32.mrb[57].mxu0 }
 0x16d   : > { %v3583_v29 = vadd.f32 %v3582_v28, %v3581_v27  ;;  %v3622_v30 = vpop.f32.mrb[57].mxu1  ;;  %v3584_v31 = vpop.f32.mrb[58].mxu0 }
 0x16e   : > { %v3623_v32 = vadd.f32 %v3622_v30, %v3621_v6  ;;  %v3624_v33 = vpop.f32.mrb[58].mxu1  ;;  %v3585_v21 = vpop.f32.mrb[59].mxu0 }
 0x16f   : > { %v2593_v36 = vadd.f32 %v3583_v29, %v2528_v23  ;;  %v3586_v18 = vadd.f32 %v3585_v21, %v3584_v31  ;;  %v3625_v39 = vpop.f32.mrb[59].mxu1 }
 0x170   : > { %v3626_v9 = vadd.f32 %v3625_v39, %v3624_v33 }
 0x171   : > { %v2658_v20 = vadd.f32 %v3623_v32, %v2593_v36  ;;  %v2596_v41 = vadd.f32 %v3586_v18, %v4766_v40 }
 0x173   : > { %v2661_v42 = vadd.f32 %v3626_v9, %v2596_v41  ;;  %v3587_v43 = vpop.f32.mrb[60].mxu0 }
 0x174   : > { %v3627_v24 = vpop.f32.mrb[60].mxu1  ;;  %v3588_v44 = vpop.f32.mrb[61].mxu0 }
 0x175   : > { %v3628_v45 = vpop.f32.mrb[61].mxu1  ;;  %v3589_v46 = vadd.f32 %v3588_v44, %v3587_v43  ;;  %v3590_v49 = vpop.f32.mrb[62].mxu0 }
 0x176   : > { %v3629_v47 = vadd.f32 %v3628_v45, %v3627_v24  ;;  %v3630_v50 = vpop.f32.mrb[62].mxu1  ;;  %v3591_v52 = vpop.f32.mrb[63].mxu0 }
 0x177   : > { %v3631_v34 = vpop.f32.mrb[63].mxu1  ;;  %v2601_v53 = vadd.f32 %v3589_v46, %v2536_v37  ;;  %v3592_v55 = vadd.f32 %v3591_v52, %v3590_v49 }
 0x178   : > { %v3632_v23 = vadd.f32 %v3631_v34, %v3630_v50 }
 0x179   : > { %v2666_v38 = vadd.f32 %v3629_v47, %v2601_v53  ;;  %v2604_v57 = vadd.f32 %v3592_v55, %v4769_v56 }
 0x17b   : > { %v2669_v58 = vadd.f32 %v3632_v23, %v2604_v57  ;;  %v3649_v59 = vpop.f32.mrb[64].mxu0 }
 0x17c   : > { %v3650_v40 = vpop.f32.mrb[65].mxu0  ;;  %v3689_v60 = vpop.f32.mrb[64].mxu1 }
 0x17d   : > { %v3651_v61 = vadd.f32 %v3650_v40, %v3649_v59  ;;  %v3652_v62 = vpop.f32.mrb[66].mxu0  ;;  %v3690_v63 = vpop.f32.mrb[65].mxu1 }
 0x17e   : > { %v3653_v1 = vpop.f32.mrb[67].mxu0  ;;  %v3691_v2 = vadd.f32 %v3690_v63, %v3689_v60  ;;  %v3692_v35 = vpop.f32.mrb[66].mxu1 }
 0x17f   : > { %v2707_v48 = vadd.f32 %v3651_v61, %v2642_v51  ;;  %v3654_v5 = vadd.f32 %v3653_v1, %v3652_v62  ;;  %v3693_v8 = vpop.f32.mrb[67].mxu1  ;;  %v3301_v61 = vld [vmem:[%s4796_s2] ss:$0 sm:$0xff] }
 0x180   : > { %v3694_v37 = vadd.f32 %v3693_v8, %v3692_v35 }
 0x181   : > { %v2710_v54 = vadd.f32 %v3654_v5, %v2645_v10  ;;  %v2772_v11 = vadd.f32 %v3691_v2, %v2707_v48  ;;  %v2879_v48 = vstv %s2868_s12 }
 0x183   : > { %v3655_v12 = vpop.f32.mrb[68].mxu0  ;;  %v4775_v13 = vadd.f32 %v3694_v37, %v2710_v54 }
 0x184   : > { %v3656_v56 = vpop.f32.mrb[69].mxu0  ;;  %v3695_v14 = vpop.f32.mrb[68].mxu1 }
 0x185   : > { %v3657_v15 = vadd.f32 %v3656_v56, %v3655_v12  ;;  %v3658_v7 = vpop.f32.mrb[70].mxu0  ;;  %v3696_v16 = vpop.f32.mrb[69].mxu1 }
 0x186   : > { %v3659_v17 = vpop.f32.mrb[71].mxu0  ;;  %v3697_v19 = vadd.f32 %v3696_v16, %v3695_v14  ;;  %v3698_v22 = vpop.f32.mrb[70].mxu1 }
 0x187   : > { %v2715_v0 = vadd.f32 %v3657_v15, %v2650_v3  ;;  %v3660_v51 = vadd.f32 %v3659_v17, %v3658_v7  ;;  %v3699_v4 = vpop.f32.mrb[71].mxu1 }
 0x188   : > { %v3700_v27 = vadd.f32 %v3699_v4, %v3698_v22 }
 0x189   : > { %v2718_v25 = vadd.f32 %v3660_v51, %v2653_v26  ;;  %v2780_v6 = vadd.f32 %v3697_v19, %v2715_v0 }
 0x18b   : > { %v3661_v10 = vpop.f32.mrb[72].mxu0  ;;  %v2783_v28 = vadd.f32 %v3700_v27, %v2718_v25 }
 0x18c   : > { %v3662_v29 = vpop.f32.mrb[73].mxu0  ;;  %v3701_v30 = vpop.f32.mrb[72].mxu1 }
 0x18d   : > { %v3663_v31 = vadd.f32 %v3662_v29, %v3661_v10  ;;  %v3664_v32 = vpop.f32.mrb[74].mxu0  ;;  %v3702_v33 = vpop.f32.mrb[73].mxu1 }
 0x18e   : > { %v3665_v21 = vpop.f32.mrb[75].mxu0  ;;  %v3703_v18 = vadd.f32 %v3702_v33, %v3701_v30  ;;  %v3704_v39 = vpop.f32.mrb[74].mxu1 }
 0x18f   : > { %v2723_v36 = vadd.f32 %v3663_v31, %v2658_v20  ;;  %v3666_v9 = vadd.f32 %v3665_v21, %v3664_v32  ;;  %v3705_v3 = vpop.f32.mrb[75].mxu1 }
 0x190   : > { %v3706_v43 = vadd.f32 %v3705_v3, %v3704_v39 }
 0x191   : > { %v2726_v41 = vadd.f32 %v3666_v9, %v2661_v42  ;;  %v2788_v24 = vadd.f32 %v3703_v18, %v2723_v36 }
 0x193   : > { %v3667_v44 = vpop.f32.mrb[76].mxu0  ;;  %v2791_v26 = vadd.f32 %v3706_v43, %v2726_v41 }
 0x194   : > { %v3668_v45 = vpop.f32.mrb[77].mxu0  ;;  %v3707_v46 = vpop.f32.mrb[76].mxu1 }
 0x195   : > { %v3669_v47 = vadd.f32 %v3668_v45, %v3667_v44  ;;  %v3670_v49 = vpop.f32.mrb[78].mxu0  ;;  %v3708_v50 = vpop.f32.mrb[77].mxu1 }
 0x196   : > { %v3671_v52 = vpop.f32.mrb[79].mxu0  ;;  %v3709_v53 = vadd.f32 %v3708_v50, %v3707_v46  ;;  %v3710_v55 = vpop.f32.mrb[78].mxu1 }
 0x197   : > { %v2731_v34 = vadd.f32 %v3669_v47, %v2666_v38  ;;  %v3672_v23 = vadd.f32 %v3671_v52, %v3670_v49  ;;  %v3711_v20 = vpop.f32.mrb[79].mxu1 }
 0x198   : > { %v3712_v59 = vadd.f32 %v3711_v20, %v3710_v55 }
 0x199   : > { %v2734_v57 = vadd.f32 %v3672_v23, %v2669_v58  ;;  %v2796_v40 = vadd.f32 %v3709_v53, %v2731_v34 }
 0x19b   : > { %v2799_v42 = vadd.f32 %v3712_v59, %v2734_v57 }
 0x19c   : > { %v3743_v60 = vpop.f32.mrb[80].mxu0 }
 0x19d   : > { %v2845_v62 = vadd.f32 %v3743_v60, %v2780_v6  ;;  %v3747_v63 = vpop.f32.mrb[80].mxu1  ;;  %v2836_v1 = vpop.f32.mrb[81].mxu0 }
 0x19e   : > { %v2861_v2 = vadd.f32 %v3747_v63, %v2796_v40  ;;  %v2837_v38 = vadd.f32 %v2836_v1, %v2772_v11  ;;  %v2852_v35 = vpop.f32.mrb[81].mxu1  ;;  %v3744_v5 = vpop.f32.mrb[82].mxu0 }
 0x19f   : > { %v2884_v8 = vadd.f32 %v3301_v61, %v2845_v62  ;;  %v2853_v54 = vadd.f32 %v2852_v35, %v2788_v24  ;;  %v2848_v58 = vadd.f32 %v3744_v5, %v2783_v28  ;;  %v3748_v37 = vpop.f32.mrb[82].mxu1  ;;  %v2839_v12 = vpop.f32.mrb[83].mxu0 }
 0x1a0   : > { %v2902_v56 = vadd.f32 %v3301_v61, %v2861_v2  ;;  %v2875_v14 = vadd.f32 %v3301_v61, %v2837_v38  ;;  %v2864_v15 = vadd.f32 %v3748_v37, %v2799_v42  ;;  %v2840_v7 = vadd.f32 %v2839_v12, %v4775_v13  ;;  %v2855_v16 = vpop.f32.mrb[83].mxu1 }
 0x1a1   : > { %vm2886_vm0 = vcmp.ge.f32.partialorder %v2884_v8, 0.0  ;;  %v2888_v17 = vmul.f32 %v2884_v8, %v2879_v48  ;;  %v2894_v0 = vadd.f32 %v3301_v61, %v2853_v54  ;;  %v2885_v19 = vadd.f32 %v3301_v61, %v2848_v58 }
 0x1a2   : > { %vm2904_vm1 = vcmp.ge.f32.partialorder %v2902_v56, 0.0  ;;  %v2906_v11 = vmul.f32 %v2902_v56, %v2879_v48  ;;  %vm2877_vm2 = vcmp.ge.f32.partialorder %v2875_v14, 0.0  ;;  %v2880_v22 = vmul.f32 %v2879_v48, %v2875_v14 }
 0x1a3   : > { %v2890_v51 = vsel %vm2886_vm0, %v2884_v8, %v2888_v17  ;;  %vm2896_vm3 = vcmp.ge.f32.partialorder %v2894_v0, 0.0  ;;  %v2898_v4 = vmul.f32 %v2894_v0, %v2879_v48  ;;  %vm2887_vm4 = vcmp.ge.f32.partialorder %v2885_v19, 0.0 }
 0x1a4   : > { %v2908_v25 = vsel %vm2904_vm1, %v2902_v56, %v2906_v11  ;;  %v2882_v27 = vsel %vm2877_vm2, %v2875_v14, %v2880_v22  ;;  %v2889_v6 = vmul.f32 %v2885_v19, %v2879_v48  ;;  %v2903_v10 = vadd.f32 %v3301_v61, %v2864_v15 }
 0x1a5   : > { %v2892_v13 = vmax.f32 %v2882_v27, %v2890_v51  ;;  %v2900_v28 = vsel %vm2896_vm3, %v2894_v0, %v2898_v4  ;;  %v2876_v29 = vadd.f32 %v3301_v61, %v2840_v7  ;;  %v2856_v30 = vadd.f32 %v2855_v16, %v2791_v26 }
 0x1a6   : > { %v2910_v31 = vmax.f32 %v2900_v28, %v2908_v25  ;;  %vm2905_vm5 = vcmp.ge.f32.partialorder %v2903_v10, 0.0  ;;  %v2907_v32 = vmul.f32 %v2903_v10, %v2879_v48  ;;  %v2891_v33 = vsel %vm2887_vm4, %v2885_v19, %v2889_v6 }
 0x1a7   : > { %vm2878_vm6 = vcmp.ge.f32.partialorder %v2876_v29, 0.0  ;;  %v2881_v21 = vmul.f32 %v2879_v48, %v2876_v29  ;;  %v2895_v36 = vadd.f32 %v3301_v61, %v2856_v30 }
 0x1a8   : > { %v2912_v18 = vmax.f32 %v2892_v13, %v2910_v31  ;;  %v2909_v39 = vsel %vm2905_vm5, %v2903_v10, %v2907_v32 }
 0x1a9   : > { %v2883_v9 = vsel %vm2878_vm6, %v2876_v29, %v2881_v21  ;;  %vm2897_vm7 = vcmp.ge.f32.partialorder %v2895_v36, 0.0  ;;  %v2899_v3 = vmul.f32 %v2895_v36, %v2879_v48 }
 0x1aa   : > { %v2893_v41 = vmax.f32 %v2883_v9, %v2891_v33 }
 0x1ab   : > { %v2901_v43 = vsel %vm2897_vm7, %v2895_v36, %v2899_v3 }
 0x1ac   : > { %v2911_v24 = vmax.f32 %v2901_v43, %v2909_v39 }
 0x1ae   : > { %v2913_v44 = vmax.f32 %v2893_v41, %v2911_v24 }
 0x1b0   : > { %v3311_v26 = vpack.c.bf16 %v2913_v44, %v2912_v18 }
 0x1b2   : > { %3312 = vst [vmem:[%s293_s8] sm:$0xff] %v3311_v26  }
 0x1b3 PF: > { %s15_s19 = sadd.s32 1, %s4104_s19   ;;  %s4799_s17 = smov %s4100_s18 }
 0x1b4   : > { %p12_p6 = scmp.ge.s32.totalorder %s15_s19, 4   ;;  %s4800_s18 = smov %s4802_s3 }
 0x1b6   :  { %14 = sbr.rel (!%p12_p6) target bundleno = 2 (0x2), region = 72 }

</bundles_post_ra>
